<compile_context>
chip_gen: v6e
topology: v6e:2x2x1
jax: 0.10.0
libtpu: 0.0.40
codegen_flags: <defaults>
</compile_context>

<pallas_src>
import numpy as np

import jax
import jax.numpy as jnp
from jax.experimental import pallas as pl
from jax.experimental.pallas import tpu as pltpu


# ----------------------------------------------------------------------------
# Static 0/1 decimation selectors (stride 2, kernel 3, pad 1 folded in).
# ----------------------------------------------------------------------------
def _col_selector(w_in, w_out, n_frames):
    """cs[kw, (n, w), (n, j)] = 1 iff w == 2*j + kw - 1 (zero pad implicit)."""
    cs = np.zeros((3, n_frames * w_in, n_frames * w_out), np.float32)
    for kw in range(3):
        for j in range(w_out):
            w = 2 * j + kw - 1
            if 0 <= w < w_in:
                for f in range(n_frames):
                    cs[kw, f * w_in + w, f * w_out + j] = 1.0
    return cs


def _row_selector(h_in, h_out):
    """rs[kh, i, h] = 1 iff h == 2*i + kh - 1 (zero pad implicit)."""
    rs = np.zeros((3, h_out, h_in), np.float32)
    for kh in range(3):
        for i in range(h_out):
            h = 2 * i + kh - 1
            if 0 <= h < h_in:
                rs[kh, i, h] = 1.0
    return rs


# ----------------------------------------------------------------------------
# The single fused kernel (one grid step = one batch element).
# ----------------------------------------------------------------------------
def _fused_kernel(x_ref, cs1_ref, m1_ref, b1_ref, cs2_ref, m2_ref, b2_ref,
                  cs3_ref, m3_ref, b3_ref, selq_ref, wqkv_ref, bqkv_ref,
                  seg_ref, segt_ref, wz_ref, bz_ref, z_ref):
    def dot(a, b):
        return jnp.dot(a, b, preferred_element_type=jnp.float32)

    def conv_layer(a, cs_ref, m_ref, b_ref):
        # a:      (C_in*H_in,  nL*W_in)   activation, rows (c, h), cols (n, w)
        # cs_ref: (3, nL*W_in, nL*W_out)  per-kw column decimation (0/1)
        # m_ref:  (3, C_out*H_out, C_in*H_in)  per-kw folded (row-decim x taps x BN)
        # b_ref:  (C_out*H_out, 1)        folded conv+BN bias
        out = None
        for kw in range(cs_ref.shape[0]):
            y = dot(a, cs_ref[kw])          # column / tap-kw selection
            t = dot(m_ref[kw], y)           # row selection + weights + BN scale
            out = t if out is None else out + t
        return out + b_ref[...]

    a = x_ref[0]                                      # (C*H, nL*W) = (192, 256)
    a = conv_layer(a, cs1_ref, m1_ref, b1_ref)        # (6*16, 8*16) = (96, 128)
    a = conv_layer(a, cs2_ref, m2_ref, b2_ref)        # (4*8,  8*8)  = (32, 64)
    a = conv_layer(a, cs3_ref, m3_ref, b3_ref)        # (4*4,  8*4)  = (16, 32)

    # Fused QKV projection straight off the conv3 layout (rows (co,i), cols
    # (n,j)), kept transposed: qkv_t[f, n].  q rows/bias are pre-scaled by
    # 1/sqrt(head_dim) in the wrapper.
    qkv_t = None
    for j in range(selq_ref.shape[0]):
        cols = dot(a, selq_ref[j])                    # (C3*h3, nL) frame columns of j
        t = dot(wqkv_ref[j], cols)                    # (3E, nL)
        qkv_t = t if qkv_t is None else qkv_t + t
    qkv_t = qkv_t + bqkv_ref[...]                     # (3E, nL)

    e = seg_ref.shape[0]                              # embed dim E
    l = selq_ref.shape[2]                             # sequence length nL
    q_last = qkv_t[0:e, l - 1:l]                      # (E, 1) last query only
    k_t = qkv_t[e:2 * e, :]                           # (E, L)
    v_t = qkv_t[2 * e:3 * e, :]                       # (E, L)

    # Per-head scores for the last query: s[h, l] = <q_last_h, k_{l,h}>
    s = dot(segt_ref[...], q_last * k_t)              # (H, L)
    s = s - jnp.max(s, axis=1, keepdims=True)
    probs = jnp.exp(s)
    probs = probs / jnp.sum(probs, axis=1, keepdims=True)   # exact softmax divide

    # Expand head weights back to feature space and combine values.
    p_e = dot(seg_ref[...], probs)                    # (E, L): p_e[e, l] = p[head(e), l]
    o_t = jnp.sum(p_e * v_t, axis=1, keepdims=True)   # (E, 1)

    # out_proj + BatchNorm1d + final Linear composed into one (1, E) vector.
    z = dot(wz_ref[...], o_t) + bz_ref[...]           # (1, 1)
    z_ref[...] = jax.nn.sigmoid(z).reshape(1, 1, 1)


# ----------------------------------------------------------------------------
# One-time parameter preparation (BN folding, selectors, fused projections).
# ----------------------------------------------------------------------------
def prepare_kernel_params(p, *, num_heads, n_l, height, eps=1e-5):
    h1 = height
    h2, h3, h4 = h1 // 2, h1 // 4, h1 // 8
    c3 = p['w3'].shape[0]
    e = c3 * h4 * h4
    dh = e // num_heads
    scale = 1.0 / float(dh) ** 0.5

    def fold(w, b, g, be, m, v, h_in):
        c_out, c_in = w.shape[0], w.shape[1]
        h_out = h_in // 2
        s = g * jax.lax.rsqrt(v + eps)
        w_f = w * s[:, None, None, None]
        b_f = (b - m) * s + be
        rs = jnp.asarray(_row_selector(h_in, h_out))                 # (3, ho, hi)
        # M[kw, (co,i), (c,h)] = sum_kh w_f[co,c,kh,kw] * rs[kh,i,h]
        mm = jnp.einsum('ockw,kih->woich', w_f, rs).reshape(
            3, c_out * h_out, c_in * h_in)
        cs = jnp.asarray(_col_selector(h_in, h_out, n_l))            # (3, nL*hi, nL*ho)
        b_row = jnp.repeat(b_f, h_out)[:, None]                      # (c_out*h_out, 1)
        return cs, mm, b_row

    cs1, m1, b1 = fold(p['w1'], p['b1'], p['g1'], p['be1'], p['m1'], p['v1'], h1)
    cs2, m2, b2 = fold(p['w2'], p['b2'], p['g2'], p['be2'], p['m2'], p['v2'], h2)
    cs3, m3, b3 = fold(p['w3'], p['b3'], p['g3'], p['be3'], p['m3'], p['v3'], h3)

    # --- attention constants ------------------------------------------------
    wi, bi = p['wi'], p['bi']                       # (3E, E), (3E,)
    # per-j blocks of the in-projection, columns ordered (co, i); q pre-scaled.
    wq_blocks = []
    for j in range(h4):
        idx = np.array([co * h4 * h4 + i * h4 + j
                        for co in range(c3) for i in range(h4)])
        wq_blocks.append(wi[:, idx])
    wqkv_j = jnp.stack(wq_blocks, axis=0)           # (w3, 3E, C3*h3)
    qscale = jnp.concatenate([jnp.full((e,), scale, jnp.float32),
                              jnp.ones((2 * e,), jnp.float32)])
    wqkv_j = wqkv_j * qscale[None, :, None]
    bqkv = (bi * qscale).reshape(3 * e, 1)

    # column selector picking the per-frame column for a fixed j from (n*w3+j)
    selq = np.zeros((h4, n_l * h4, n_l), np.float32)
    for j in range(h4):
        for n in range(n_l):
            selq[j, n * h4 + j, n] = 1.0

    # head indicator matrices (hoisted out of the kernel per review)
    seg = (np.arange(e)[:, None] // dh == np.arange(num_heads)[None, :]
           ).astype(np.float32)                     # (E, H)

    # eval BatchNorm1d folded into out_proj, then composed with the final Linear
    s4 = p['g4'] * jax.lax.rsqrt(p['v4'] + eps)
    wo_ft = p['wo'] * s4[:, None]                                   # (E, E)
    bo_ft = ((p['bo'] - p['m4']) * s4 + p['be4']).reshape(e, 1)     # (E, 1)
    wz = p['wl'] @ wo_ft                                            # (1, E)
    bz = p['wl'] @ bo_ft + p['bl'].reshape(1, 1)                    # (1, 1)

    return dict(cs1=cs1, m1=m1, b1=b1, cs2=cs2, m2=m2, b2=b2,
                cs3=cs3, m3=m3, b3=b3,
                selq=jnp.asarray(selq), wqkv=wqkv_j, bqkv=bqkv,
                seg=jnp.asarray(seg), segt=jnp.asarray(seg.T),
                wz=wz, bz=bz)


# ----------------------------------------------------------------------------
# Per-step forward: one transpose + ONE pallas_call.
# ----------------------------------------------------------------------------
def self_attention_forward(x, kp):
    B, n_l, _, C, H, W = x.shape
    # (B, nL, 1, C, H, W) -> (B, C*H, nL*W): rows (c, h), cols (n, w)
    xr = x.reshape(B, n_l, C, H, W).transpose(0, 2, 3, 1, 4).reshape(
        B, C * H, n_l * W)

    names = ('cs1', 'm1', 'b1', 'cs2', 'm2', 'b2', 'cs3', 'm3', 'b3',
             'selq', 'wqkv', 'bqkv', 'seg', 'segt', 'wz', 'bz')
    consts = [kp[n] for n in names]

    def const_spec(shape):
        nd = len(shape)
        return pl.BlockSpec(shape, lambda b, _nd=nd: (0,) * _nd)

    in_specs = [pl.BlockSpec((1, C * H, n_l * W), lambda b: (b, 0, 0))]
    in_specs += [const_spec(c.shape) for c in consts]

    z = pl.pallas_call(
        _fused_kernel,
        grid=(B,),
        in_specs=in_specs,
        out_specs=pl.BlockSpec((1, 1, 1), lambda b: (b, 0, 0)),
        out_shape=jax.ShapeDtypeStruct((B, 1, 1), jnp.float32),
        compiler_params=pltpu.CompilerParams(
            dimension_semantics=("parallel",)),
    )(xr, *consts)
    return z.reshape(B, 1)


# ----------------------------------------------------------------------------
# Pure-JAX reference (for correctness check)
# ----------------------------------------------------------------------------
def reference_forward(x, p, num_heads):
    def conv_bn_ref(x, w, b, g, be, m, v):
        y = jax.lax.conv_general_dilated(
            x, w, (2, 2), ((1, 1), (1, 1)),
            dimension_numbers=('NCHW', 'OIHW', 'NCHW'))
        y = y + b[None, :, None, None]
        return ((y - m[None, :, None, None])
                * jax.lax.rsqrt(v[None, :, None, None] + 1e-5)
                * g[None, :, None, None] + be[None, :, None, None])

    B, nL, _, C, H, W = x.shape
    y = x.reshape(B * nL, C, H, W)
    y = conv_bn_ref(y, p['w1'], p['b1'], p['g1'], p['be1'], p['m1'], p['v1'])
    y = conv_bn_ref(y, p['w2'], p['b2'], p['g2'], p['be2'], p['m2'], p['v2'])
    y = conv_bn_ref(y, p['w3'], p['b3'], p['g3'], p['be3'], p['m3'], p['v3'])
    xseq = y.reshape(B, nL, -1)
    E = xseq.shape[-1]
    Dh = E // num_heads
    wi, bi = p['wi'], p['bi']
    q = xseq @ wi[:E].T + bi[:E]
    k = xseq @ wi[E:2 * E].T + bi[E:2 * E]
    v = xseq @ wi[2 * E:].T + bi[2 * E:]

    def split(t):
        return t.reshape(B, nL, num_heads, Dh).transpose(0, 2, 1, 3)

    qh, kh, vh = split(q), split(k), split(v)
    s = jnp.einsum('bhld,bhmd->bhlm', qh, kh) / jnp.sqrt(Dh)
    a = jax.nn.softmax(s, axis=-1)
    o = jnp.einsum('bhlm,bhmd->bhld', a, vh).transpose(0, 2, 1, 3).reshape(B, nL, E)
    o = o @ p['wo'].T + p['bo']
    o = (o - p['m4']) * jax.lax.rsqrt(p['v4'] + 1e-5) * p['g4'] + p['be4']
    z = o[:, -1, :] @ p['wl'].T + p['bl']
    return jax.nn.sigmoid(z)


# ----------------------------------------------------------------------------
def init_params(key, features, n_input):
    fm2 = features - 2
    ks = list(jax.random.split(key, 32))

    def nrm(k, shape, s=0.1):
        return s * jax.random.normal(k, shape, jnp.float32)

    def uni(k, shape, lo=0.5, hi=1.5):
        return jax.random.uniform(k, shape, jnp.float32, lo, hi)

    p = {}
    p['w1'] = nrm(ks[0], (features, features, 3, 3)); p['b1'] = nrm(ks[1], (features,))
    p['w2'] = nrm(ks[2], (fm2, features, 3, 3));      p['b2'] = nrm(ks[3], (fm2,))
    p['w3'] = nrm(ks[4], (fm2, fm2, 3, 3));           p['b3'] = nrm(ks[5], (fm2,))
    p['g1'], p['be1'], p['m1'], p['v1'] = uni(ks[6], (features,)), nrm(ks[7], (features,)), nrm(ks[8], (features,)), uni(ks[9], (features,))
    p['g2'], p['be2'], p['m2'], p['v2'] = uni(ks[10], (fm2,)), nrm(ks[11], (fm2,)), nrm(ks[12], (fm2,)), uni(ks[13], (fm2,))
    p['g3'], p['be3'], p['m3'], p['v3'] = uni(ks[14], (fm2,)), nrm(ks[15], (fm2,)), nrm(ks[16], (fm2,)), uni(ks[17], (fm2,))
    p['wi'] = nrm(ks[18], (3 * n_input, n_input));    p['bi'] = nrm(ks[19], (3 * n_input,))
    p['wo'] = nrm(ks[20], (n_input, n_input));        p['bo'] = nrm(ks[21], (n_input,))
    p['g4'], p['be4'], p['m4'], p['v4'] = uni(ks[22], (n_input,)), nrm(ks[23], (n_input,)), nrm(ks[24], (n_input,)), uni(ks[25], (n_input,))
    p['wl'] = nrm(ks[26], (1, n_input));              p['bl'] = nrm(ks[27], (1,))
    return p


if __name__ == "__main__":
    # args: features=6, dim_h=dim_w=32, clip_frames=16, frame_extra_rate=2,
    #       num_heads=4, dropout_rate=0.1 (inactive in eval mode)
    B, nL, features, H, W, num_heads = 2, 8, 6, 32, 32, 4
    n_input = (features - 2) * (H // 8) * (W // 8)     # 4*4*4 = 64

    key = jax.random.PRNGKey(0)
    kx, kparam = jax.random.split(key)
    sparse_represent = jax.random.normal(kx, (B, nL, 1, features, H, W), jnp.float32)
    params = init_params(kparam, features, n_input)

    # one-time folding / selector construction (outside the per-step forward)
    kern_params = prepare_kernel_params(params, num_heads=num_heads, n_l=nL, height=H)

    fwd = jax.jit(self_attention_forward)
    z = jax.block_until_ready(fwd(sparse_represent, kern_params))

    z_ref = jax.block_until_ready(reference_forward(sparse_represent, params, num_heads))
    assert z.shape == (B, 1)
    assert jnp.allclose(z, z_ref, atol=2e-2, rtol=2e-2), (z, z_ref)

    print("KERNEL_OK")
</pallas_src>

<mosaic_0001>
module attributes {stable_mosaic.version = 11 : i64} {
  func.func @_fused_kernel(%arg0: i32, %arg1: memref<1x192x256xf32, #tpu.memory_space<vmem>>, %arg2: memref<3x256x128xf32, #tpu.memory_space<vmem>>, %arg3: memref<3x96x192xf32, #tpu.memory_space<vmem>>, %arg4: memref<96x1xf32, #tpu.memory_space<vmem>>, %arg5: memref<3x128x64xf32, #tpu.memory_space<vmem>>, %arg6: memref<3x32x96xf32, #tpu.memory_space<vmem>>, %arg7: memref<32x1xf32, #tpu.memory_space<vmem>>, %arg8: memref<3x64x32xf32, #tpu.memory_space<vmem>>, %arg9: memref<3x16x32xf32, #tpu.memory_space<vmem>>, %arg10: memref<16x1xf32, #tpu.memory_space<vmem>>, %arg11: memref<4x32x8xf32, #tpu.memory_space<vmem>>, %arg12: memref<4x192x16xf32, #tpu.memory_space<vmem>>, %arg13: memref<192x1xf32, #tpu.memory_space<vmem>>, %arg14: memref<64x4xf32, #tpu.memory_space<vmem>>, %arg15: memref<4x64xf32, #tpu.memory_space<vmem>>, %arg16: memref<1x64xf32, #tpu.memory_space<vmem>>, %arg17: memref<1x1xf32, #tpu.memory_space<vmem>>, %arg18: memref<1x1x1xf32, #tpu.memory_space<vmem>>) attributes {dimension_semantics = [#tpu.dimension_semantics<parallel>], iteration_bounds = array<i64: 2>, scalar_prefetch = 0 : i64, scratch_operands = 0 : i64, tpu.core_type = #tpu.core_type<tc>, window_params = [{transform_indices = @transform_0, window_bounds = array<i64: 1, 192, 256>}, {pipeline_mode = #tpu.pipeline_mode<synchronous>, transform_indices = @transform_1, window_bounds = array<i64: 3, 256, 128>}, {pipeline_mode = #tpu.pipeline_mode<synchronous>, transform_indices = @transform_2, window_bounds = array<i64: 3, 96, 192>}, {pipeline_mode = #tpu.pipeline_mode<synchronous>, transform_indices = @transform_3, window_bounds = array<i64: 96, 1>}, {pipeline_mode = #tpu.pipeline_mode<synchronous>, transform_indices = @transform_4, window_bounds = array<i64: 3, 128, 64>}, {pipeline_mode = #tpu.pipeline_mode<synchronous>, transform_indices = @transform_5, window_bounds = array<i64: 3, 32, 96>}, {pipeline_mode = #tpu.pipeline_mode<synchronous>, transform_indices = @transform_6, window_bounds = array<i64: 32, 1>}, {pipeline_mode = #tpu.pipeline_mode<synchronous>, transform_indices = @transform_7, window_bounds = array<i64: 3, 64, 32>}, {pipeline_mode = #tpu.pipeline_mode<synchronous>, transform_indices = @transform_8, window_bounds = array<i64: 3, 16, 32>}, {pipeline_mode = #tpu.pipeline_mode<synchronous>, transform_indices = @transform_9, window_bounds = array<i64: 16, 1>}, {pipeline_mode = #tpu.pipeline_mode<synchronous>, transform_indices = @transform_10, window_bounds = array<i64: 4, 32, 8>}, {pipeline_mode = #tpu.pipeline_mode<synchronous>, transform_indices = @transform_11, window_bounds = array<i64: 4, 192, 16>}, {pipeline_mode = #tpu.pipeline_mode<synchronous>, transform_indices = @transform_12, window_bounds = array<i64: 192, 1>}, {pipeline_mode = #tpu.pipeline_mode<synchronous>, transform_indices = @transform_13, window_bounds = array<i64: 64, 4>}, {pipeline_mode = #tpu.pipeline_mode<synchronous>, transform_indices = @transform_14, window_bounds = array<i64: 4, 64>}, {pipeline_mode = #tpu.pipeline_mode<synchronous>, transform_indices = @transform_15, window_bounds = array<i64: 1, 64>}, {pipeline_mode = #tpu.pipeline_mode<synchronous>, transform_indices = @transform_16, window_bounds = array<i64: 1, 1>}, {transform_indices = @transform_17, window_bounds = array<i64: 1, 1, 1>}]} {
    %c0 = arith.constant 0 : index
    %c0_0 = arith.constant 0 : index
    %c0_1 = arith.constant 0 : index
    %0 = vector.load %arg1[%c0, %c0_0, %c0_1] : memref<1x192x256xf32, #tpu.memory_space<vmem>>, vector<1x192x256xf32>
    %1 = vector.shape_cast %0 : vector<1x192x256xf32> to vector<192x256xf32>
    %c0_2 = arith.constant 0 : index
    %c0_3 = arith.constant 0 : index
    %c0_4 = arith.constant 0 : index
    %2 = vector.load %arg2[%c0_2, %c0_3, %c0_4] : memref<3x256x128xf32, #tpu.memory_space<vmem>>, vector<1x256x128xf32>
    %3 = vector.shape_cast %2 : vector<1x256x128xf32> to vector<256x128xf32>
    %cst = arith.constant dense<0.000000e+00> : vector<192x128xf32>
    %4 = tpu.matmul %1, %3, %cst {dimension_numbers = #tpu.dot_dimension_numbers<[1], [0], [0], [1], [0, 0, 1, 1], [], []>} : vector<192x256xf32>, vector<256x128xf32>, vector<192x128xf32> -> vector<192x128xf32>
    %c0_5 = arith.constant 0 : index
    %c0_6 = arith.constant 0 : index
    %c0_7 = arith.constant 0 : index
    %5 = vector.load %arg3[%c0_5, %c0_6, %c0_7] : memref<3x96x192xf32, #tpu.memory_space<vmem>>, vector<1x96x192xf32>
    %6 = vector.shape_cast %5 : vector<1x96x192xf32> to vector<96x192xf32>
    %cst_8 = arith.constant dense<0.000000e+00> : vector<96x128xf32>
    %7 = tpu.matmul %6, %4, %cst_8 {dimension_numbers = #tpu.dot_dimension_numbers<[1], [0], [0], [1], [0, 0, 1, 1], [], []>} : vector<96x192xf32>, vector<192x128xf32>, vector<96x128xf32> -> vector<96x128xf32>
    %c1 = arith.constant 1 : index
    %c0_9 = arith.constant 0 : index
    %c0_10 = arith.constant 0 : index
    %8 = vector.load %arg2[%c1, %c0_9, %c0_10] : memref<3x256x128xf32, #tpu.memory_space<vmem>>, vector<1x256x128xf32>
    %9 = vector.shape_cast %8 : vector<1x256x128xf32> to vector<256x128xf32>
    %cst_11 = arith.constant dense<0.000000e+00> : vector<192x128xf32>
    %10 = tpu.matmul %1, %9, %cst_11 {dimension_numbers = #tpu.dot_dimension_numbers<[1], [0], [0], [1], [0, 0, 1, 1], [], []>} : vector<192x256xf32>, vector<256x128xf32>, vector<192x128xf32> -> vector<192x128xf32>
    %c1_12 = arith.constant 1 : index
    %c0_13 = arith.constant 0 : index
    %c0_14 = arith.constant 0 : index
    %11 = vector.load %arg3[%c1_12, %c0_13, %c0_14] : memref<3x96x192xf32, #tpu.memory_space<vmem>>, vector<1x96x192xf32>
    %12 = vector.shape_cast %11 : vector<1x96x192xf32> to vector<96x192xf32>
    %cst_15 = arith.constant dense<0.000000e+00> : vector<96x128xf32>
    %13 = tpu.matmul %12, %10, %cst_15 {dimension_numbers = #tpu.dot_dimension_numbers<[1], [0], [0], [1], [0, 0, 1, 1], [], []>} : vector<96x192xf32>, vector<192x128xf32>, vector<96x128xf32> -> vector<96x128xf32>
    %14 = arith.addf %7, %13 : vector<96x128xf32>
    %c2 = arith.constant 2 : index
    %c0_16 = arith.constant 0 : index
    %c0_17 = arith.constant 0 : index
    %15 = vector.load %arg2[%c2, %c0_16, %c0_17] : memref<3x256x128xf32, #tpu.memory_space<vmem>>, vector<1x256x128xf32>
    %16 = vector.shape_cast %15 : vector<1x256x128xf32> to vector<256x128xf32>
    %cst_18 = arith.constant dense<0.000000e+00> : vector<192x128xf32>
    %17 = tpu.matmul %1, %16, %cst_18 {dimension_numbers = #tpu.dot_dimension_numbers<[1], [0], [0], [1], [0, 0, 1, 1], [], []>} : vector<192x256xf32>, vector<256x128xf32>, vector<192x128xf32> -> vector<192x128xf32>
    %c2_19 = arith.constant 2 : index
    %c0_20 = arith.constant 0 : index
    %c0_21 = arith.constant 0 : index
    %18 = vector.load %arg3[%c2_19, %c0_20, %c0_21] : memref<3x96x192xf32, #tpu.memory_space<vmem>>, vector<1x96x192xf32>
    %19 = vector.shape_cast %18 : vector<1x96x192xf32> to vector<96x192xf32>
    %cst_22 = arith.constant dense<0.000000e+00> : vector<96x128xf32>
    %20 = tpu.matmul %19, %17, %cst_22 {dimension_numbers = #tpu.dot_dimension_numbers<[1], [0], [0], [1], [0, 0, 1, 1], [], []>} : vector<96x192xf32>, vector<192x128xf32>, vector<96x128xf32> -> vector<96x128xf32>
    %21 = arith.addf %14, %20 : vector<96x128xf32>
    %c0_23 = arith.constant 0 : index
    %c0_24 = arith.constant 0 : index
    %22 = vector.load %arg4[%c0_23, %c0_24] : memref<96x1xf32, #tpu.memory_space<vmem>>, vector<96x1xf32>
    %23 = vector.broadcast %22 : vector<96x1xf32> to vector<96x128xf32>
    %24 = arith.addf %21, %23 : vector<96x128xf32>
    %c0_25 = arith.constant 0 : index
    %c0_26 = arith.constant 0 : index
    %c0_27 = arith.constant 0 : index
    %25 = vector.load %arg5[%c0_25, %c0_26, %c0_27] : memref<3x128x64xf32, #tpu.memory_space<vmem>>, vector<1x128x64xf32>
    %26 = vector.shape_cast %25 : vector<1x128x64xf32> to vector<128x64xf32>
    %cst_28 = arith.constant dense<0.000000e+00> : vector<96x64xf32>
    %27 = tpu.matmul %24, %26, %cst_28 {dimension_numbers = #tpu.dot_dimension_numbers<[1], [0], [0], [1], [0, 0, 1, 1], [], []>} : vector<96x128xf32>, vector<128x64xf32>, vector<96x64xf32> -> vector<96x64xf32>
    %c0_29 = arith.constant 0 : index
    %c0_30 = arith.constant 0 : index
    %c0_31 = arith.constant 0 : index
    %28 = vector.load %arg6[%c0_29, %c0_30, %c0_31] : memref<3x32x96xf32, #tpu.memory_space<vmem>>, vector<1x32x96xf32>
    %29 = vector.shape_cast %28 : vector<1x32x96xf32> to vector<32x96xf32>
    %cst_32 = arith.constant dense<0.000000e+00> : vector<32x64xf32>
    %30 = tpu.matmul %29, %27, %cst_32 {dimension_numbers = #tpu.dot_dimension_numbers<[1], [0], [0], [1], [0, 0, 1, 1], [], []>} : vector<32x96xf32>, vector<96x64xf32>, vector<32x64xf32> -> vector<32x64xf32>
    %c1_33 = arith.constant 1 : index
    %c0_34 = arith.constant 0 : index
    %c0_35 = arith.constant 0 : index
    %31 = vector.load %arg5[%c1_33, %c0_34, %c0_35] : memref<3x128x64xf32, #tpu.memory_space<vmem>>, vector<1x128x64xf32>
    %32 = vector.shape_cast %31 : vector<1x128x64xf32> to vector<128x64xf32>
    %cst_36 = arith.constant dense<0.000000e+00> : vector<96x64xf32>
    %33 = tpu.matmul %24, %32, %cst_36 {dimension_numbers = #tpu.dot_dimension_numbers<[1], [0], [0], [1], [0, 0, 1, 1], [], []>} : vector<96x128xf32>, vector<128x64xf32>, vector<96x64xf32> -> vector<96x64xf32>
    %c1_37 = arith.constant 1 : index
    %c0_38 = arith.constant 0 : index
    %c0_39 = arith.constant 0 : index
    %34 = vector.load %arg6[%c1_37, %c0_38, %c0_39] : memref<3x32x96xf32, #tpu.memory_space<vmem>>, vector<1x32x96xf32>
    %35 = vector.shape_cast %34 : vector<1x32x96xf32> to vector<32x96xf32>
    %cst_40 = arith.constant dense<0.000000e+00> : vector<32x64xf32>
    %36 = tpu.matmul %35, %33, %cst_40 {dimension_numbers = #tpu.dot_dimension_numbers<[1], [0], [0], [1], [0, 0, 1, 1], [], []>} : vector<32x96xf32>, vector<96x64xf32>, vector<32x64xf32> -> vector<32x64xf32>
    %37 = arith.addf %30, %36 : vector<32x64xf32>
    %c2_41 = arith.constant 2 : index
    %c0_42 = arith.constant 0 : index
    %c0_43 = arith.constant 0 : index
    %38 = vector.load %arg5[%c2_41, %c0_42, %c0_43] : memref<3x128x64xf32, #tpu.memory_space<vmem>>, vector<1x128x64xf32>
    %39 = vector.shape_cast %38 : vector<1x128x64xf32> to vector<128x64xf32>
    %cst_44 = arith.constant dense<0.000000e+00> : vector<96x64xf32>
    %40 = tpu.matmul %24, %39, %cst_44 {dimension_numbers = #tpu.dot_dimension_numbers<[1], [0], [0], [1], [0, 0, 1, 1], [], []>} : vector<96x128xf32>, vector<128x64xf32>, vector<96x64xf32> -> vector<96x64xf32>
    %c2_45 = arith.constant 2 : index
    %c0_46 = arith.constant 0 : index
    %c0_47 = arith.constant 0 : index
    %41 = vector.load %arg6[%c2_45, %c0_46, %c0_47] : memref<3x32x96xf32, #tpu.memory_space<vmem>>, vector<1x32x96xf32>
    %42 = vector.shape_cast %41 : vector<1x32x96xf32> to vector<32x96xf32>
    %cst_48 = arith.constant dense<0.000000e+00> : vector<32x64xf32>
    %43 = tpu.matmul %42, %40, %cst_48 {dimension_numbers = #tpu.dot_dimension_numbers<[1], [0], [0], [1], [0, 0, 1, 1], [], []>} : vector<32x96xf32>, vector<96x64xf32>, vector<32x64xf32> -> vector<32x64xf32>
    %44 = arith.addf %37, %43 : vector<32x64xf32>
    %c0_49 = arith.constant 0 : index
    %c0_50 = arith.constant 0 : index
    %45 = vector.load %arg7[%c0_49, %c0_50] : memref<32x1xf32, #tpu.memory_space<vmem>>, vector<32x1xf32>
    %46 = vector.broadcast %45 : vector<32x1xf32> to vector<32x64xf32>
    %47 = arith.addf %44, %46 : vector<32x64xf32>
    %c0_51 = arith.constant 0 : index
    %c0_52 = arith.constant 0 : index
    %c0_53 = arith.constant 0 : index
    %48 = vector.load %arg8[%c0_51, %c0_52, %c0_53] : memref<3x64x32xf32, #tpu.memory_space<vmem>>, vector<1x64x32xf32>
    %49 = vector.shape_cast %48 : vector<1x64x32xf32> to vector<64x32xf32>
    %cst_54 = arith.constant dense<0.000000e+00> : vector<32x32xf32>
    %50 = tpu.matmul %47, %49, %cst_54 {dimension_numbers = #tpu.dot_dimension_numbers<[1], [0], [0], [1], [0, 0, 1, 1], [], []>} : vector<32x64xf32>, vector<64x32xf32>, vector<32x32xf32> -> vector<32x32xf32>
    %c0_55 = arith.constant 0 : index
    %c0_56 = arith.constant 0 : index
    %c0_57 = arith.constant 0 : index
    %51 = vector.load %arg9[%c0_55, %c0_56, %c0_57] : memref<3x16x32xf32, #tpu.memory_space<vmem>>, vector<1x16x32xf32>
    %52 = vector.shape_cast %51 : vector<1x16x32xf32> to vector<16x32xf32>
    %cst_58 = arith.constant dense<0.000000e+00> : vector<16x32xf32>
    %53 = tpu.matmul %52, %50, %cst_58 {dimension_numbers = #tpu.dot_dimension_numbers<[1], [0], [0], [1], [0, 0, 1, 1], [], []>} : vector<16x32xf32>, vector<32x32xf32>, vector<16x32xf32> -> vector<16x32xf32>
    %c1_59 = arith.constant 1 : index
    %c0_60 = arith.constant 0 : index
    %c0_61 = arith.constant 0 : index
    %54 = vector.load %arg8[%c1_59, %c0_60, %c0_61] : memref<3x64x32xf32, #tpu.memory_space<vmem>>, vector<1x64x32xf32>
    %55 = vector.shape_cast %54 : vector<1x64x32xf32> to vector<64x32xf32>
    %cst_62 = arith.constant dense<0.000000e+00> : vector<32x32xf32>
    %56 = tpu.matmul %47, %55, %cst_62 {dimension_numbers = #tpu.dot_dimension_numbers<[1], [0], [0], [1], [0, 0, 1, 1], [], []>} : vector<32x64xf32>, vector<64x32xf32>, vector<32x32xf32> -> vector<32x32xf32>
    %c1_63 = arith.constant 1 : index
    %c0_64 = arith.constant 0 : index
    %c0_65 = arith.constant 0 : index
    %57 = vector.load %arg9[%c1_63, %c0_64, %c0_65] : memref<3x16x32xf32, #tpu.memory_space<vmem>>, vector<1x16x32xf32>
    %58 = vector.shape_cast %57 : vector<1x16x32xf32> to vector<16x32xf32>
    %cst_66 = arith.constant dense<0.000000e+00> : vector<16x32xf32>
    %59 = tpu.matmul %58, %56, %cst_66 {dimension_numbers = #tpu.dot_dimension_numbers<[1], [0], [0], [1], [0, 0, 1, 1], [], []>} : vector<16x32xf32>, vector<32x32xf32>, vector<16x32xf32> -> vector<16x32xf32>
    %60 = arith.addf %53, %59 : vector<16x32xf32>
    %c2_67 = arith.constant 2 : index
    %c0_68 = arith.constant 0 : index
    %c0_69 = arith.constant 0 : index
    %61 = vector.load %arg8[%c2_67, %c0_68, %c0_69] : memref<3x64x32xf32, #tpu.memory_space<vmem>>, vector<1x64x32xf32>
    %62 = vector.shape_cast %61 : vector<1x64x32xf32> to vector<64x32xf32>
    %cst_70 = arith.constant dense<0.000000e+00> : vector<32x32xf32>
    %63 = tpu.matmul %47, %62, %cst_70 {dimension_numbers = #tpu.dot_dimension_numbers<[1], [0], [0], [1], [0, 0, 1, 1], [], []>} : vector<32x64xf32>, vector<64x32xf32>, vector<32x32xf32> -> vector<32x32xf32>
    %c2_71 = arith.constant 2 : index
    %c0_72 = arith.constant 0 : index
    %c0_73 = arith.constant 0 : index
    %64 = vector.load %arg9[%c2_71, %c0_72, %c0_73] : memref<3x16x32xf32, #tpu.memory_space<vmem>>, vector<1x16x32xf32>
    %65 = vector.shape_cast %64 : vector<1x16x32xf32> to vector<16x32xf32>
    %cst_74 = arith.constant dense<0.000000e+00> : vector<16x32xf32>
    %66 = tpu.matmul %65, %63, %cst_74 {dimension_numbers = #tpu.dot_dimension_numbers<[1], [0], [0], [1], [0, 0, 1, 1], [], []>} : vector<16x32xf32>, vector<32x32xf32>, vector<16x32xf32> -> vector<16x32xf32>
    %67 = arith.addf %60, %66 : vector<16x32xf32>
    %c0_75 = arith.constant 0 : index
    %c0_76 = arith.constant 0 : index
    %68 = vector.load %arg10[%c0_75, %c0_76] : memref<16x1xf32, #tpu.memory_space<vmem>>, vector<16x1xf32>
    %69 = vector.broadcast %68 : vector<16x1xf32> to vector<16x32xf32>
    %70 = arith.addf %67, %69 : vector<16x32xf32>
    %c0_77 = arith.constant 0 : index
    %c0_78 = arith.constant 0 : index
    %c0_79 = arith.constant 0 : index
    %71 = vector.load %arg11[%c0_77, %c0_78, %c0_79] : memref<4x32x8xf32, #tpu.memory_space<vmem>>, vector<1x32x8xf32>
    %72 = vector.shape_cast %71 : vector<1x32x8xf32> to vector<32x8xf32>
    %cst_80 = arith.constant dense<0.000000e+00> : vector<16x8xf32>
    %73 = tpu.matmul %70, %72, %cst_80 {dimension_numbers = #tpu.dot_dimension_numbers<[1], [0], [0], [1], [0, 0, 1, 1], [], []>} : vector<16x32xf32>, vector<32x8xf32>, vector<16x8xf32> -> vector<16x8xf32>
    %c0_81 = arith.constant 0 : index
    %c0_82 = arith.constant 0 : index
    %c0_83 = arith.constant 0 : index
    %74 = vector.load %arg12[%c0_81, %c0_82, %c0_83] : memref<4x192x16xf32, #tpu.memory_space<vmem>>, vector<1x192x16xf32>
    %75 = vector.shape_cast %74 : vector<1x192x16xf32> to vector<192x16xf32>
    %cst_84 = arith.constant dense<0.000000e+00> : vector<192x8xf32>
    %76 = tpu.matmul %75, %73, %cst_84 {dimension_numbers = #tpu.dot_dimension_numbers<[1], [0], [0], [1], [0, 0, 1, 1], [], []>} : vector<192x16xf32>, vector<16x8xf32>, vector<192x8xf32> -> vector<192x8xf32>
    %c1_85 = arith.constant 1 : index
    %c0_86 = arith.constant 0 : index
    %c0_87 = arith.constant 0 : index
    %77 = vector.load %arg11[%c1_85, %c0_86, %c0_87] : memref<4x32x8xf32, #tpu.memory_space<vmem>>, vector<1x32x8xf32>
    %78 = vector.shape_cast %77 : vector<1x32x8xf32> to vector<32x8xf32>
    %cst_88 = arith.constant dense<0.000000e+00> : vector<16x8xf32>
    %79 = tpu.matmul %70, %78, %cst_88 {dimension_numbers = #tpu.dot_dimension_numbers<[1], [0], [0], [1], [0, 0, 1, 1], [], []>} : vector<16x32xf32>, vector<32x8xf32>, vector<16x8xf32> -> vector<16x8xf32>
    %c1_89 = arith.constant 1 : index
    %c0_90 = arith.constant 0 : index
    %c0_91 = arith.constant 0 : index
    %80 = vector.load %arg12[%c1_89, %c0_90, %c0_91] : memref<4x192x16xf32, #tpu.memory_space<vmem>>, vector<1x192x16xf32>
    %81 = vector.shape_cast %80 : vector<1x192x16xf32> to vector<192x16xf32>
    %cst_92 = arith.constant dense<0.000000e+00> : vector<192x8xf32>
    %82 = tpu.matmul %81, %79, %cst_92 {dimension_numbers = #tpu.dot_dimension_numbers<[1], [0], [0], [1], [0, 0, 1, 1], [], []>} : vector<192x16xf32>, vector<16x8xf32>, vector<192x8xf32> -> vector<192x8xf32>
    %83 = arith.addf %76, %82 : vector<192x8xf32>
    %c2_93 = arith.constant 2 : index
    %c0_94 = arith.constant 0 : index
    %c0_95 = arith.constant 0 : index
    %84 = vector.load %arg11[%c2_93, %c0_94, %c0_95] : memref<4x32x8xf32, #tpu.memory_space<vmem>>, vector<1x32x8xf32>
    %85 = vector.shape_cast %84 : vector<1x32x8xf32> to vector<32x8xf32>
    %cst_96 = arith.constant dense<0.000000e+00> : vector<16x8xf32>
    %86 = tpu.matmul %70, %85, %cst_96 {dimension_numbers = #tpu.dot_dimension_numbers<[1], [0], [0], [1], [0, 0, 1, 1], [], []>} : vector<16x32xf32>, vector<32x8xf32>, vector<16x8xf32> -> vector<16x8xf32>
    %c2_97 = arith.constant 2 : index
    %c0_98 = arith.constant 0 : index
    %c0_99 = arith.constant 0 : index
    %87 = vector.load %arg12[%c2_97, %c0_98, %c0_99] : memref<4x192x16xf32, #tpu.memory_space<vmem>>, vector<1x192x16xf32>
    %88 = vector.shape_cast %87 : vector<1x192x16xf32> to vector<192x16xf32>
    %cst_100 = arith.constant dense<0.000000e+00> : vector<192x8xf32>
    %89 = tpu.matmul %88, %86, %cst_100 {dimension_numbers = #tpu.dot_dimension_numbers<[1], [0], [0], [1], [0, 0, 1, 1], [], []>} : vector<192x16xf32>, vector<16x8xf32>, vector<192x8xf32> -> vector<192x8xf32>
    %90 = arith.addf %83, %89 : vector<192x8xf32>
    %c3 = arith.constant 3 : index
    %c0_101 = arith.constant 0 : index
    %c0_102 = arith.constant 0 : index
    %91 = vector.load %arg11[%c3, %c0_101, %c0_102] : memref<4x32x8xf32, #tpu.memory_space<vmem>>, vector<1x32x8xf32>
    %92 = vector.shape_cast %91 : vector<1x32x8xf32> to vector<32x8xf32>
    %cst_103 = arith.constant dense<0.000000e+00> : vector<16x8xf32>
    %93 = tpu.matmul %70, %92, %cst_103 {dimension_numbers = #tpu.dot_dimension_numbers<[1], [0], [0], [1], [0, 0, 1, 1], [], []>} : vector<16x32xf32>, vector<32x8xf32>, vector<16x8xf32> -> vector<16x8xf32>
    %c3_104 = arith.constant 3 : index
    %c0_105 = arith.constant 0 : index
    %c0_106 = arith.constant 0 : index
    %94 = vector.load %arg12[%c3_104, %c0_105, %c0_106] : memref<4x192x16xf32, #tpu.memory_space<vmem>>, vector<1x192x16xf32>
    %95 = vector.shape_cast %94 : vector<1x192x16xf32> to vector<192x16xf32>
    %cst_107 = arith.constant dense<0.000000e+00> : vector<192x8xf32>
    %96 = tpu.matmul %95, %93, %cst_107 {dimension_numbers = #tpu.dot_dimension_numbers<[1], [0], [0], [1], [0, 0, 1, 1], [], []>} : vector<192x16xf32>, vector<16x8xf32>, vector<192x8xf32> -> vector<192x8xf32>
    %97 = arith.addf %90, %96 : vector<192x8xf32>
    %c0_108 = arith.constant 0 : index
    %c0_109 = arith.constant 0 : index
    %98 = vector.load %arg13[%c0_108, %c0_109] : memref<192x1xf32, #tpu.memory_space<vmem>>, vector<192x1xf32>
    %99 = vector.broadcast %98 : vector<192x1xf32> to vector<192x8xf32>
    %100 = arith.addf %97, %99 : vector<192x8xf32>
    %101 = vector.extract_strided_slice %100 {offsets = [0, 7], sizes = [64, 1], strides = [1, 1]} : vector<192x8xf32> to vector<64x1xf32>
    %102 = vector.extract_strided_slice %100 {offsets = [64, 0], sizes = [64, 8], strides = [1, 1]} : vector<192x8xf32> to vector<64x8xf32>
    %103 = vector.extract_strided_slice %100 {offsets = [128, 0], sizes = [64, 8], strides = [1, 1]} : vector<192x8xf32> to vector<64x8xf32>
    %c0_110 = arith.constant 0 : index
    %c0_111 = arith.constant 0 : index
    %104 = vector.load %arg15[%c0_110, %c0_111] : memref<4x64xf32, #tpu.memory_space<vmem>>, vector<4x64xf32>
    %105 = vector.broadcast %101 : vector<64x1xf32> to vector<64x8xf32>
    %106 = arith.mulf %105, %102 : vector<64x8xf32>
    %cst_112 = arith.constant dense<0.000000e+00> : vector<4x8xf32>
    %107 = tpu.matmul %104, %106, %cst_112 {dimension_numbers = #tpu.dot_dimension_numbers<[1], [0], [0], [1], [0, 0, 1, 1], [], []>} : vector<4x64xf32>, vector<64x8xf32>, vector<4x8xf32> -> vector<4x8xf32>
    %cst_113 = arith.constant dense<0xFF800000> : vector<4xf32>
    %108 = vector.multi_reduction <maximumf>, %107, %cst_113 [1] : vector<4x8xf32> to vector<4xf32>
    %109 = vector.shape_cast %108 : vector<4xf32> to vector<4x1xf32>
    %110 = vector.broadcast %109 : vector<4x1xf32> to vector<4x8xf32>
    %111 = arith.subf %107, %110 : vector<4x8xf32>
    %112 = math.exp %111 : vector<4x8xf32>
    %cst_114 = arith.constant dense<0.000000e+00> : vector<4xf32>
    %113 = vector.multi_reduction <add>, %112, %cst_114 [1] : vector<4x8xf32> to vector<4xf32>
    %114 = vector.shape_cast %113 : vector<4xf32> to vector<4x1xf32>
    %115 = vector.broadcast %114 : vector<4x1xf32> to vector<4x8xf32>
    %116 = arith.divf %112, %115 : vector<4x8xf32>
    %c0_115 = arith.constant 0 : index
    %c0_116 = arith.constant 0 : index
    %117 = vector.load %arg14[%c0_115, %c0_116] : memref<64x4xf32, #tpu.memory_space<vmem>>, vector<64x4xf32>
    %cst_117 = arith.constant dense<0.000000e+00> : vector<64x8xf32>
    %118 = tpu.matmul %117, %116, %cst_117 {dimension_numbers = #tpu.dot_dimension_numbers<[1], [0], [0], [1], [0, 0, 1, 1], [], []>} : vector<64x4xf32>, vector<4x8xf32>, vector<64x8xf32> -> vector<64x8xf32>
    %119 = arith.mulf %118, %103 : vector<64x8xf32>
    %cst_118 = arith.constant dense<0.000000e+00> : vector<64xf32>
    %120 = vector.multi_reduction <add>, %119, %cst_118 [1] : vector<64x8xf32> to vector<64xf32>
    %121 = vector.shape_cast %120 : vector<64xf32> to vector<64x1xf32>
    %c0_119 = arith.constant 0 : index
    %c0_120 = arith.constant 0 : index
    %122 = vector.load %arg16[%c0_119, %c0_120] : memref<1x64xf32, #tpu.memory_space<vmem>>, vector<1x64xf32>
    %cst_121 = arith.constant dense<0.000000e+00> : vector<1x1xf32>
    %123 = tpu.matmul %122, %121, %cst_121 {dimension_numbers = #tpu.dot_dimension_numbers<[1], [0], [0], [1], [0, 0, 1, 1], [], []>} : vector<1x64xf32>, vector<64x1xf32>, vector<1x1xf32> -> vector<1x1xf32>
    %c0_122 = arith.constant 0 : index
    %c0_123 = arith.constant 0 : index
    %124 = vector.load %arg17[%c0_122, %c0_123] : memref<1x1xf32, #tpu.memory_space<vmem>>, vector<1x1xf32>
    %125 = arith.addf %123, %124 : vector<1x1xf32>
    %126 = arith.negf %125 : vector<1x1xf32>
    %127 = math.exp %126 : vector<1x1xf32>
    %cst_124 = arith.constant 1.000000e+00 : f32
    %128 = vector.broadcast %cst_124 : f32 to vector<1x1xf32>
    %129 = arith.addf %128, %127 : vector<1x1xf32>
    %130 = arith.divf %128, %129 : vector<1x1xf32>
    %131 = vector.shape_cast %130 : vector<1x1xf32> to vector<1x1x1xf32>
    %c0_125 = arith.constant 0 : index
    %c0_126 = arith.constant 0 : index
    %c0_127 = arith.constant 0 : index
    %132 = vector.load %arg18[%c0_125, %c0_126, %c0_127] : memref<1x1x1xf32, #tpu.memory_space<vmem>>, vector<1x1x1xf32>
    tpu.vector_store %arg18[%c0_125, %c0_126, %c0_127], %131 {strides = array<i32>} : memref<1x1x1xf32, #tpu.memory_space<vmem>>, vector<1x1x1xf32>,
    return
  }
  func.func @transform_0(%arg0: i32) -> (i32, i32, i32) {
    %c0_i32 = arith.constant 0 : i32
    %c0_i32_0 = arith.constant 0 : i32
    %c0_i32_1 = arith.constant 0 : i32
    return %arg0, %c0_i32, %c0_i32_0 : i32, i32, i32
  }
  func.func @transform_1(%arg0: i32) -> (i32, i32, i32) {
    %c0_i32 = arith.constant 0 : i32
    %c0_i32_0 = arith.constant 0 : i32
    %c0_i32_1 = arith.constant 0 : i32
    %c0_i32_2 = arith.constant 0 : i32
    return %c0_i32, %c0_i32_0, %c0_i32_1 : i32, i32, i32
  }
  func.func @transform_2(%arg0: i32) -> (i32, i32, i32) {
    %c0_i32 = arith.constant 0 : i32
    %c0_i32_0 = arith.constant 0 : i32
    %c0_i32_1 = arith.constant 0 : i32
    %c0_i32_2 = arith.constant 0 : i32
    return %c0_i32, %c0_i32_0, %c0_i32_1 : i32, i32, i32
  }
  func.func @transform_3(%arg0: i32) -> (i32, i32) {
    %c0_i32 = arith.constant 0 : i32
    %c0_i32_0 = arith.constant 0 : i32
    %c0_i32_1 = arith.constant 0 : i32
    return %c0_i32, %c0_i32_0 : i32, i32
  }
  func.func @transform_4(%arg0: i32) -> (i32, i32, i32) {
    %c0_i32 = arith.constant 0 : i32
    %c0_i32_0 = arith.constant 0 : i32
    %c0_i32_1 = arith.constant 0 : i32
    %c0_i32_2 = arith.constant 0 : i32
    return %c0_i32, %c0_i32_0, %c0_i32_1 : i32, i32, i32
  }
  func.func @transform_5(%arg0: i32) -> (i32, i32, i32) {
    %c0_i32 = arith.constant 0 : i32
    %c0_i32_0 = arith.constant 0 : i32
    %c0_i32_1 = arith.constant 0 : i32
    %c0_i32_2 = arith.constant 0 : i32
    return %c0_i32, %c0_i32_0, %c0_i32_1 : i32, i32, i32
  }
  func.func @transform_6(%arg0: i32) -> (i32, i32) {
    %c0_i32 = arith.constant 0 : i32
    %c0_i32_0 = arith.constant 0 : i32
    %c0_i32_1 = arith.constant 0 : i32
    return %c0_i32, %c0_i32_0 : i32, i32
  }
  func.func @transform_7(%arg0: i32) -> (i32, i32, i32) {
    %c0_i32 = arith.constant 0 : i32
    %c0_i32_0 = arith.constant 0 : i32
    %c0_i32_1 = arith.constant 0 : i32
    %c0_i32_2 = arith.constant 0 : i32
    return %c0_i32, %c0_i32_0, %c0_i32_1 : i32, i32, i32
  }
  func.func @transform_8(%arg0: i32) -> (i32, i32, i32) {
    %c0_i32 = arith.constant 0 : i32
    %c0_i32_0 = arith.constant 0 : i32
    %c0_i32_1 = arith.constant 0 : i32
    %c0_i32_2 = arith.constant 0 : i32
    return %c0_i32, %c0_i32_0, %c0_i32_1 : i32, i32, i32
  }
  func.func @transform_9(%arg0: i32) -> (i32, i32) {
    %c0_i32 = arith.constant 0 : i32
    %c0_i32_0 = arith.constant 0 : i32
    %c0_i32_1 = arith.constant 0 : i32
    return %c0_i32, %c0_i32_0 : i32, i32
  }
  func.func @transform_10(%arg0: i32) -> (i32, i32, i32) {
    %c0_i32 = arith.constant 0 : i32
    %c0_i32_0 = arith.constant 0 : i32
    %c0_i32_1 = arith.constant 0 : i32
    %c0_i32_2 = arith.constant 0 : i32
    return %c0_i32, %c0_i32_0, %c0_i32_1 : i32, i32, i32
  }
  func.func @transform_11(%arg0: i32) -> (i32, i32, i32) {
    %c0_i32 = arith.constant 0 : i32
    %c0_i32_0 = arith.constant 0 : i32
    %c0_i32_1 = arith.constant 0 : i32
    %c0_i32_2 = arith.constant 0 : i32
    return %c0_i32, %c0_i32_0, %c0_i32_1 : i32, i32, i32
  }
  func.func @transform_12(%arg0: i32) -> (i32, i32) {
    %c0_i32 = arith.constant 0 : i32
    %c0_i32_0 = arith.constant 0 : i32
    %c0_i32_1 = arith.constant 0 : i32
    return %c0_i32, %c0_i32_0 : i32, i32
  }
  func.func @transform_13(%arg0: i32) -> (i32, i32) {
    %c0_i32 = arith.constant 0 : i32
    %c0_i32_0 = arith.constant 0 : i32
    %c0_i32_1 = arith.constant 0 : i32
    return %c0_i32, %c0_i32_0 : i32, i32
  }
  func.func @transform_14(%arg0: i32) -> (i32, i32) {
    %c0_i32 = arith.constant 0 : i32
    %c0_i32_0 = arith.constant 0 : i32
    %c0_i32_1 = arith.constant 0 : i32
    return %c0_i32, %c0_i32_0 : i32, i32
  }
  func.func @transform_15(%arg0: i32) -> (i32, i32) {
    %c0_i32 = arith.constant 0 : i32
    %c0_i32_0 = arith.constant 0 : i32
    %c0_i32_1 = arith.constant 0 : i32
    return %c0_i32, %c0_i32_0 : i32, i32
  }
  func.func @transform_16(%arg0: i32) -> (i32, i32) {
    %c0_i32 = arith.constant 0 : i32
    %c0_i32_0 = arith.constant 0 : i32
    %c0_i32_1 = arith.constant 0 : i32
    return %c0_i32, %c0_i32_0 : i32, i32
  }
  func.func @transform_17(%arg0: i32) -> (i32, i32, i32) {
    %c0_i32 = arith.constant 0 : i32
    %c0_i32_0 = arith.constant 0 : i32
    %c0_i32_1 = arith.constant 0 : i32
    return %arg0, %c0_i32, %c0_i32_0 : i32, i32, i32
  }
}

</mosaic_0001>

<bundles_post_ra>
// kernel: self_attention_forward.1
= control target key start
LH: loop header
LB: loop body
LE: loop exit
PB: predicated region body
PF: predicated region fallthrough
CT: control target
= control target key end

     0   :  { %s6864_s26 = smov 0   ;;  %s9163_s0 = inlined_call_operand.vmem [shape: f32[2,192,256], index: 0, kind: input, shape index: {}]   ;;  %s9164_s1 = inlined_call_operand.vmem [shape: f32[3,256,128], index: 1, kind: input, shape index: {}]   ;;  %s9165_s2 = inlined_call_operand.vmem [shape: f32[3,96,192], index: 2, kind: input, shape index: {}]   ;;  %s9166_s3 = inlined_call_operand.vmem [shape: f32[96,1], index: 3, kind: input, shape index: {}]   ;;  %s9167_s4 = inlined_call_operand.vmem [shape: f32[3,128,64], index: 4, kind: input, shape index: {}]   ;;  %s9168_s5 = inlined_call_operand.vmem [shape: f32[3,32,96], index: 5, kind: input, shape index: {}]   ;;  %s9169_s6 = inlined_call_operand.vmem [shape: f32[32,1], index: 6, kind: input, shape index: {}]   ;;  %s9170_s7 = inlined_call_operand.vmem [shape: f32[3,64,32], index: 7, kind: input, shape index: {}]   ;;  %s9171_s8 = inlined_call_operand.vmem [shape: f32[3,16,32], index: 8, kind: input, shape index: {}]   ;;  %s9172_s9 = inlined_call_operand.vmem [shape: f32[16,1], index: 9, kind: input, shape index: {}]   ;;  %s9173_s10 = inlined_call_operand.vmem [shape: f32[4,32,8], index: 10, kind: input, shape index: {}]   ;;  %s9174_s11 = inlined_call_operand.vmem [shape: f32[4,192,16], index: 11, kind: input, shape index: {}]   ;;  %s9175_s12 = inlined_call_operand.vmem [shape: f32[192,1], index: 12, kind: input, shape index: {}]   ;;  %s9176_s13 = inlined_call_operand.vmem [shape: f32[64,4], index: 13, kind: input, shape index: {}]   ;;  %s9177_s14 = inlined_call_operand.vmem [shape: f32[4,64], index: 14, kind: input, shape index: {}]   ;;  %s9178_s15 = inlined_call_operand.vmem [shape: f32[1,64], index: 15, kind: input, shape index: {}]   ;;  %s9179_s16 = inlined_call_operand.<no memory space> [shape: f32[1,1], index: 16, kind: input, shape index: {}]   ;;  %s9180_s17 = inlined_call_operand.vmem [shape: f32[2,1,1], index: 17, kind: output, shape index: {}]  }
   0x1   :  { %9199 = sst [smem:[#allocation18_spill]] %s9163_s0  ;;  %v22_v0 = vstv %s9179_s16 }
   0x2   :  { %9200 = sst [smem:[#allocation19_spill]] %s9164_s1  ;;  %23 = vst [vmem:[#allocation2] sm:$0x1] %v22_v0 }
   0x3 LB: > { %s5334_s27 = sadd.s32 4294967295, %s6765_s26   ;;  %p5338_p0 = scmp.ge.s32.totalorder %s6765_s26, 1  ;;  %s6765_s26 = sphi %s6864_s26, %s29_s26  }
   0x4   : > { %p489_p1 = scmp.lt.s32.totalorder %s6765_s26, 3 }
   0x6   : > { %p490_p2 = pnand %p5338_p0, %p489_p1 }
   0x8   : > { %493 = sbr.rel (%p490_p2) target bundleno = 4021 (0xfb5), region = 88 }
   0xd   : > { %s9201_s0 = sld [smem:[#allocation19_spill]]  ;;  %v9182_v2 = vmov 0.0   ;;  %p539_p3 = scmp.lt.s32.totalorder %s5334_s27, 1  ;;  %vm1079_vm0 = vcmask 523264   ;;  %vm2194_vm1 = vcmask 785408   ;;  %vm2869_vm2 = vcmask 261120  }
   0xe   : > { %869 = vmatprep.subr.mxu1 %v9182_v2  ;;  %627 = vmatprep.subr.mxu0 %v9182_v2  ;;  %s9202_s30 = sld [smem:[#allocation18_spill]]  ;;  %vm3440_vm3 = vcmask 130048   ;;  %vm6770_vm4 = vmmov 0   ;;  %vm5017_vm5 = vcmask 60416   ;;  %vm5037_vm6 = vcmask 31744  }
   0xf   : > { %s9235_s27 = smov (!%p539_p3, %s5334_s27), 1  ;;  %vm5062_vm7 = vcmask 1043456   ;;  %vm5179_vm8 = vcmask 64512   ;;  %vm5285_vm9 = vcmask 0  }
  0x10   : > { %s6716_s19 = smul.u32 384, %s9235_s27  ;;  %s546_s22 = scalar_lea.vmem %s9180_s17, %s9235_s27 }
  0x13   : > { %v5355_v1 = vld [vmem:[%s9201_s0 + $0x178] sm:$0xff]  ;;  %v5354_v3 = vld [vmem:[%s9201_s0 + $0x170] sm:$0xff]  ;;  %v5353_v6 = vld [vmem:[%s9201_s0 + $0x168] sm:$0xff] }
  0x14   : > { %v610_v4 = vld [vmem:[%s9201_s0 + $0x78] sm:$0xff]  ;;  %870 = vmatpush1.msra.mxu1 %v5355_v1  ;;  %v609_v5 = vld [vmem:[%s9201_s0 + $0x70] sm:$0xff]  ;;  %v608_v7 = vld [vmem:[%s9201_s0 + $0x68] sm:$0xff]  ;;  %s7088_s18 = scalar_lea.vmem %s9202_s30, %s6716_s19 }
  0x15   : > { %628 = vmatpush1.msra.mxu0 %v610_v4  ;;  %871 = vmatprep.subr.mxu1 %v9182_v2  ;;  %v5352_v8 = vld [vmem:[%s9201_s0 + $0x160] sm:$0xff]  ;;  %v5351_v10 = vld [vmem:[%s9201_s0 + $0x158] sm:$0xff]  ;;  %v5350_v12 = vld [vmem:[%s9201_s0 + $0x150] sm:$0xff] }
  0x16   : > { %629 = vmatprep.subr.mxu0 %v9182_v2  ;;  %872 = vmatpush1.msra.mxu1 %v5354_v3  ;;  %v607_v9 = vld [vmem:[%s9201_s0 + $0x60] sm:$0xff]  ;;  %v606_v11 = vld [vmem:[%s9201_s0 + $0x58] sm:$0xff]  ;;  %v605_v13 = vld [vmem:[%s9201_s0 + $0x50] sm:$0xff] }
  0x17   : > { %630 = vmatpush1.msra.mxu0 %v609_v5  ;;  %873 = vmatprep.subr.mxu1 %v9182_v2  ;;  %v5349_v14 = vld [vmem:[%s9201_s0 + $0x148] sm:$0xff]  ;;  %v5348_v16 = vld [vmem:[%s9201_s0 + $0x140] sm:$0xff]  ;;  %v5347_v18 = vld [vmem:[%s9201_s0 + $0x138] sm:$0xff] }
  0x18   : > { %631 = vmatprep.subr.mxu0 %v9182_v2  ;;  %874 = vmatpush1.msra.mxu1 %v5353_v6  ;;  %v604_v15 = vld [vmem:[%s9201_s0 + $0x48] sm:$0xff]  ;;  %v603_v17 = vld [vmem:[%s9201_s0 + $0x40] sm:$0xff]  ;;  %v602_v19 = vld [vmem:[%s9201_s0 + $0x38] sm:$0xff] }
  0x19   : > { %632 = vmatpush1.msra.mxu0 %v608_v7  ;;  %875 = vmatprep.subr.mxu1 %v9182_v2  ;;  %v5346_v20 = vld [vmem:[%s9201_s0 + $0x130] sm:$0xff]  ;;  %v5345_v22 = vld [vmem:[%s9201_s0 + $0x128] sm:$0xff]  ;;  %v5344_v24 = vld [vmem:[%s9201_s0 + $0x120] sm:$0xff] }
  0x1a   : > { %633 = vmatprep.subr.mxu0 %v9182_v2  ;;  %876 = vmatpush1.msra.mxu1 %v5352_v8  ;;  %v601_v21 = vld [vmem:[%s9201_s0 + $0x30] sm:$0xff]  ;;  %v600_v23 = vld [vmem:[%s9201_s0 + $0x28] sm:$0xff]  ;;  %v599_v25 = vld [vmem:[%s9201_s0 + $0x20] sm:$0xff] }
  0x1b   : > { %634 = vmatpush1.msra.mxu0 %v607_v9  ;;  %877 = vmatprep.subr.mxu1 %v9182_v2  ;;  %v5343_v26 = vld [vmem:[%s9201_s0 + $0x118] sm:$0xff]  ;;  %v5342_v28 = vld [vmem:[%s9201_s0 + $0x110] sm:$0xff]  ;;  %v5341_v30 = vld [vmem:[%s9201_s0 + $0x108] sm:$0xff] }
  0x1c   : > { %635 = vmatprep.subr.mxu0 %v9182_v2  ;;  %878 = vmatpush1.msra.mxu1 %v5351_v10  ;;  %v598_v27 = vld [vmem:[%s9201_s0 + $0x18] sm:$0xff]  ;;  %v597_v29 = vld [vmem:[%s9201_s0 + $0x10] sm:$0xff]  ;;  %v596_v31 = vld [vmem:[%s9201_s0 + $0x8] sm:$0xff] }
  0x1d   : > { %636 = vmatpush1.msra.mxu0 %v606_v11  ;;  %879 = vmatprep.subr.mxu1 %v9182_v2  ;;  %v5340_v32 = vld [vmem:[%s9201_s0 + $0x100] sm:$0xff]  ;;  %v5371_v34 = vld [vmem:[%s9201_s0 + $0x1f8] sm:$0xff]  ;;  %v5370_v36 = vld [vmem:[%s9201_s0 + $0x1f0] sm:$0xff] }
  0x1e   : > { %637 = vmatprep.subr.mxu0 %v9182_v2  ;;  %880 = vmatpush1.msra.mxu1 %v5350_v12  ;;  %v595_v33 = vld [vmem:[%s9201_s0] sm:$0xff]  ;;  %v626_v35 = vld [vmem:[%s9201_s0 + $0xf8] sm:$0xff]  ;;  %v625_v37 = vld [vmem:[%s9201_s0 + $0xf0] sm:$0xff] }
  0x1f   : > { %638 = vmatpush1.msra.mxu0 %v605_v13  ;;  %881 = vmatprep.subr.mxu1 %v9182_v2  ;;  %v5369_v38 = vld [vmem:[%s9201_s0 + $0x1e8] sm:$0xff]  ;;  %v5368_v40 = vld [vmem:[%s9201_s0 + $0x1e0] sm:$0xff]  ;;  %v5367_v42 = vld [vmem:[%s9201_s0 + $0x1d8] sm:$0xff] }
  0x20   : > { %639 = vmatprep.subr.mxu0 %v9182_v2  ;;  %882 = vmatpush1.msra.mxu1 %v5349_v14  ;;  %v624_v39 = vld [vmem:[%s9201_s0 + $0xe8] sm:$0xff]  ;;  %v623_v41 = vld [vmem:[%s9201_s0 + $0xe0] sm:$0xff]  ;;  %v622_v43 = vld [vmem:[%s9201_s0 + $0xd8] sm:$0xff] }
  0x21   : > { %640 = vmatpush1.msra.mxu0 %v604_v15  ;;  %883 = vmatprep.subr.mxu1 %v9182_v2  ;;  %v5366_v44 = vld [vmem:[%s9201_s0 + $0x1d0] sm:$0xff]  ;;  %v5365_v46 = vld [vmem:[%s9201_s0 + $0x1c8] sm:$0xff]  ;;  %v5364_v48 = vld [vmem:[%s9201_s0 + $0x1c0] sm:$0xff] }
  0x22   : > { %641 = vmatprep.subr.mxu0 %v9182_v2  ;;  %884 = vmatpush1.msra.mxu1 %v5348_v16  ;;  %v621_v45 = vld [vmem:[%s9201_s0 + $0xd0] sm:$0xff]  ;;  %v620_v47 = vld [vmem:[%s9201_s0 + $0xc8] sm:$0xff]  ;;  %v619_v49 = vld [vmem:[%s9201_s0 + $0xc0] sm:$0xff] }
  0x23   : > { %642 = vmatpush1.msra.mxu0 %v603_v17  ;;  %885 = vmatprep.subr.mxu1 %v9182_v2  ;;  %v5363_v50 = vld [vmem:[%s9201_s0 + $0x1b8] sm:$0xff]  ;;  %v5362_v52 = vld [vmem:[%s9201_s0 + $0x1b0] sm:$0xff]  ;;  %v5361_v54 = vld [vmem:[%s9201_s0 + $0x1a8] sm:$0xff] }
  0x24   : > { %643 = vmatprep.subr.mxu0 %v9182_v2  ;;  %886 = vmatpush1.msra.mxu1 %v5347_v18  ;;  %v618_v51 = vld [vmem:[%s9201_s0 + $0xb8] sm:$0xff]  ;;  %v617_v53 = vld [vmem:[%s9201_s0 + $0xb0] sm:$0xff]  ;;  %v616_v55 = vld [vmem:[%s9201_s0 + $0xa8] sm:$0xff] }
  0x25   : > { %644 = vmatpush1.msra.mxu0 %v602_v19  ;;  %887 = vmatprep.subr.mxu1 %v9182_v2  ;;  %v5360_v56 = vld [vmem:[%s9201_s0 + $0x1a0] sm:$0xff]  ;;  %v548_v57 = vld [vmem:[%s7088_s18 + $0x8] sm:$0xff]  ;;  %v5359_v59 = vld [vmem:[%s9201_s0 + $0x198] sm:$0xff] }
  0x26   : > { %645 = vmatprep.subr.mxu0 %v9182_v2  ;;  %888 = vmatpush1.msra.mxu1 %v5346_v20  ;;  %v615_v58 = vld [vmem:[%s9201_s0 + $0xa0] sm:$0xff]  ;;  %v614_v60 = vld [vmem:[%s9201_s0 + $0x98] sm:$0xff]  ;;  %v5358_v61 = vld [vmem:[%s9201_s0 + $0x190] sm:$0xff] }
  0x27   : > { %646 = vmatpush1.msra.mxu0 %v601_v21  ;;  %889 = vmatprep.subr.mxu1 %v9182_v2  ;;  %v613_v62 = vld [vmem:[%s9201_s0 + $0x90] sm:$0xff]  ;;  %v5357_v63 = vld [vmem:[%s9201_s0 + $0x188] sm:$0xff]  ;;  %v5356_v1 = vld [vmem:[%s9201_s0 + $0x180] sm:$0xff] }
  0x28   : > { %647 = vmatprep.subr.mxu0 %v9182_v2  ;;  %890 = vmatpush1.msra.mxu1 %v5345_v22  ;;  %v612_v0 = vld [vmem:[%s9201_s0 + $0x88] sm:$0xff]  ;;  %v547_v3 = vld [vmem:[%s7088_s18] sm:$0xff]  ;;  %v550_v5 = vld [vmem:[%s7088_s18 + $0x18] sm:$0xff] }
  0x29   : > { %648 = vmatpush1.msra.mxu0 %v600_v23  ;;  %891 = vmatprep.subr.mxu1 %v9182_v2  ;;  %v611_v4 = vld [vmem:[%s9201_s0 + $0x80] sm:$0xff]  ;;  %v549_v6 = vld [vmem:[%s7088_s18 + $0x10] sm:$0xff]  ;;  %v552_v7 = vld [vmem:[%s7088_s18 + $0x28] sm:$0xff] }
  0x2a   : > { %649 = vmatprep.subr.mxu0 %v9182_v2  ;;  %892 = vmatpush1.msra.mxu1 %v5344_v24  ;;  %v551_v8 = vld [vmem:[%s7088_s18 + $0x20] sm:$0xff]  ;;  %v554_v9 = vld [vmem:[%s7088_s18 + $0x38] sm:$0xff]  ;;  %v553_v10 = vld [vmem:[%s7088_s18 + $0x30] sm:$0xff] }
  0x2b   : > { %650 = vmatpush1.msra.mxu0 %v599_v25  ;;  %893 = vmatprep.subr.mxu1 %v9182_v2  ;;  %v556_v11 = vld [vmem:[%s7088_s18 + $0x48] sm:$0xff]  ;;  %v555_v12 = vld [vmem:[%s7088_s18 + $0x40] sm:$0xff]  ;;  %v558_v13 = vld [vmem:[%s7088_s18 + $0x58] sm:$0xff] }
  0x2c   : > { %651 = vmatprep.subr.mxu0 %v9182_v2  ;;  %894 = vmatpush1.msra.mxu1 %v5343_v26  ;;  %v7154_v14 = vld [vmem:[%s7088_s18 + $0x50] sm:$0xff]  ;;  %v7157_v15 = vld [vmem:[%s7088_s18 + $0x68] sm:$0xff]  ;;  %v7162_v16 = vld [vmem:[%s7088_s18 + $0x60] sm:$0xff] }
  0x2d   : > { %652 = vmatpush1.msra.mxu0 %v598_v27  ;;  %895 = vmatprep.subr.mxu1 %v9182_v2  ;;  %v7165_v17 = vld [vmem:[%s7088_s18 + $0x78] sm:$0xff]  ;;  %v7172_v18 = vld [vmem:[%s7088_s18 + $0x70] sm:$0xff]  ;;  %v7175_v19 = vld [vmem:[%s7088_s18 + $0x88] sm:$0xff] }
  0x2e   : > { %653 = vmatprep.subr.mxu0 %v9182_v2  ;;  %896 = vmatpush1.msra.mxu1 %v5342_v28  ;;  %v7182_v20 = vld [vmem:[%s7088_s18 + $0x80] sm:$0xff]  ;;  %v7185_v21 = vld [vmem:[%s7088_s18 + $0x98] sm:$0xff]  ;;  %v7192_v22 = vld [vmem:[%s7088_s18 + $0x90] sm:$0xff] }
  0x2f   : > { %654 = vmatpush1.msra.mxu0 %v597_v29  ;;  %897 = vmatprep.subr.mxu1 %v9182_v2  ;;  %v7195_v23 = vld [vmem:[%s7088_s18 + $0xa8] sm:$0xff]  ;;  %v7202_v24 = vld [vmem:[%s7088_s18 + $0xa0] sm:$0xff]  ;;  %v7205_v25 = vld [vmem:[%s7088_s18 + $0xb8] sm:$0xff] }
  0x30   : > { %655 = vmatprep.subr.mxu0 %v9182_v2  ;;  %898 = vmatpush1.msra.mxu1 %v5341_v30  ;;  %v7212_v26 = vld [vmem:[%s7088_s18 + $0xb0] sm:$0xff]  ;;  %v7215_v27 = vld [vmem:[%s7088_s18 + $0xc8] sm:$0xff]  ;;  %v7222_v28 = vld [vmem:[%s7088_s18 + $0xc0] sm:$0xff] }
  0x31   : > { %656 = vmatpush1.msra.mxu0 %v596_v31  ;;  %899 = vmatprep.subr.mxu1 %v9182_v2  ;;  %v7225_v29 = vld [vmem:[%s7088_s18 + $0xd8] sm:$0xff]  ;;  %v7232_v30 = vld [vmem:[%s7088_s18 + $0xd0] sm:$0xff]  ;;  %v7235_v31 = vld [vmem:[%s7088_s18 + $0xe8] sm:$0xff] }
  0x32   : > { %657 = vmatprep.subr.mxu0 %v9182_v2  ;;  %900 = vmatpush1.msra.mxu1 %v5340_v32  ;;  %v7242_v32 = vld [vmem:[%s7088_s18 + $0xe0] sm:$0xff] }
  0x33   : > { %658 = vmatpush1.msra.mxu0 %v595_v33  ;;  %901 = vmatprep.subr.mxu1 %v9182_v2  ;;  %v7245_v33 = vld [vmem:[%s7088_s18 + $0xf8] sm:$0xff] }
  0x34   : > { %659 = vmatprep.subr.mxu0 %v9182_v2  ;;  %902 = vmatpush2.msra.mxu1 %v5371_v34  ;;  %v7252_v34 = vld [vmem:[%s7088_s18 + $0xf0] sm:$0xff] }
  0x35   : > { %660 = vmatpush2.msra.mxu0 %v626_v35  ;;  %903 = vmatprep.subr.mxu1 %v9182_v2  ;;  %v7255_v35 = vld [vmem:[%s7088_s18 + $0x108] sm:$0xff] }
  0x36   : > { %661 = vmatprep.subr.mxu0 %v9182_v2  ;;  %904 = vmatpush2.msra.mxu1 %v5370_v36  ;;  %v7262_v36 = vld [vmem:[%s7088_s18 + $0x100] sm:$0xff] }
  0x37   : > { %662 = vmatpush2.msra.mxu0 %v625_v37  ;;  %905 = vmatprep.subr.mxu1 %v9182_v2  ;;  %9203 = vst [vmem:[#allocation3_spill] sm:$0xff] %v7262_v36  ;;  %v7265_v37 = vld [vmem:[%s7088_s18 + $0x118] sm:$0xff] }
  0x38   : > { %663 = vmatprep.subr.mxu0 %v9182_v2  ;;  %906 = vmatpush2.msra.mxu1 %v5369_v38  ;;  %9204 = vst [vmem:[#allocation4_spill] sm:$0xff] %v7265_v37  ;;  %v7272_v38 = vld [vmem:[%s7088_s18 + $0x110] sm:$0xff] }
  0x39   : > { %664 = vmatpush2.msra.mxu0 %v624_v39  ;;  %907 = vmatprep.subr.mxu1 %v9182_v2  ;;  %9205 = vst [vmem:[#allocation5_spill] sm:$0xff] %v7272_v38  ;;  %v7275_v39 = vld [vmem:[%s7088_s18 + $0x128] sm:$0xff] }
  0x3a   : > { %665 = vmatprep.subr.mxu0 %v9182_v2  ;;  %908 = vmatpush2.msra.mxu1 %v5368_v40  ;;  %9206 = vst [vmem:[#allocation6_spill] sm:$0xff] %v7275_v39  ;;  %v7282_v40 = vld [vmem:[%s7088_s18 + $0x120] sm:$0xff] }
  0x3b   : > { %666 = vmatpush2.msra.mxu0 %v623_v41  ;;  %909 = vmatprep.subr.mxu1 %v9182_v2  ;;  %9207 = vst [vmem:[#allocation7_spill] sm:$0xff] %v7282_v40  ;;  %v7285_v41 = vld [vmem:[%s7088_s18 + $0x138] sm:$0xff] }
  0x3c   : > { %667 = vmatprep.subr.mxu0 %v9182_v2  ;;  %910 = vmatpush2.msra.mxu1 %v5367_v42  ;;  %9208 = vst [vmem:[#allocation8_spill] sm:$0xff] %v7285_v41  ;;  %v7292_v42 = vld [vmem:[%s7088_s18 + $0x130] sm:$0xff] }
  0x3d   : > { %668 = vmatpush2.msra.mxu0 %v622_v43  ;;  %911 = vmatprep.subr.mxu1 %v9182_v2  ;;  %9209 = vst [vmem:[#allocation9_spill] sm:$0xff] %v7292_v42  ;;  %v7295_v43 = vld [vmem:[%s7088_s18 + $0x148] sm:$0xff] }
  0x3e   : > { %669 = vmatprep.subr.mxu0 %v9182_v2  ;;  %912 = vmatpush2.msra.mxu1 %v5366_v44  ;;  %9210 = vst [vmem:[#allocation10_spill] sm:$0xff] %v7295_v43  ;;  %v7302_v44 = vld [vmem:[%s7088_s18 + $0x140] sm:$0xff] }
  0x3f   : > { %670 = vmatpush2.msra.mxu0 %v621_v45  ;;  %913 = vmatprep.subr.mxu1 %v9182_v2  ;;  %9211 = vst [vmem:[#allocation11_spill] sm:$0xff] %v7302_v44  ;;  %v7305_v45 = vld [vmem:[%s7088_s18 + $0x158] sm:$0xff] }
  0x40   : > { %671 = vmatprep.subr.mxu0 %v9182_v2  ;;  %914 = vmatpush2.msra.mxu1 %v5365_v46  ;;  %9212 = vst [vmem:[#allocation12_spill] sm:$0xff] %v7305_v45  ;;  %v7312_v46 = vld [vmem:[%s7088_s18 + $0x150] sm:$0xff] }
  0x41   : > { %672 = vmatpush2.msra.mxu0 %v620_v47  ;;  %915 = vmatprep.subr.mxu1 %v9182_v2  ;;  %9213 = vst [vmem:[#allocation13_spill] sm:$0xff] %v7312_v46  ;;  %v7315_v47 = vld [vmem:[%s7088_s18 + $0x168] sm:$0xff] }
  0x42   : > { %673 = vmatprep.subr.mxu0 %v9182_v2  ;;  %916 = vmatpush2.msra.mxu1 %v5364_v48  ;;  %9214 = vst [vmem:[#allocation14_spill] sm:$0xff] %v7315_v47  ;;  %v7322_v48 = vld [vmem:[%s7088_s18 + $0x160] sm:$0xff] }
  0x43   : > { %674 = vmatpush2.msra.mxu0 %v619_v49  ;;  %917 = vmatprep.subr.mxu1 %v9182_v2  ;;  %9215 = vst [vmem:[#allocation15_spill] sm:$0xff] %v7322_v48  ;;  %v7325_v49 = vld [vmem:[%s7088_s18 + $0x178] sm:$0xff] }
  0x44   : > { %675 = vmatprep.subr.mxu0 %v9182_v2  ;;  %918 = vmatpush2.msra.mxu1 %v5363_v50  ;;  %9216 = vst [vmem:[#allocation16_spill] sm:$0xff] %v7325_v49  ;;  %v7332_v50 = vld [vmem:[%s7088_s18 + $0x170] sm:$0xff] }
  0x45   : > { %676 = vmatpush2.msra.mxu0 %v618_v51  ;;  %919 = vmatprep.subr.mxu1 %v9182_v2  ;;  %9217 = vst [vmem:[#allocation17_spill] sm:$0xff] %v7332_v50  ;;  %v5373_v51 = vld [vmem:[%s9165_s2 + $0xc8] sm:$0xff] }
  0x46   : > { %677 = vmatprep.subr.mxu0 %v9182_v2  ;;  %920 = vmatpush2.msra.mxu1 %v5362_v52  ;;  %v813_v52 = vld [vmem:[%s9165_s2 + $0x8] sm:$0xff] }
  0x47   : > { %678 = vmatpush2.msra.mxu0 %v617_v53  ;;  %921 = vmatprep.subr.mxu1 %v9182_v2 }
  0x48   : > { %679 = vmatprep.subr.mxu0 %v9182_v2  ;;  %922 = vmatpush2.msra.mxu1 %v5361_v54 }
  0x49   : > { %680 = vmatpush2.msra.mxu0 %v616_v55  ;;  %923 = vmatprep.subr.mxu1 %v9182_v2 }
  0x4a   : > { %681 = vmatprep.subr.mxu0 %v9182_v2  ;;  %924 = vmatpush2.msra.mxu1 %v5360_v56 }
  0x4b   : > { %933 = vmatprep.mubr.f32.mxu1 %v548_v57  ;;  %925 = vmatprep.subr.mxu1 %v9182_v2 }
  0x4c   : > { %682 = vmatpush2.msra.mxu0 %v615_v58  ;;  %926 = vmatpush2.msra.mxu1 %v5359_v59 }
  0x4d   : > { %683 = vmatprep.subr.mxu0 %v9182_v2  ;;  %927 = vmatprep.subr.mxu1 %v9182_v2 }
  0x4e   : > { %684 = vmatpush2.msra.mxu0 %v614_v60  ;;  %928 = vmatpush2.msra.mxu1 %v5358_v61 }
  0x4f   : > { %685 = vmatprep.subr.mxu0 %v9182_v2  ;;  %929 = vmatprep.subr.mxu1 %v9182_v2 }
  0x50   : > { %686 = vmatpush2.msra.mxu0 %v613_v62  ;;  %930 = vmatpush2.msra.mxu1 %v5357_v63 }
  0x51   : > { %687 = vmatprep.subr.mxu0 %v9182_v2  ;;  %931 = vmatprep.subr.mxu1 %v9182_v2 }
  0x52   : > { %688 = vmatpush2.msra.mxu0 %v612_v0  ;;  %932 = vmatpush2.msra.mxu1 %v5356_v1 }
  0x53   : > { %689 = vmatprep.subr.mxu0 %v9182_v2  ;;  %934 = vmatmul.mubr.f32.vlgmr.msra.gmra.mxu1 %v547_v3 }
  0x54   : > { %690 = vmatpush2.msra.mxu0 %v611_v4  ;;  %938 = vmatprep.mubr.f32.mxu1 %v550_v5 }
  0x55   : > { %691 = vmatprep.mubr.f32.mxu0 %v548_v57  ;;  %1116 = vmatprep.subr.mxu0 %v9182_v2 }
  0x56   : > { %692 = vmatmul.mubr.f32.vlgmr.msra.gmra.mxu0 %v547_v3  ;;  %1277 = vmatprep.subr.mxu1 %v9182_v2 }
  0x57   : > { %696 = vmatprep.mubr.f32.mxu0 %v550_v5  ;;  %939 = vmatmul.mubr.f32.gmra.mxu1 %v549_v6 }
  0x58   : > { %943 = vmatprep.mubr.f32.mxu1 %v552_v7 }
  0x5a   : > { %697 = vmatmul.mubr.f32.gmra.mxu0 %v549_v6 }
  0x5b   : > { %701 = vmatprep.mubr.f32.mxu0 %v552_v7  ;;  %944 = vmatmul.mubr.f32.gmra.mxu1 %v551_v8 }
  0x5c   : > { %948 = vmatprep.mubr.f32.mxu1 %v554_v9 }
  0x5e   : > { %702 = vmatmul.mubr.f32.gmra.mxu0 %v551_v8 }
  0x5f   : > { %706 = vmatprep.mubr.f32.mxu0 %v554_v9  ;;  %949 = vmatmul.mubr.f32.gmra.mxu1 %v553_v10 }
  0x60   : > { %953 = vmatprep.mubr.f32.mxu1 %v556_v11 }
  0x62   : > { %707 = vmatmul.mubr.f32.gmra.mxu0 %v553_v10 }
  0x63   : > { %711 = vmatprep.mubr.f32.mxu0 %v556_v11  ;;  %954 = vmatmul.mubr.f32.gmra.mxu1 %v555_v12 }
  0x64   : > { %958 = vmatprep.mubr.f32.mxu1 %v558_v13 }
  0x66   : > { %712 = vmatmul.mubr.f32.gmra.mxu0 %v555_v12 }
  0x67   : > { %716 = vmatprep.mubr.f32.mxu0 %v558_v13  ;;  %959 = vmatmul.mubr.f32.gmra.mxu1 %v7154_v14 }
  0x68   : > { %963 = vmatprep.mubr.f32.mxu1 %v7157_v15 }
  0x6a   : > { %717 = vmatmul.mubr.f32.gmra.mxu0 %v7154_v14 }
  0x6b   : > { %721 = vmatprep.mubr.f32.mxu0 %v7157_v15  ;;  %964 = vmatmul.mubr.f32.gmra.mxu1 %v7162_v16 }
  0x6c   : > { %968 = vmatprep.mubr.f32.mxu1 %v7165_v17 }
  0x6e   : > { %722 = vmatmul.mubr.f32.gmra.mxu0 %v7162_v16 }
  0x6f   : > { %726 = vmatprep.mubr.f32.mxu0 %v7165_v17  ;;  %969 = vmatmul.mubr.f32.gmra.mxu1 %v7172_v18 }
  0x70   : > { %973 = vmatprep.mubr.f32.mxu1 %v7175_v19 }
  0x72   : > { %727 = vmatmul.mubr.f32.gmra.mxu0 %v7172_v18 }
  0x73   : > { %731 = vmatprep.mubr.f32.mxu0 %v7175_v19  ;;  %974 = vmatmul.mubr.f32.gmra.mxu1 %v7182_v20 }
  0x74   : > { %978 = vmatprep.mubr.f32.mxu1 %v7185_v21 }
  0x76   : > { %732 = vmatmul.mubr.f32.gmra.mxu0 %v7182_v20 }
  0x77   : > { %736 = vmatprep.mubr.f32.mxu0 %v7185_v21  ;;  %979 = vmatmul.mubr.f32.gmra.mxu1 %v7192_v22 }
  0x78   : > { %983 = vmatprep.mubr.f32.mxu1 %v7195_v23 }
  0x7a   : > { %737 = vmatmul.mubr.f32.gmra.mxu0 %v7192_v22 }
  0x7b   : > { %741 = vmatprep.mubr.f32.mxu0 %v7195_v23  ;;  %984 = vmatmul.mubr.f32.gmra.mxu1 %v7202_v24 }
  0x7c   : > { %988 = vmatprep.mubr.f32.mxu1 %v7205_v25 }
  0x7e   : > { %742 = vmatmul.mubr.f32.gmra.mxu0 %v7202_v24 }
  0x7f   : > { %746 = vmatprep.mubr.f32.mxu0 %v7205_v25  ;;  %989 = vmatmul.mubr.f32.gmra.mxu1 %v7212_v26 }
  0x80   : > { %993 = vmatprep.mubr.f32.mxu1 %v7215_v27 }
  0x82   : > { %747 = vmatmul.mubr.f32.gmra.mxu0 %v7212_v26 }
  0x83   : > { %751 = vmatprep.mubr.f32.mxu0 %v7215_v27  ;;  %994 = vmatmul.mubr.f32.gmra.mxu1 %v7222_v28 }
  0x84   : > { %998 = vmatprep.mubr.f32.mxu1 %v7225_v29 }
  0x86   : > { %752 = vmatmul.mubr.f32.gmra.mxu0 %v7222_v28 }
  0x87   : > { %756 = vmatprep.mubr.f32.mxu0 %v7225_v29  ;;  %999 = vmatmul.mubr.f32.gmra.mxu1 %v7232_v30 }
  0x88   : > { %1003 = vmatprep.mubr.f32.mxu1 %v7235_v31 }
  0x8a   : > { %757 = vmatmul.mubr.f32.gmra.mxu0 %v7232_v30 }
  0x8b   : > { %761 = vmatprep.mubr.f32.mxu0 %v7235_v31  ;;  %1004 = vmatmul.mubr.f32.gmra.mxu1 %v7242_v32 }
  0x8c   : > { %1008 = vmatprep.mubr.f32.mxu1 %v7245_v33 }
  0x8e   : > { %762 = vmatmul.mubr.f32.gmra.mxu0 %v7242_v32 }
  0x8f   : > { %766 = vmatprep.mubr.f32.mxu0 %v7245_v33  ;;  %1009 = vmatmul.mubr.f32.gmra.mxu1 %v7252_v34 }
  0x90   : > { %1013 = vmatprep.mubr.f32.mxu1 %v7255_v35 }
  0x92   : > { %767 = vmatmul.mubr.f32.gmra.mxu0 %v7252_v34 }
  0x93   : > { %771 = vmatprep.mubr.f32.mxu0 %v7255_v35  ;;  %1014 = vmatmul.mubr.f32.gmra.mxu1 %v7262_v36 }
  0x94   : > { %1018 = vmatprep.mubr.f32.mxu1 %v7265_v37 }
  0x96   : > { %772 = vmatmul.mubr.f32.gmra.mxu0 %v7262_v36  ;;  %v9218_v36 = vmov 0.0  }
  0x97   : > { %776 = vmatprep.mubr.f32.mxu0 %v7265_v37  ;;  %1019 = vmatmul.mubr.f32.gmra.mxu1 %v7272_v38 }
  0x98   : > { %1023 = vmatprep.mubr.f32.mxu1 %v7275_v39 }
  0x9a   : > { %777 = vmatmul.mubr.f32.gmra.mxu0 %v7272_v38 }
  0x9b   : > { %781 = vmatprep.mubr.f32.mxu0 %v7275_v39  ;;  %1024 = vmatmul.mubr.f32.gmra.mxu1 %v7282_v40 }
  0x9c   : > { %1028 = vmatprep.mubr.f32.mxu1 %v7285_v41 }
  0x9e   : > { %782 = vmatmul.mubr.f32.gmra.mxu0 %v7282_v40 }
  0x9f   : > { %786 = vmatprep.mubr.f32.mxu0 %v7285_v41  ;;  %1029 = vmatmul.mubr.f32.gmra.mxu1 %v7292_v42 }
  0xa0   : > { %1033 = vmatprep.mubr.f32.mxu1 %v7295_v43 }
  0xa2   : > { %787 = vmatmul.mubr.f32.gmra.mxu0 %v7292_v42 }
  0xa3   : > { %791 = vmatprep.mubr.f32.mxu0 %v7295_v43  ;;  %1034 = vmatmul.mubr.f32.gmra.mxu1 %v7302_v44 }
  0xa4   : > { %1038 = vmatprep.mubr.f32.mxu1 %v7305_v45 }
  0xa6   : > { %792 = vmatmul.mubr.f32.gmra.mxu0 %v7302_v44 }
  0xa7   : > { %796 = vmatprep.mubr.f32.mxu0 %v7305_v45  ;;  %1039 = vmatmul.mubr.f32.gmra.mxu1 %v7312_v46 }
  0xa8   : > { %1043 = vmatprep.mubr.f32.mxu1 %v7315_v47 }
  0xaa   : > { %797 = vmatmul.mubr.f32.gmra.mxu0 %v7312_v46 }
  0xab   : > { %801 = vmatprep.mubr.f32.mxu0 %v7315_v47  ;;  %1044 = vmatmul.mubr.f32.gmra.mxu1 %v7322_v48 }
  0xac   : > { %1048 = vmatprep.mubr.f32.mxu1 %v7325_v49 }
  0xae   : > { %802 = vmatmul.mubr.f32.gmra.mxu0 %v7322_v48 }
  0xaf   : > { %806 = vmatprep.mubr.f32.mxu0 %v7325_v49  ;;  %1049 = vmatmul.mubr.f32.gmra.mxu1 %v7332_v50 }
  0xb0   : > { %5408 = vmatprep.mubr.msk.f32.mxu1 %vm1079_vm0, %v813_v52 }
  0xb2   : > { %807 = vmatmul.mubr.f32.gmra.mxu0 %v7332_v50 }
  0xb3   : > { %5396 = vmatprep.mubr.msk.f32.mxu0 %vm1079_vm0, %v5373_v51 }
 0x113   : > { %v7346_v53 = vpop.f32.mrf.mxu1 }
 0x115   : > { %v937_v54 = vpop.f32.mrf.mxu1 }
 0x116   : > { %v7348_v55 = vpop.f32.mrf.mxu0 }
 0x117   : > { %v7350_v56 = vpop.f32.mrf.mxu1 }
 0x118   : > { %v695_v57 = vpop.f32.mrf.mxu0 }
 0x119   : > { %v942_v58 = vpop.f32.mrf.mxu1 }
 0x11a   : > { %v7352_v59 = vpop.f32.mrf.mxu0 }
 0x11b   : > { %v7354_v60 = vpop.f32.mrf.mxu1 }
 0x11c   : > { %v700_v61 = vpop.f32.mrf.mxu0 }
 0x11d   : > { %v947_v62 = vpop.f32.mrf.mxu1 }
 0x11e   : > { %v7356_v63 = vpop.f32.mrf.mxu0 }
 0x11f   : > { %v7358_v0 = vpop.f32.mrf.mxu1 }
 0x120   : > { %v705_v1 = vpop.f32.mrf.mxu0 }
 0x121   : > { %v952_v3 = vpop.f32.mrf.mxu1 }
 0x122   : > { %v7360_v4 = vpop.f32.mrf.mxu0 }
 0x123   : > { %v7362_v5 = vpop.f32.mrf.mxu1 }
 0x124   : > { %v710_v6 = vpop.f32.mrf.mxu0 }
 0x125   : > { %v957_v7 = vpop.f32.mrf.mxu1 }
 0x126   : > { %v7364_v8 = vpop.f32.mrf.mxu0 }
 0x127   : > { %v7366_v9 = vpop.f32.mrf.mxu1 }
 0x128   : > { %v715_v10 = vpop.f32.mrf.mxu0 }
 0x129   : > { %v962_v11 = vpop.f32.mrf.mxu1 }
 0x12a   : > { %v7368_v12 = vpop.f32.mrf.mxu0 }
 0x12b   : > { %v7370_v13 = vpop.f32.mrf.mxu1 }
 0x12c   : > { %v720_v51 = vpop.f32.mrf.mxu0 }
 0x12d   : > { %v967_v52 = vpop.f32.mrf.mxu1 }
 0x12e   : > { %v7372_v54 = vpop.f32.mrf.mxu0 }
 0x12f   : > { %v7374_v57 = vpop.f32.mrf.mxu1 }
 0x130   : > { %v725_v58 = vpop.f32.mrf.mxu0 }
 0x131   : > { %v972_v61 = vpop.f32.mrf.mxu1 }
 0x132   : > { %v7376_v62 = vpop.f32.mrf.mxu0 }
 0x133   : > { %v7378_v1 = vpop.f32.mrf.mxu1 }
 0x134   : > { %v730_v3 = vpop.f32.mrf.mxu0 }
 0x135   : > { %v977_v6 = vpop.f32.mrf.mxu1 }
 0x136   : > { %v7380_v7 = vpop.f32.mrf.mxu0 }
 0x137   : > { %v980_v10 = vpop.f32.mrf.mxu1 }
 0x138   : > { %v735_v11 = vpop.f32.mrf.mxu0 }
 0x139   : > { %v982_v2 = vpop.f32.mrf.mxu1 }
 0x13a   : > { %v7382_v50 = vpop.f32.mrf.mxu0 }
 0x13b   : > { %v985_v51 = vpop.f32.mrf.mxu1 }
 0x13c   : > { %v740_v52 = vpop.f32.mrf.mxu0 }
 0x13d   : > { %v987_v49 = vpop.f32.mrf.mxu1 }
 0x13e   : > { %v743_v48 = vpop.f32.mrf.mxu0 }
 0x13f   : > { %v990_v47 = vpop.f32.mrf.mxu1 }
 0x140   : > { %v745_v58 = vpop.f32.mrf.mxu0 }
 0x141   : > { %v992_v61 = vpop.f32.mrf.mxu1 }
 0x142   : > { %v748_v46 = vpop.f32.mrf.mxu0 }
 0x143   : > { %v995_v45 = vpop.f32.mrf.mxu1 }
 0x144   : > { %v750_v44 = vpop.f32.mrf.mxu0 }
 0x145   : > { %v997_v43 = vpop.f32.mrf.mxu1 }
 0x146   : > { %v753_v3 = vpop.f32.mrf.mxu0 }
 0x147   : > { %v1000_v6 = vpop.f32.mrf.mxu1 }
 0x148   : > { %v755_v42 = vpop.f32.mrf.mxu0 }
 0x149   : > { %v1002_v41 = vpop.f32.mrf.mxu1 }
 0x14a   : > { %v758_v40 = vpop.f32.mrf.mxu0 }
 0x14b   : > { %v1005_v11 = vpop.f32.mrf.mxu1 }
 0x14c   : > { %v760_v2 = vpop.f32.mrf.mxu0 }
 0x14d   : > { %v1007_v39 = vpop.f32.mrf.mxu1  ;;  %v5375_v2 = vld [vmem:[%s9165_s2 + $0xd8] sm:$0xff] }
 0x14e   : > { %v763_v38 = vpop.f32.mrf.mxu0 }
 0x14f   : > { %v1010_v37 = vpop.f32.mrf.mxu1 }
 0x150   : > { %v765_v52 = vpop.f32.mrf.mxu0  ;;  %1117 = vmatpush1.msra.mxu0 %v1010_v37 }
 0x151   : > { %v1012_v49 = vpop.f32.mrf.mxu1  ;;  %1118 = vmatprep.subr.mxu0 %v9218_v36  ;;  %v5433_v52 = vld [vmem:[%s9201_s0 + $0x268] sm:$0xff] }
 0x152   : > { %v768_v58 = vpop.f32.mrf.mxu0  ;;  %1119 = vmatpush1.msra.mxu0 %v1005_v11  ;;  %v812_v11 = vld [vmem:[%s9165_s2] sm:$0xff]  ;;  %v815_v49 = vld [vmem:[%s9165_s2 + $0x18] sm:$0xff] }
 0x153   : > { %1278 = vmatpush1.msra.mxu1 %v768_v58  ;;  %v7385_v44 = vpop.f32.mrf.mxu1  ;;  %1120 = vmatprep.subr.mxu0 %v9218_v36  ;;  %v5374_v58 = vld [vmem:[%s9165_s2 + $0xd0] sm:$0xff] }
 0x154   : > { %v770_v42 = vpop.f32.mrf.mxu0  ;;  %1279 = vmatprep.subr.mxu1 %v9218_v36  ;;  %1121 = vmatpush1.msra.mxu0 %v1000_v6  ;;  %v5434_v6 = vld [vmem:[%s9201_s0 + $0x270] sm:$0xff] }
 0x155   : > { %1280 = vmatpush1.msra.mxu1 %v763_v38  ;;  %v1017_v39 = vpop.f32.mrf.mxu1  ;;  %1122 = vmatprep.subr.mxu0 %v9218_v36  ;;  %v5377_v42 = vld [vmem:[%s9165_s2 + $0xe8] sm:$0xff] }
 0x156   : > { %v7390_v41 = vpop.f32.mrf.mxu0  ;;  %1281 = vmatprep.subr.mxu1 %v9218_v36  ;;  %1123 = vmatpush1.msra.mxu0 %v995_v45  ;;  %v814_v39 = vld [vmem:[%s9165_s2 + $0x10] sm:$0xff] }
 0x157   : > { %1282 = vmatpush1.msra.mxu1 %v758_v40  ;;  %v7393_v37 = vpop.f32.mrf.mxu1  ;;  %1124 = vmatprep.subr.mxu0 %v9218_v36 }
 0x158   : > { %v775_v43 = vpop.f32.mrf.mxu0  ;;  %1283 = vmatprep.subr.mxu1 %v9218_v36  ;;  %1125 = vmatpush1.msra.mxu0 %v990_v47 }
 0x159   : > { %1284 = vmatpush1.msra.mxu1 %v753_v3  ;;  %v1022_v61 = vpop.f32.mrf.mxu1  ;;  %1126 = vmatprep.subr.mxu0 %v9218_v36  ;;  %v5376_v43 = vld [vmem:[%s9165_s2 + $0xe0] sm:$0xff] }
 0x15a   : > { %v7398_v38 = vpop.f32.mrf.mxu0  ;;  %1285 = vmatprep.subr.mxu1 %v9218_v36  ;;  %1127 = vmatpush1.msra.mxu0 %v985_v51  ;;  %v5430_v61 = vld [vmem:[%s9201_s0 + $0x250] sm:$0xff] }
 0x15b   : > { %1286 = vmatpush1.msra.mxu1 %v748_v46  ;;  %v7401_v45 = vpop.f32.mrf.mxu1  ;;  %1128 = vmatprep.subr.mxu0 %v9218_v36 }
 0x15c   : > { %v780_v40 = vpop.f32.mrf.mxu0  ;;  %1287 = vmatprep.subr.mxu1 %v9218_v36  ;;  %1129 = vmatpush1.msra.mxu0 %v980_v10 }
 0x15d   : > { %1288 = vmatpush1.msra.mxu1 %v743_v48  ;;  %v1027_v47 = vpop.f32.mrf.mxu1  ;;  %1130 = vmatprep.subr.mxu0 %v9218_v36  ;;  %v5429_v40 = vld [vmem:[%s9201_s0 + $0x248] sm:$0xff] }
 0x15e   : > { %v7406_v3 = vpop.f32.mrf.mxu0  ;;  %1289 = vmatprep.subr.mxu1 %v9218_v36  ;;  %1131 = vmatpush1.msra.mxu0 %v7378_v1  ;;  %v819_v47 = vld [vmem:[%s9165_s2 + $0x38] sm:$0xff] }
 0x15f   : > { %1290 = vmatpush1.msra.mxu1 %v7382_v50  ;;  %v7411_v46 = vpop.f32.mrf.mxu1  ;;  %1132 = vmatprep.subr.mxu0 %v9218_v36 }
 0x160   : > { %v785_v51 = vpop.f32.mrf.mxu0  ;;  %1291 = vmatprep.subr.mxu1 %v9218_v36  ;;  %1133 = vmatpush1.msra.mxu0 %v7374_v57 }
 0x161   : > { %1292 = vmatpush1.msra.mxu1 %v7380_v7  ;;  %v1032_v48 = vpop.f32.mrf.mxu1  ;;  %1134 = vmatprep.subr.mxu0 %v9218_v36  ;;  %v5381_v51 = vld [vmem:[%s9165_s2 + $0x108] sm:$0xff] }
 0x162   : > { %v7418_v10 = vpop.f32.mrf.mxu0  ;;  %1293 = vmatprep.subr.mxu1 %v9218_v36  ;;  %1135 = vmatpush1.msra.mxu0 %v7370_v13  ;;  %v818_v48 = vld [vmem:[%s9165_s2 + $0x30] sm:$0xff] }
 0x163   : > { %1294 = vmatpush1.msra.mxu1 %v7376_v62  ;;  %v1035_v50 = vpop.f32.mrf.mxu1  ;;  %1136 = vmatprep.subr.mxu0 %v9218_v36 }
 0x164   : > { %v790_v1 = vpop.f32.mrf.mxu0  ;;  %1295 = vmatprep.subr.mxu1 %v9218_v36  ;;  %1137 = vmatpush1.msra.mxu0 %v7366_v9 }
 0x165   : > { %1296 = vmatpush1.msra.mxu1 %v7372_v54  ;;  %v1037_v57 = vpop.f32.mrf.mxu1  ;;  %1138 = vmatprep.subr.mxu0 %v9218_v36  ;;  %v5380_v1 = vld [vmem:[%s9165_s2 + $0x100] sm:$0xff] }
 0x166   : > { %v793_v7 = vpop.f32.mrf.mxu0  ;;  %1297 = vmatprep.subr.mxu1 %v9218_v36  ;;  %1139 = vmatpush1.msra.mxu0 %v7362_v5  ;;  %v5426_v57 = vld [vmem:[%s9201_s0 + $0x230] sm:$0xff] }
 0x167   : > { %1298 = vmatpush1.msra.mxu1 %v7368_v12  ;;  %v1040_v13 = vpop.f32.mrf.mxu1  ;;  %1140 = vmatprep.subr.mxu0 %v9218_v36 }
 0x168   : > { %v795_v62 = vpop.f32.mrf.mxu0  ;;  %1299 = vmatprep.subr.mxu1 %v9218_v36  ;;  %1141 = vmatpush1.msra.mxu0 %v7358_v0 }
 0x169   : > { %1300 = vmatpush1.msra.mxu1 %v7364_v8  ;;  %v1042_v9 = vpop.f32.mrf.mxu1  ;;  %1142 = vmatprep.subr.mxu0 %v9218_v36  ;;  %v5425_v62 = vld [vmem:[%s9201_s0 + $0x228] sm:$0xff] }
 0x16a   : > { %v798_v54 = vpop.f32.mrf.mxu0  ;;  %1301 = vmatprep.subr.mxu1 %v9218_v36  ;;  %1143 = vmatpush1.msra.mxu0 %v7354_v60  ;;  %v823_v9 = vld [vmem:[%s9165_s2 + $0x58] sm:$0xff] }
 0x16b   : > { %1302 = vmatpush1.msra.mxu1 %v7360_v4  ;;  %v1045_v5 = vpop.f32.mrf.mxu1  ;;  %1144 = vmatprep.subr.mxu0 %v9218_v36 }
 0x16c   : > { %v800_v12 = vpop.f32.mrf.mxu0  ;;  %1303 = vmatprep.subr.mxu1 %v9218_v36  ;;  %1145 = vmatpush1.msra.mxu0 %v7350_v56 }
 0x16d   : > { %1304 = vmatpush1.msra.mxu1 %v7356_v63  ;;  %v1047_v0 = vpop.f32.mrf.mxu1  ;;  %1146 = vmatprep.subr.mxu0 %v9218_v36  ;;  %v5385_v12 = vld [vmem:[%s9165_s2 + $0x128] sm:$0xff] }
 0x16e   : > { %v803_v8 = vpop.f32.mrf.mxu0  ;;  %1305 = vmatprep.subr.mxu1 %v9218_v36  ;;  %1147 = vmatpush1.msra.mxu0 %v7346_v53  ;;  %v822_v0 = vld [vmem:[%s9165_s2 + $0x50] sm:$0xff] }
 0x16f   : > { %1306 = vmatpush1.msra.mxu1 %v7352_v59  ;;  %v1050_v60 = vpop.f32.mrf.mxu1  ;;  %1164 = vmatprep.subr.mxu0 %v9218_v36  ;;  %v5435_v59 = vld [vmem:[%s9201_s0 + $0x278] sm:$0xff] }
 0x170   : > { %v805_v4 = vpop.f32.mrf.mxu0  ;;  %1307 = vmatprep.subr.mxu1 %v9218_v36  ;;  %1165 = vmatpush2.msra.mxu0 %v1050_v60  ;;  %v825_v60 = vld [vmem:[%s9165_s2 + $0x68] sm:$0xff] }
 0x171   : > { %1308 = vmatpush1.msra.mxu1 %v7348_v55  ;;  %1166 = vmatprep.subr.mxu0 %v9218_v36  ;;  %v1052_v56 = vpop.f32.mrf.mxu1  ;;  %v5372_v55 = vld [vmem:[%s9165_s2 + $0xc0] sm:$0xff] }
 0x172   : > { %v808_v63 = vpop.f32.mrf.mxu0  ;;  %1325 = vmatprep.subr.mxu1 %v9218_v36  ;;  %1167 = vmatpush2.msra.mxu0 %v1045_v5  ;;  %v5424_v5 = vld [vmem:[%s9201_s0 + $0x220] sm:$0xff]  ;;  %v5422_v56 = vld [vmem:[%s9201_s0 + $0x210] sm:$0xff] }
 0x173   : > { %1326 = vmatpush2.msra.mxu1 %v808_v63  ;;  %1168 = vmatprep.subr.mxu0 %v9218_v36  ;;  %v5384_v4 = vld [vmem:[%s9165_s2 + $0x120] sm:$0xff]  ;;  %v5387_v63 = vld [vmem:[%s9165_s2 + $0x138] sm:$0xff] }
 0x174   : > { %1327 = vmatprep.subr.mxu1 %v9218_v36  ;;  %v810_v53 = vpop.f32.mrf.mxu0  ;;  %1169 = vmatpush2.msra.mxu0 %v1040_v13  ;;  %v820_v13 = vld [vmem:[%s9165_s2 + $0x40] sm:$0xff] }
 0x175   : > { %1328 = vmatpush2.msra.mxu1 %v803_v8  ;;  %1170 = vmatprep.subr.mxu0 %v9218_v36  ;;  %v5423_v8 = vld [vmem:[%s9201_s0 + $0x218] sm:$0xff]  ;;  %v824_v53 = vld [vmem:[%s9165_s2 + $0x60] sm:$0xff] }
 0x176   : > { %1329 = vmatprep.subr.mxu1 %v9218_v36  ;;  %1171 = vmatpush2.msra.mxu0 %v1035_v50  ;;  %v821_v50 = vld [vmem:[%s9165_s2 + $0x48] sm:$0xff] }
 0x177   : > { %1330 = vmatpush2.msra.mxu1 %v798_v54  ;;  %1172 = vmatprep.subr.mxu0 %v9218_v36  ;;  %v5382_v54 = vld [vmem:[%s9165_s2 + $0x110] sm:$0xff] }
 0x178   : > { %1331 = vmatprep.subr.mxu1 %v9218_v36  ;;  %1173 = vmatpush2.msra.mxu0 %v7411_v46  ;;  %v5428_v46 = vld [vmem:[%s9201_s0 + $0x240] sm:$0xff] }
 0x179   : > { %1332 = vmatpush2.msra.mxu1 %v793_v7  ;;  %1174 = vmatprep.subr.mxu0 %v9218_v36  ;;  %v5383_v7 = vld [vmem:[%s9165_s2 + $0x118] sm:$0xff] }
 0x17a   : > { %1333 = vmatprep.subr.mxu1 %v9218_v36  ;;  %1175 = vmatpush2.msra.mxu0 %v7401_v45  ;;  %v816_v45 = vld [vmem:[%s9165_s2 + $0x20] sm:$0xff] }
 0x17b   : > { %1334 = vmatpush2.msra.mxu1 %v7418_v10  ;;  %1176 = vmatprep.subr.mxu0 %v9218_v36  ;;  %v5427_v10 = vld [vmem:[%s9201_s0 + $0x238] sm:$0xff] }
 0x17c   : > { %1335 = vmatprep.subr.mxu1 %v9218_v36  ;;  %1177 = vmatpush2.msra.mxu0 %v7393_v37  ;;  %v817_v37 = vld [vmem:[%s9165_s2 + $0x28] sm:$0xff] }
 0x17d   : > { %1336 = vmatpush2.msra.mxu1 %v7406_v3  ;;  %1178 = vmatprep.subr.mxu0 %v9218_v36  ;;  %v5378_v3 = vld [vmem:[%s9165_s2 + $0xf0] sm:$0xff] }
 0x17e   : > { %1337 = vmatprep.subr.mxu1 %v9218_v36  ;;  %1179 = vmatpush2.msra.mxu0 %v7385_v44  ;;  %v5432_v44 = vld [vmem:[%s9201_s0 + $0x260] sm:$0xff] }
 0x17f   : > { %1338 = vmatpush2.msra.mxu1 %v7398_v38  ;;  %1435 = vmatprep.subr.mxu0 %v9218_v36  ;;  %v5379_v38 = vld [vmem:[%s9165_s2 + $0xf8] sm:$0xff] }
 0x180   : > { %1181 = vmatmul.mubr.f32.vlgmr.msra.gmra.mxu0 %v5372_v55  ;;  %1339 = vmatprep.subr.mxu1 %v9218_v36  ;;  %v5421_v55 = vld [vmem:[%s9201_s0 + $0x208] sm:$0xff] }
 0x181   : > { %1436 = vmatpush1.msra.mxu0 %v5435_v59  ;;  %1340 = vmatpush2.msra.mxu1 %v7390_v41  ;;  %v5431_v41 = vld [vmem:[%s9201_s0 + $0x258] sm:$0xff] }
 0x182   : > { %1437 = vmatprep.subr.mxu0 %v9218_v36  ;;  %1342 = vmatmul.mubr.f32.vlgmr.msra.gmra.mxu1 %v812_v11  ;;  %v827_v59 = vld [vmem:[%s9165_s2 + $0x78] sm:$0xff]  ;;  %v5420_v11 = vld [vmem:[%s9201_s0 + $0x200] sm:$0xff] }
 0x183   : > { %1438 = vmatpush1.msra.mxu0 %v5434_v6  ;;  %5397 = vmatprep.mubr.msk.f32.mxu0 %vm1079_vm0, %v5375_v2  ;;  %v5386_v6 = vld [vmem:[%s9165_s2 + $0x130] sm:$0xff]  ;;  %v5389_v2 = vld [vmem:[%s9165_s2 + $0x148] sm:$0xff] }
 0x184   : > { %1439 = vmatprep.subr.mxu0 %v9218_v36  ;;  %5409 = vmatprep.mubr.msk.f32.mxu1 %vm1079_vm0, %v815_v49  ;;  %v5451_v49 = vld [vmem:[%s9201_s0 + $0x2f8] sm:$0xff] }
 0x185   : > { %1440 = vmatpush1.msra.mxu0 %v5433_v52  ;;  %v826_v52 = vld [vmem:[%s9165_s2 + $0x70] sm:$0xff]  ;;  %1681 = vmatprep.subr.mxu1 %v9218_v36 }
 0x186   : > { %1441 = vmatprep.subr.mxu0 %v9218_v36  ;;  %1186 = vmatmul.mubr.f32.gmra.mxu0 %v5374_v58  ;;  %v829_v58 = vld [vmem:[%s9165_s2 + $0x88] sm:$0xff] }
 0x187   : > { %1442 = vmatpush1.msra.mxu0 %v5432_v44  ;;  %5398 = vmatprep.mubr.msk.f32.mxu0 %vm1079_vm0, %v5377_v42  ;;  %v5388_v44 = vld [vmem:[%s9165_s2 + $0x140] sm:$0xff]  ;;  %v5450_v42 = vld [vmem:[%s9201_s0 + $0x2f0] sm:$0xff] }
 0x188   : > { %1443 = vmatprep.subr.mxu0 %v9218_v36  ;;  %1347 = vmatmul.mubr.f32.gmra.mxu1 %v814_v39  ;;  %v5391_v39 = vld [vmem:[%s9165_s2 + $0x158] sm:$0xff] }
 0x189   : > { %1444 = vmatpush1.msra.mxu0 %v5431_v41  ;;  %5410 = vmatprep.mubr.msk.f32.mxu1 %vm1079_vm0, %v817_v37  ;;  %v828_v41 = vld [vmem:[%s9165_s2 + $0x80] sm:$0xff]  ;;  %v5449_v37 = vld [vmem:[%s9201_s0 + $0x2e8] sm:$0xff] }
 0x18a   : > { %1445 = vmatprep.subr.mxu0 %v9218_v36  ;;  %1191 = vmatmul.mubr.f32.gmra.mxu0 %v5376_v43  ;;  %v831_v43 = vld [vmem:[%s9165_s2 + $0x98] sm:$0xff] }
 0x18b   : > { %1446 = vmatpush1.msra.mxu0 %v5430_v61  ;;  %5399 = vmatprep.mubr.msk.f32.mxu0 %vm1079_vm0, %v5379_v38  ;;  %v5390_v61 = vld [vmem:[%s9165_s2 + $0x150] sm:$0xff]  ;;  %v5448_v38 = vld [vmem:[%s9201_s0 + $0x2e0] sm:$0xff] }
 0x18c   : > { %1447 = vmatprep.subr.mxu0 %v9218_v36  ;;  %1352 = vmatmul.mubr.f32.gmra.mxu1 %v816_v45  ;;  %v5393_v45 = vld [vmem:[%s9165_s2 + $0x168] sm:$0xff] }
 0x18d   : > { %1448 = vmatpush1.msra.mxu0 %v5429_v40  ;;  %5411 = vmatprep.mubr.msk.f32.mxu1 %vm1079_vm0, %v819_v47  ;;  %v830_v40 = vld [vmem:[%s9165_s2 + $0x90] sm:$0xff]  ;;  %v5447_v47 = vld [vmem:[%s9201_s0 + $0x2d8] sm:$0xff] }
 0x18e   : > { %1449 = vmatprep.subr.mxu0 %v9218_v36  ;;  %1196 = vmatmul.mubr.f32.gmra.mxu0 %v5378_v3  ;;  %v833_v3 = vld [vmem:[%s9165_s2 + $0xa8] sm:$0xff] }
 0x18f   : > { %1450 = vmatpush1.msra.mxu0 %v5428_v46  ;;  %5400 = vmatprep.mubr.msk.f32.mxu0 %vm1079_vm0, %v5381_v51  ;;  %v5392_v46 = vld [vmem:[%s9165_s2 + $0x160] sm:$0xff]  ;;  %v5446_v51 = vld [vmem:[%s9201_s0 + $0x2d0] sm:$0xff] }
 0x190   : > { %1451 = vmatprep.subr.mxu0 %v9218_v36  ;;  %1357 = vmatmul.mubr.f32.gmra.mxu1 %v818_v48  ;;  %v5395_v48 = vld [vmem:[%s9165_s2 + $0x178] sm:$0xff] }
 0x191   : > { %1452 = vmatpush1.msra.mxu0 %v5427_v10  ;;  %5412 = vmatprep.mubr.msk.f32.mxu1 %vm1079_vm0, %v821_v50  ;;  %v832_v10 = vld [vmem:[%s9165_s2 + $0xa0] sm:$0xff]  ;;  %v5445_v50 = vld [vmem:[%s9201_s0 + $0x2c8] sm:$0xff] }
 0x192   : > { %1453 = vmatprep.subr.mxu0 %v9218_v36  ;;  %1201 = vmatmul.mubr.f32.gmra.mxu0 %v5380_v1  ;;  %v835_v1 = vld [vmem:[%s9165_s2 + $0xb8] sm:$0xff] }
 0x193   : > { %1454 = vmatpush1.msra.mxu0 %v5426_v57  ;;  %5401 = vmatprep.mubr.msk.f32.mxu0 %vm1079_vm0, %v5383_v7  ;;  %v5394_v57 = vld [vmem:[%s9165_s2 + $0x170] sm:$0xff]  ;;  %v5444_v7 = vld [vmem:[%s9201_s0 + $0x2c0] sm:$0xff] }
 0x194   : > { %1455 = vmatprep.subr.mxu0 %v9218_v36  ;;  %1362 = vmatmul.mubr.f32.gmra.mxu1 %v820_v13  ;;  %v834_v13 = vld [vmem:[%s9165_s2 + $0xb0] sm:$0xff] }
 0x195   : > { %1456 = vmatpush1.msra.mxu0 %v5425_v62  ;;  %5413 = vmatprep.mubr.msk.f32.mxu1 %vm1079_vm0, %v823_v9  ;;  %v5443_v62 = vld [vmem:[%s9201_s0 + $0x2b8] sm:$0xff]  ;;  %v6748_v9 = vld [vmem:[%s7088_s18 + $0x8] sm:$0xff] }
 0x196   : > { %1457 = vmatprep.subr.mxu0 %v9218_v36  ;;  %1206 = vmatmul.mubr.f32.gmra.mxu0 %v5382_v54  ;;  %v5442_v54 = vld [vmem:[%s9201_s0 + $0x2b0] sm:$0xff] }
 0x197   : > { %1458 = vmatpush1.msra.mxu0 %v5424_v5  ;;  %5402 = vmatprep.mubr.msk.f32.mxu0 %vm1079_vm0, %v5385_v12  ;;  %v5441_v5 = vld [vmem:[%s9201_s0 + $0x2a8] sm:$0xff]  ;;  %v5440_v12 = vld [vmem:[%s9201_s0 + $0x2a0] sm:$0xff] }
 0x198   : > { %1459 = vmatprep.subr.mxu0 %v9218_v36  ;;  %1367 = vmatmul.mubr.f32.gmra.mxu1 %v822_v0  ;;  %v5439_v0 = vld [vmem:[%s9201_s0 + $0x298] sm:$0xff] }
 0x199   : > { %1460 = vmatpush1.msra.mxu0 %v5423_v8  ;;  %5414 = vmatprep.mubr.msk.f32.mxu1 %vm1079_vm0, %v825_v60  ;;  %v5438_v8 = vld [vmem:[%s9201_s0 + $0x290] sm:$0xff]  ;;  %v5437_v60 = vld [vmem:[%s9201_s0 + $0x288] sm:$0xff] }
 0x19a   : > { %1461 = vmatprep.subr.mxu0 %v9218_v36  ;;  %1211 = vmatmul.mubr.f32.gmra.mxu0 %v5384_v4  ;;  %v5436_v4 = vld [vmem:[%s9201_s0 + $0x280] sm:$0xff] }
 0x19b   : > { %1462 = vmatpush1.msra.mxu0 %v5422_v56  ;;  %5403 = vmatprep.mubr.msk.f32.mxu0 %vm1079_vm0, %v5387_v63  ;;  %v6749_v56 = vld [vmem:[%s7088_s18] sm:$0xff]  ;;  %v6750_v63 = vld [vmem:[%s7088_s18 + $0x18] sm:$0xff] }
 0x19c   : > { %1463 = vmatprep.subr.mxu0 %v9218_v36  ;;  %1372 = vmatmul.mubr.f32.gmra.mxu1 %v824_v53  ;;  %v6751_v53 = vld [vmem:[%s7088_s18 + $0x10] sm:$0xff] }
 0x19d   : > { %1464 = vmatpush1.msra.mxu0 %v5421_v55  ;;  %5415 = vmatprep.mubr.msk.f32.mxu1 %vm1079_vm0, %v827_v59  ;;  %v6752_v55 = vld [vmem:[%s7088_s18 + $0x28] sm:$0xff]  ;;  %v6753_v59 = vld [vmem:[%s7088_s18 + $0x20] sm:$0xff] }
 0x19e   : > { %1465 = vmatprep.subr.mxu0 %v9218_v36  ;;  %1216 = vmatmul.mubr.f32.gmra.mxu0 %v5386_v6  ;;  %v6754_v6 = vld [vmem:[%s7088_s18 + $0x38] sm:$0xff] }
 0x19f   : > { %1466 = vmatpush1.msra.mxu0 %v5420_v11  ;;  %5404 = vmatprep.mubr.msk.f32.mxu0 %vm1079_vm0, %v5389_v2  ;;  %v6755_v11 = vld [vmem:[%s7088_s18 + $0x30] sm:$0xff]  ;;  %v6756_v2 = vld [vmem:[%s7088_s18 + $0x48] sm:$0xff] }
 0x1a0   : > { %1467 = vmatprep.subr.mxu0 %v9218_v36  ;;  %1377 = vmatmul.mubr.f32.gmra.mxu1 %v826_v52  ;;  %v6757_v52 = vld [vmem:[%s7088_s18 + $0x40] sm:$0xff] }
 0x1a1   : > { %1468 = vmatpush2.msra.mxu0 %v5451_v49  ;;  %5416 = vmatprep.mubr.msk.f32.mxu1 %vm1079_vm0, %v829_v58  ;;  %v6758_v49 = vld [vmem:[%s7088_s18 + $0x58] sm:$0xff] }
 0x1a2   : > { %1469 = vmatprep.subr.mxu0 %v9218_v36  ;;  %1221 = vmatmul.mubr.f32.gmra.mxu0 %v5388_v44 }
 0x1a3   : > { %1470 = vmatpush2.msra.mxu0 %v5450_v42  ;;  %5405 = vmatprep.mubr.msk.f32.mxu0 %vm1079_vm0, %v5391_v39 }
 0x1a4   : > { %1471 = vmatprep.subr.mxu0 %v9218_v36  ;;  %1382 = vmatmul.mubr.f32.gmra.mxu1 %v828_v41 }
 0x1a5   : > { %1472 = vmatpush2.msra.mxu0 %v5449_v37  ;;  %5417 = vmatprep.mubr.msk.f32.mxu1 %vm1079_vm0, %v831_v43 }
 0x1a6   : > { %1473 = vmatprep.subr.mxu0 %v9218_v36  ;;  %1226 = vmatmul.mubr.f32.gmra.mxu0 %v5390_v61 }
 0x1a7   : > { %1474 = vmatpush2.msra.mxu0 %v5448_v38  ;;  %5406 = vmatprep.mubr.msk.f32.mxu0 %vm1079_vm0, %v5393_v45 }
 0x1a8   : > { %1475 = vmatprep.subr.mxu0 %v9218_v36  ;;  %1387 = vmatmul.mubr.f32.gmra.mxu1 %v830_v40 }
 0x1a9   : > { %1476 = vmatpush2.msra.mxu0 %v5447_v47  ;;  %5418 = vmatprep.mubr.msk.f32.mxu1 %vm1079_vm0, %v833_v3 }
 0x1aa   : > { %1477 = vmatprep.subr.mxu0 %v9218_v36  ;;  %1231 = vmatmul.mubr.f32.gmra.mxu0 %v5392_v46 }
 0x1ab   : > { %1478 = vmatpush2.msra.mxu0 %v5446_v51  ;;  %5407 = vmatprep.mubr.msk.f32.mxu0 %vm1079_vm0, %v5395_v48 }
 0x1ac   : > { %1479 = vmatprep.subr.mxu0 %v9218_v36  ;;  %1392 = vmatmul.mubr.f32.gmra.mxu1 %v832_v10 }
 0x1ad   : > { %1480 = vmatpush2.msra.mxu0 %v5445_v50  ;;  %5419 = vmatprep.mubr.msk.f32.mxu1 %vm1079_vm0, %v835_v1 }
 0x1ae   : > { %1481 = vmatprep.subr.mxu0 %v9218_v36  ;;  %1236 = vmatmul.mubr.f32.gmra.mxu0 %v5394_v57 }
 0x1af   : > { %1482 = vmatpush2.msra.mxu0 %v5444_v7  ;;  %1499 = vmatprep.mubr.f32.mxu0 %v6748_v9 }
 0x1b0   : > { %1483 = vmatprep.subr.mxu0 %v9218_v36  ;;  %1397 = vmatmul.mubr.f32.gmra.mxu1 %v834_v13 }
 0x1b1   : > { %1484 = vmatpush2.msra.mxu0 %v5443_v62 }
 0x1b2   : > { %1485 = vmatprep.subr.mxu0 %v9218_v36 }
 0x1b3   : > { %1486 = vmatpush2.msra.mxu0 %v5442_v54 }
 0x1b4   : > { %1487 = vmatprep.subr.mxu0 %v9218_v36 }
 0x1b5   : > { %1488 = vmatpush2.msra.mxu0 %v5441_v5 }
 0x1b6   : > { %1489 = vmatprep.subr.mxu0 %v9218_v36 }
 0x1b7   : > { %1490 = vmatpush2.msra.mxu0 %v5440_v12 }
 0x1b8   : > { %1491 = vmatprep.subr.mxu0 %v9218_v36 }
 0x1b9   : > { %1492 = vmatpush2.msra.mxu0 %v5439_v0 }
 0x1ba   : > { %1493 = vmatprep.subr.mxu0 %v9218_v36 }
 0x1bb   : > { %1494 = vmatpush2.msra.mxu0 %v5438_v8 }
 0x1bc   : > { %1495 = vmatprep.subr.mxu0 %v9218_v36 }
 0x1bd   : > { %1496 = vmatpush2.msra.mxu0 %v5437_v60 }
 0x1be   : > { %1497 = vmatprep.subr.mxu0 %v9218_v36 }
 0x1bf   : > { %1498 = vmatpush2.msra.mxu0 %v5436_v4 }
 0x1c0   : > { %1500 = vmatmul.mubr.f32.vlgmr.msra.gmra.mxu0 %v6749_v56 }
 0x1c1   : > { %1504 = vmatprep.mubr.f32.mxu0 %v6750_v63 }
 0x1c4   : > { %1505 = vmatmul.mubr.f32.gmra.mxu0 %v6751_v53 }
 0x1c5   : > { %1509 = vmatprep.mubr.f32.mxu0 %v6752_v55 }
 0x1c8   : > { %1510 = vmatmul.mubr.f32.gmra.mxu0 %v6753_v59 }
 0x1c9   : > { %1514 = vmatprep.mubr.f32.mxu0 %v6754_v6 }
 0x1cc   : > { %1515 = vmatmul.mubr.f32.gmra.mxu0 %v6755_v11 }
 0x1cd   : > { %1519 = vmatprep.mubr.f32.mxu0 %v6756_v2 }
 0x1d0   : > { %1520 = vmatmul.mubr.f32.gmra.mxu0 %v6757_v52 }
 0x1d1   : > { %1524 = vmatprep.mubr.f32.mxu0 %v6758_v49 }
 0x1d4   : > { %1525 = vmatmul.mubr.f32.gmra.mxu0 %v7154_v14  ;;  %v9219_v14 = vld [vmem:[#allocation3_spill] sm:$0xff] }
 0x1d5   : > { %1529 = vmatprep.mubr.f32.mxu0 %v7157_v15  ;;  %v9220_v15 = vld [vmem:[#allocation4_spill] sm:$0xff] }
 0x1d8   : > { %1530 = vmatmul.mubr.f32.gmra.mxu0 %v7162_v16  ;;  %v9221_v16 = vld [vmem:[#allocation5_spill] sm:$0xff] }
 0x1d9   : > { %1534 = vmatprep.mubr.f32.mxu0 %v7165_v17  ;;  %v9222_v17 = vld [vmem:[#allocation6_spill] sm:$0xff] }
 0x1dc   : > { %1535 = vmatmul.mubr.f32.gmra.mxu0 %v7172_v18  ;;  %v9223_v18 = vld [vmem:[#allocation7_spill] sm:$0xff] }
 0x1dd   : > { %1539 = vmatprep.mubr.f32.mxu0 %v7175_v19  ;;  %v9224_v19 = vld [vmem:[#allocation8_spill] sm:$0xff] }
 0x1e0   : > { %1540 = vmatmul.mubr.f32.gmra.mxu0 %v7182_v20  ;;  %v9225_v20 = vld [vmem:[#allocation9_spill] sm:$0xff] }
 0x1e1   : > { %1544 = vmatprep.mubr.f32.mxu0 %v7185_v21  ;;  %v9226_v21 = vld [vmem:[#allocation10_spill] sm:$0xff] }
 0x1e4   : > { %1545 = vmatmul.mubr.f32.gmra.mxu0 %v7192_v22  ;;  %v9227_v22 = vld [vmem:[#allocation11_spill] sm:$0xff] }
 0x1e5   : > { %1549 = vmatprep.mubr.f32.mxu0 %v7195_v23  ;;  %v9228_v23 = vld [vmem:[#allocation12_spill] sm:$0xff] }
 0x1e8   : > { %1550 = vmatmul.mubr.f32.gmra.mxu0 %v7202_v24  ;;  %v9229_v24 = vld [vmem:[#allocation13_spill] sm:$0xff] }
 0x1e9   : > { %1554 = vmatprep.mubr.f32.mxu0 %v7205_v25  ;;  %v9230_v25 = vld [vmem:[#allocation14_spill] sm:$0xff] }
 0x1ec   : > { %1555 = vmatmul.mubr.f32.gmra.mxu0 %v7212_v26  ;;  %v9231_v26 = vld [vmem:[#allocation15_spill] sm:$0xff] }
 0x1ed   : > { %1559 = vmatprep.mubr.f32.mxu0 %v7215_v27  ;;  %v9232_v27 = vld [vmem:[#allocation16_spill] sm:$0xff] }
 0x1f0   : > { %1560 = vmatmul.mubr.f32.gmra.mxu0 %v7222_v28  ;;  %v9233_v28 = vld [vmem:[#allocation17_spill] sm:$0xff] }
 0x1f1   : > { %1564 = vmatprep.mubr.f32.mxu0 %v7225_v29 }
 0x1f4   : > { %1565 = vmatmul.mubr.f32.gmra.mxu0 %v7232_v30 }
 0x1f5   : > { %1569 = vmatprep.mubr.f32.mxu0 %v7235_v31 }
 0x1f8   : > { %1570 = vmatmul.mubr.f32.gmra.mxu0 %v7242_v32 }
 0x1f9   : > { %1574 = vmatprep.mubr.f32.mxu0 %v7245_v33 }
 0x1fc   : > { %1575 = vmatmul.mubr.f32.gmra.mxu0 %v7252_v34 }
 0x1fd   : > { %1579 = vmatprep.mubr.f32.mxu0 %v7255_v35 }
 0x200   : > { %1580 = vmatmul.mubr.f32.gmra.mxu0 %v9219_v14 }
 0x201   : > { %1584 = vmatprep.mubr.f32.mxu0 %v9220_v15 }
 0x204   : > { %1585 = vmatmul.mubr.f32.gmra.mxu0 %v9221_v16 }
 0x205   : > { %1589 = vmatprep.mubr.f32.mxu0 %v9222_v17  ;;  %v5453_v17 = vld [vmem:[%s9165_s2 + $0x188] sm:$0xff] }
 0x206   : > { %5476 = vmatprep.mubr.msk.f32.mxu1 %vm1079_vm0, %v5453_v17 }
 0x208   : > { %1590 = vmatmul.mubr.f32.gmra.mxu0 %v9223_v18 }
 0x209   : > { %1594 = vmatprep.mubr.f32.mxu0 %v9224_v19 }
 0x20c   : > { %1595 = vmatmul.mubr.f32.gmra.mxu0 %v9225_v20 }
 0x20d   : > { %1599 = vmatprep.mubr.f32.mxu0 %v9226_v21 }
 0x210   : > { %1600 = vmatmul.mubr.f32.gmra.mxu0 %v9227_v22 }
 0x211   : > { %1604 = vmatprep.mubr.f32.mxu0 %v9228_v23 }
 0x214   : > { %1605 = vmatmul.mubr.f32.gmra.mxu0 %v9229_v24 }
 0x215   : > { %1609 = vmatprep.mubr.f32.mxu0 %v9230_v25 }
 0x218   : > { %1610 = vmatmul.mubr.f32.gmra.mxu0 %v9231_v26 }
 0x219   : > { %1614 = vmatprep.mubr.f32.mxu0 %v9232_v27 }
 0x21c   : > { %1615 = vmatmul.mubr.f32.gmra.mxu0 %v9233_v28 }
 0x240   : > { %v1182_v29 = vpop.f32.mrf.mxu0 }
 0x242   : > { %v1184_v30 = vpop.f32.mrf.mxu0  ;;  %v1343_v31 = vpop.f32.mrf.mxu1 }
 0x243   : > { %v7810_v32 = vadd.f32 %v1343_v31, %v1182_v29 }
 0x244   : > { %v1345_v33 = vpop.f32.mrf.mxu1 }
 0x245   : > { %v6768_v33 = vmov 0  }
 0x246   : > { %v1187_v34 = vpop.f32.mrf.mxu0  ;;  %6729 = vset.pattern.permute.xlu0 %v6768_v33  ;;  %6730 = vset.pattern.permute.xlu1 %v6768_v33 }
 0x248   : > { %v1189_v35 = vpop.f32.mrf.mxu0  ;;  %v1348_v58 = vpop.f32.mrf.mxu1 }
 0x249   : > { %v7812_v44 = vadd.f32 %v1348_v58, %v1187_v34  ;;  %v1818_v34 = vld [vmem:[%s9166_s3] sm:$0xff] }
 0x24a   : > { %v1192_v42 = vpop.f32.mrf.mxu0  ;;  %v1350_v39 = vpop.f32.mrf.mxu1  ;;  %1832 = vperm.xlu0 %6729, %v1818_v34   ;;  %v4728_v34 = vld [vmem:[%s9175_s12 + $0x8] sm:$0xff] }
 0x24b   : > { %v1819_v39 = vld [vmem:[%s9166_s3 + $0x8] sm:$0xff] }
 0x24c   : > { %v1194_v41 = vpop.f32.mrf.mxu0  ;;  %v1353_v37 = vpop.f32.mrf.mxu1 }
 0x24d   : > { %v7814_v43 = vadd.f32 %v1353_v37, %v1192_v42  ;;  %v1820_v42 = vld [vmem:[%s9166_s3 + $0x10] sm:$0xff] }
 0x24e   : > { %v1197_v61 = vpop.f32.mrf.mxu0  ;;  %v1355_v38 = vpop.f32.mrf.mxu1  ;;  %1842 = vperm.xlu1 %6730, %v1820_v42   ;;  %1837 = vperm.xlu0 %6729, %v1819_v39   ;;  %v4727_v39 = vld [vmem:[%s9175_s12] sm:$0xff] }
 0x24f   : > { %v1822_v38 = vld [vmem:[%s9166_s3 + $0x20] sm:$0xff] }
 0x250   : > { %v1199_v45 = vpop.f32.mrf.mxu0  ;;  %v1358_v40 = vpop.f32.mrf.mxu1 }
 0x251   : > { %v7816_v47 = vadd.f32 %v1358_v40, %v1197_v61  ;;  %v1821_v61 = vld [vmem:[%s9166_s3 + $0x18] sm:$0xff] }
 0x252   : > { %v1202_v3 = vpop.f32.mrf.mxu0  ;;  %v1360_v46 = vpop.f32.mrf.mxu1  ;;  %1847 = vperm.xlu1 %6730, %v1821_v61   ;;  %1852 = vperm.xlu0 %6729, %v1822_v38  }
 0x253   : > { %v1824_v46 = vld [vmem:[%s9166_s3 + $0x30] sm:$0xff] }
 0x254   : > { %v1204_v51 = vpop.f32.mrf.mxu0  ;;  %v1363_v48 = vpop.f32.mrf.mxu1 }
 0x255   : > { %v7818_v10 = vadd.f32 %v1363_v48, %v1202_v3  ;;  %v1823_v3 = vld [vmem:[%s9166_s3 + $0x28] sm:$0xff] }
 0x256   : > { %v1207_v50 = vpop.f32.mrf.mxu0  ;;  %v1365_v1 = vpop.f32.mrf.mxu1  ;;  %1857 = vperm.xlu1 %6730, %v1823_v3   ;;  %1862 = vperm.xlu0 %6729, %v1824_v46   ;;  %v4739_v3 = vld [vmem:[%s9175_s12 + $0x60] sm:$0xff] }
 0x257   : > { %v1826_v1 = vld [vmem:[%s9166_s3 + $0x40] sm:$0xff] }
 0x258   : > { %v1209_v57 = vpop.f32.mrf.mxu0  ;;  %v1368_v7 = vpop.f32.mrf.mxu1 }
 0x259   : > { %v7820_v13 = vadd.f32 %v1368_v7, %v1207_v50  ;;  %v1825_v50 = vld [vmem:[%s9166_s3 + $0x38] sm:$0xff]  ;;  %v1827_v7 = vld [vmem:[%s9166_s3 + $0x48] sm:$0xff] }
 0x25a   : > { %v1212_v62 = vpop.f32.mrf.mxu0  ;;  %v1370_v9 = vpop.f32.mrf.mxu1  ;;  %1867 = vperm.xlu1 %6730, %v1825_v50   ;;  %1872 = vperm.xlu0 %6729, %v1826_v1   ;;  %v4740_v50 = vld [vmem:[%s9175_s12 + $0x68] sm:$0xff] }
 0x25c   : > { %v1214_v54 = vpop.f32.mrf.mxu0  ;;  %v1373_v5 = vpop.f32.mrf.mxu1 }
 0x25d   : > { %v7822_v12 = vadd.f32 %v1373_v5, %v1212_v62  ;;  %v1828_v62 = vld [vmem:[%s9166_s3 + $0x50] sm:$0xff]  ;;  %v1829_v5 = vld [vmem:[%s9166_s3 + $0x58] sm:$0xff] }
 0x25e   : > { %v1217_v0 = vpop.f32.mrf.mxu0  ;;  %v1375_v8 = vpop.f32.mrf.mxu1  ;;  %1877 = vperm.xlu1 %6730, %v1827_v7   ;;  %1882 = vperm.xlu0 %6729, %v1828_v62   ;;  %v4738_v7 = vld [vmem:[%s9175_s12 + $0x58] sm:$0xff] }
 0x260   : > { %v1219_v60 = vpop.f32.mrf.mxu0  ;;  %v1378_v4 = vpop.f32.mrf.mxu1 }
 0x261   : > { %v7824_v56 = vadd.f32 %v1378_v4, %v1217_v0  ;;  %v2637_v0 = vld [vmem:[%s9169_s6] sm:$0xff]  ;;  %v2638_v4 = vld [vmem:[%s9169_s6 + $0x8] sm:$0xff] }
 0x262   : > { %v1222_v63 = vpop.f32.mrf.mxu0  ;;  %v1380_v53 = vpop.f32.mrf.mxu1  ;;  %1887 = vperm.xlu1 %6730, %v1829_v5   ;;  %2643 = vperm.xlu0 %6729, %v2637_v0   ;;  %v4737_v5 = vld [vmem:[%s9175_s12 + $0x50] sm:$0xff] }
 0x264   : > { %v1224_v55 = vpop.f32.mrf.mxu0  ;;  %v1383_v59 = vpop.f32.mrf.mxu1 }
 0x265   : > { %v7826_v6 = vadd.f32 %v1383_v59, %v1222_v63  ;;  %v2639_v63 = vld [vmem:[%s9169_s6 + $0x10] sm:$0xff]  ;;  %v2640_v59 = vld [vmem:[%s9169_s6 + $0x18] sm:$0xff] }
 0x266   : > { %v1227_v11 = vpop.f32.mrf.mxu0  ;;  %v1385_v2 = vpop.f32.mrf.mxu1  ;;  %2648 = vperm.xlu1 %6730, %v2638_v4   ;;  %2653 = vperm.xlu0 %6729, %v2639_v63  }
 0x268   : > { %v1229_v52 = vpop.f32.mrf.mxu0  ;;  %v1388_v49 = vpop.f32.mrf.mxu1 }
 0x269   : > { %v7828_v14 = vadd.f32 %v1388_v49, %v1227_v11  ;;  %v3212_v11 = vld [vmem:[%s9172_s9] sm:$0xff]  ;;  %v3213_v49 = vld [vmem:[%s9172_s9 + $0x8] sm:$0xff] }
 0x26a   : > { %v1232_v15 = vpop.f32.mrf.mxu0  ;;  %v1390_v16 = vpop.f32.mrf.mxu1  ;;  %2658 = vperm.xlu1 %6730, %v2640_v59   ;;  %3216 = vperm.xlu0 %6729, %v3212_v11   ;;  %v1915_v59 = vld [vmem:[%s9167_s4 + $0x68] sm:$0xff] }
 0x26b   : > { %v5457_v11 = vld [vmem:[%s9165_s2 + $0x1a8] sm:$0xff] }
 0x26c   : > { %v1234_v18 = vpop.f32.mrf.mxu0  ;;  %v1393_v19 = vpop.f32.mrf.mxu1 }
 0x26d   : > { %v7834_v20 = vadd.f32 %v1393_v19, %v1232_v15  ;;  %v4734_v15 = vld [vmem:[%s9175_s12 + $0x38] sm:$0xff]  ;;  %v4733_v18 = vld [vmem:[%s9175_s12 + $0x30] sm:$0xff]  ;;  %v4732_v19 = vld [vmem:[%s9175_s12 + $0x28] sm:$0xff] }
 0x26e   : > { %v1237_v21 = vpop.f32.mrf.mxu0  ;;  %v1395_v22 = vpop.f32.mrf.mxu1  ;;  %3221 = vperm.xlu1 %6730, %v3213_v49   ;;  %4788 = vperm.xlu0 %6729, %v4734_v15   ;;  %v1913_v49 = vld [vmem:[%s9167_s4 + $0x58] sm:$0xff] }
 0x26f   : > { %v5459_v15 = vld [vmem:[%s9165_s2 + $0x1b8] sm:$0xff] }
 0x270   : > { %v1239_v23 = vpop.f32.mrf.mxu0  ;;  %v1398_v24 = vpop.f32.mrf.mxu1 }
 0x271   : > { %v7836_v25 = vadd.f32 %v1398_v24, %v1237_v21  ;;  %v4731_v23 = vld [vmem:[%s9175_s12 + $0x20] sm:$0xff]  ;;  %v4730_v24 = vld [vmem:[%s9175_s12 + $0x18] sm:$0xff] }
 0x272   : > { %v1400_v26 = vpop.f32.mrf.mxu1  ;;  %4783 = vperm.xlu1 %6730, %v4733_v18   ;;  %4778 = vperm.xlu0 %6729, %v4732_v19   ;;  %v1911_v18 = vld [vmem:[%s9167_s4 + $0x48] sm:$0xff] }
 0x273   : > { %v5461_v19 = vld [vmem:[%s9165_s2 + $0x1c8] sm:$0xff] }
 0x276   : > { %4773 = vperm.xlu1 %6730, %v4731_v23   ;;  %4768 = vperm.xlu0 %6729, %v4730_v24   ;;  %v1909_v23 = vld [vmem:[%s9167_s4 + $0x38] sm:$0xff] }
 0x277   : > { %v5463_v24 = vld [vmem:[%s9165_s2 + $0x1d8] sm:$0xff] }
 0x27a   : > { %4758 = vperm.xlu0 %6729, %v4728_v34   ;;  %v5465_v34 = vld [vmem:[%s9165_s2 + $0x1e8] sm:$0xff] }
 0x280   : > { %v7838_v27 = vpop.f32.mrf.mxu0 }
 0x282   : > { %v1503_v28 = vpop.f32.mrf.mxu0 }
 0x284   : > { %v7840_v29 = vpop.f32.mrf.mxu0 }
 0x286   : > { %v1508_v30 = vpop.f32.mrf.mxu0 }
 0x287   : > { %v4729_v30 = vld [vmem:[%s9175_s12 + $0x10] sm:$0xff] }
 0x288   : > { %v7842_v31 = vpop.f32.mrf.mxu0  ;;  %4763 = vperm.xlu1 %6730, %v4729_v30   ;;  %v1907_v30 = vld [vmem:[%s9167_s4 + $0x28] sm:$0xff] }
 0x28a   : > { %v1513_v35 = vpop.f32.mrf.mxu0 }
 0x28c   : > { %v7849_v58 = vpop.f32.mrf.mxu0  ;;  %4753 = vperm.xlu1 %6730, %v4727_v39   ;;  %v5467_v39 = vld [vmem:[%s9165_s2 + $0x1f8] sm:$0xff] }
 0x28e   : > { %v1518_v41 = vpop.f32.mrf.mxu0 }
 0x28f   : > { %v4742_v41 = vld [vmem:[%s9175_s12 + $0x78] sm:$0xff] }
 0x290   : > { %v7857_v37 = vpop.f32.mrf.mxu0  ;;  %4828 = vperm.xlu0 %6729, %v4742_v41   ;;  %v5466_v41 = vld [vmem:[%s9165_s2 + $0x1f0] sm:$0xff] }
 0x292   : > { %v1523_v45 = vpop.f32.mrf.mxu0 }
 0x293   : > { %v4741_v45 = vld [vmem:[%s9175_s12 + $0x70] sm:$0xff] }
 0x294   : > { %v7865_v40 = vpop.f32.mrf.mxu0  ;;  %4823 = vperm.xlu1 %6730, %v4741_v45   ;;  %4813 = vperm.xlu0 %6729, %v4739_v3   ;;  %v5471_v45 = vld [vmem:[%s9165_s2 + $0x218] sm:$0xff]  ;;  %v5470_v3 = vld [vmem:[%s9165_s2 + $0x210] sm:$0xff] }
 0x296   : > { %v1528_v51 = vpop.f32.mrf.mxu0 }
 0x298   : > { %v7873_v48 = vpop.f32.mrf.mxu0  ;;  %4818 = vperm.xlu1 %6730, %v4740_v50   ;;  %v5475_v50 = vld [vmem:[%s9165_s2 + $0x238] sm:$0xff] }
 0x29a   : > { %v1533_v57 = vpop.f32.mrf.mxu0 }
 0x29c   : > { %v7887_v9 = vpop.f32.mrf.mxu0  ;;  %4808 = vperm.xlu1 %6730, %v4738_v7   ;;  %v1904_v7 = vld [vmem:[%s9167_s4 + $0x10] sm:$0xff] }
 0x29e   : > { %v1538_v54 = vpop.f32.mrf.mxu0 }
 0x2a0   : > { %v7895_v8 = vpop.f32.mrf.mxu0  ;;  %4803 = vperm.xlu1 %6730, %v4737_v5   ;;  %v5503_v5 = vld [vmem:[%s9167_s4 + $0xf8] sm:$0xff] }
 0x2a2   : > { %v1543_v60 = vpop.f32.mrf.mxu0 }
 0x2a4   : > { %v7903_v53 = vpop.f32.mrf.mxu0 }
 0x2a6   : > { %v1548_v55 = vpop.f32.mrf.mxu0 }
 0x2a7   : > { %v5454_v55 = vld [vmem:[%s9165_s2 + $0x190] sm:$0xff] }
 0x2a8   : > { %v1551_v2 = vpop.f32.mrf.mxu0 }
 0x2aa   : > { %v1553_v52 = vpop.f32.mrf.mxu0 }
 0x2ab   : > { %v5456_v52 = vld [vmem:[%s9165_s2 + $0x1a0] sm:$0xff] }
 0x2ac   : > { %v1556_v16 = vpop.f32.mrf.mxu0 }
 0x2ae   : > { %v1558_v17 = vpop.f32.mrf.mxu0 }
 0x2af   : > { %v5458_v17 = vld [vmem:[%s9165_s2 + $0x1b0] sm:$0xff] }
 0x2b0   : > { %v1561_v21 = vpop.f32.mrf.mxu0 }
 0x2b2   : > { %v1563_v22 = vpop.f32.mrf.mxu0 }
 0x2b3   : > { %v5460_v22 = vld [vmem:[%s9165_s2 + $0x1c0] sm:$0xff] }
 0x2b4   : > { %v1566_v26 = vpop.f32.mrf.mxu0 }
 0x2b6   : > { %v1568_v28 = vpop.f32.mrf.mxu0 }
 0x2b7   : > { %v5462_v28 = vld [vmem:[%s9165_s2 + $0x1d0] sm:$0xff] }
 0x2b8   : > { %v1571_v35 = vpop.f32.mrf.mxu0 }
 0x2ba   : > { %v1573_v42 = vpop.f32.mrf.mxu0 }
 0x2bb   : > { %v5464_v42 = vld [vmem:[%s9165_s2 + $0x1e0] sm:$0xff] }
 0x2bc   : > { %v1576_v61 = vpop.f32.mrf.mxu0 }
 0x2bd   : > { %1682 = vmatpush1.msra.mxu1 %v1576_v61  ;;  %v5469_v61 = vld [vmem:[%s9165_s2 + $0x208] sm:$0xff] }
 0x2be   : > { %v1578_v38 = vpop.f32.mrf.mxu0  ;;  %1683 = vmatprep.subr.mxu1 %v9218_v36 }
 0x2bf   : > { %1684 = vmatpush1.msra.mxu1 %v1571_v35  ;;  %v1906_v35 = vld [vmem:[%s9167_s4 + $0x20] sm:$0xff] }
 0x2c0   : > { %v7948_v46 = vpop.f32.mrf.mxu0  ;;  %1685 = vmatprep.subr.mxu1 %v9218_v36  ;;  %v5468_v38 = vld [vmem:[%s9165_s2 + $0x200] sm:$0xff] }
 0x2c1   : > { %1686 = vmatpush1.msra.mxu1 %v1566_v26  ;;  %v1908_v26 = vld [vmem:[%s9167_s4 + $0x30] sm:$0xff] }
 0x2c2   : > { %v1583_v51 = vpop.f32.mrf.mxu0  ;;  %1687 = vmatprep.subr.mxu1 %v9218_v36 }
 0x2c3   : > { %1688 = vmatpush1.msra.mxu1 %v1561_v21  ;;  %v1910_v21 = vld [vmem:[%s9167_s4 + $0x40] sm:$0xff] }
 0x2c4   : > { %v1586_v1 = vpop.f32.mrf.mxu0  ;;  %1689 = vmatprep.subr.mxu1 %v9218_v36  ;;  %v5472_v51 = vld [vmem:[%s9165_s2 + $0x220] sm:$0xff] }
 0x2c5   : > { %1690 = vmatpush1.msra.mxu1 %v1556_v16  ;;  %v1912_v16 = vld [vmem:[%s9167_s4 + $0x50] sm:$0xff] }
 0x2c6   : > { %v1588_v57 = vpop.f32.mrf.mxu0  ;;  %1691 = vmatprep.subr.mxu1 %v9218_v36 }
 0x2c7   : > { %1692 = vmatpush1.msra.mxu1 %v1551_v2  ;;  %v1914_v2 = vld [vmem:[%s9167_s4 + $0x60] sm:$0xff]  ;;  %v1905_v57 = vld [vmem:[%s9167_s4 + $0x18] sm:$0xff] }
 0x2c8   : > { %v1591_v62 = vpop.f32.mrf.mxu0  ;;  %1693 = vmatprep.subr.mxu1 %v9218_v36 }
 0x2c9   : > { %1694 = vmatpush1.msra.mxu1 %v7903_v53  ;;  %v1916_v53 = vld [vmem:[%s9167_s4 + $0x70] sm:$0xff] }
 0x2ca   : > { %v1593_v54 = vpop.f32.mrf.mxu0  ;;  %1695 = vmatprep.subr.mxu1 %v9218_v36 }
 0x2cb   : > { %1696 = vmatpush1.msra.mxu1 %v7895_v8  ;;  %v1902_v54 = vld [vmem:[%s9167_s4] sm:$0xff] }
 0x2cc   : > { %v1596_v0 = vpop.f32.mrf.mxu0  ;;  %1697 = vmatprep.subr.mxu1 %v9218_v36 }
 0x2cd   : > { %1698 = vmatpush1.msra.mxu1 %v7887_v9 }
 0x2ce   : > { %v1598_v60 = vpop.f32.mrf.mxu0  ;;  %1699 = vmatprep.subr.mxu1 %v9218_v36 }
 0x2cf   : > { %1700 = vmatpush1.msra.mxu1 %v7873_v48 }
 0x2d0   : > { %v1601_v4 = vpop.f32.mrf.mxu0  ;;  %1701 = vmatprep.subr.mxu1 %v9218_v36 }
 0x2d1   : > { %1702 = vmatpush1.msra.mxu1 %v7865_v40 }
 0x2d2   : > { %v1603_v63 = vpop.f32.mrf.mxu0  ;;  %1703 = vmatprep.subr.mxu1 %v9218_v36 }
 0x2d3   : > { %1704 = vmatpush1.msra.mxu1 %v7857_v37 }
 0x2d4   : > { %v1606_v8 = vpop.f32.mrf.mxu0  ;;  %1705 = vmatprep.subr.mxu1 %v9218_v36 }
 0x2d5   : > { %1706 = vmatpush1.msra.mxu1 %v7849_v58 }
 0x2d6   : > { %v1608_v9 = vpop.f32.mrf.mxu0  ;;  %1707 = vmatprep.subr.mxu1 %v9218_v36 }
 0x2d7   : > { %1708 = vmatpush1.msra.mxu1 %v7842_v31  ;;  %v5455_v31 = vld [vmem:[%s9165_s2 + $0x198] sm:$0xff] }
 0x2d8   : > { %v1611_v48 = vpop.f32.mrf.mxu0  ;;  %1709 = vmatprep.subr.mxu1 %v9218_v36 }
 0x2d9   : > { %1710 = vmatpush1.msra.mxu1 %v7840_v29  ;;  %v1917_v29 = vld [vmem:[%s9167_s4 + $0x78] sm:$0xff] }
 0x2da   : > { %v1613_v40 = vpop.f32.mrf.mxu0  ;;  %1711 = vmatprep.subr.mxu1 %v9218_v36 }
 0x2db   : > { %1712 = vmatpush1.msra.mxu1 %v7838_v27  ;;  %v5452_v27 = vld [vmem:[%s9165_s2 + $0x180] sm:$0xff] }
 0x2dc   : > { %v1616_v37 = vpop.f32.mrf.mxu0  ;;  %1729 = vmatprep.subr.mxu1 %v9218_v36 }
 0x2dd   : > { %1730 = vmatpush2.msra.mxu1 %v1616_v37 }
 0x2de   : > { %1731 = vmatprep.subr.mxu1 %v9218_v36  ;;  %v1618_v58 = vpop.f32.mrf.mxu0 }
 0x2df   : > { %1732 = vmatpush2.msra.mxu1 %v1611_v48 }
 0x2e0   : > { %1733 = vmatprep.subr.mxu1 %v9218_v36 }
 0x2e1   : > { %1734 = vmatpush2.msra.mxu1 %v1606_v8 }
 0x2e2   : > { %1735 = vmatprep.subr.mxu1 %v9218_v36 }
 0x2e3   : > { %1736 = vmatpush2.msra.mxu1 %v1601_v4 }
 0x2e4   : > { %1737 = vmatprep.subr.mxu1 %v9218_v36 }
 0x2e5   : > { %1738 = vmatpush2.msra.mxu1 %v1596_v0  ;;  %v1833_v0 = vpop.permute.xlu0 %1832 }
 0x2e6   : > { %1739 = vmatprep.subr.mxu1 %v9218_v36 }
 0x2e7   : > { %1740 = vmatpush2.msra.mxu1 %v1591_v62  ;;  %v1903_v62 = vld [vmem:[%s9167_s4 + $0x8] sm:$0xff] }
 0x2e8   : > { %1741 = vmatprep.subr.mxu1 %v9218_v36 }
 0x2e9   : > { %1742 = vmatpush2.msra.mxu1 %v1586_v1  ;;  %v5474_v1 = vld [vmem:[%s9165_s2 + $0x230] sm:$0xff]  ;;  %v1838_v40 = vpop.permute.xlu0 %1837 }
 0x2ea   : > { %1743 = vmatprep.subr.mxu1 %v9218_v36 }
 0x2eb   : > { %1744 = vmatpush2.msra.mxu1 %v7948_v46  ;;  %v5473_v46 = vld [vmem:[%s9165_s2 + $0x228] sm:$0xff] }
 0x2ec   : > { %1746 = vmatmul.mubr.f32.vlgmr.msra.gmra.mxu1 %v5452_v27  ;;  %6121 = vmatprep.subr.mxu1 %v1917_v29  ;;  %v1843_v27 = vpop.permute.xlu1 %1842 }
 0x2ed   : > { %5477 = vmatprep.mubr.msk.f32.mxu1 %vm1079_vm0, %v5455_v31  ;;  %6122 = vmatpush3.msra.mxu1 %v1917_v29  ;;  %v5502_v31 = vld [vmem:[%s9167_s4 + $0xf0] sm:$0xff] }
 0x2ee   : > { %6123 = vmatprep.subr.mxu1 %v1916_v53 }
 0x2ef   : > { %6124 = vmatpush3.msra.mxu1 %v1916_v53 }
 0x2f0   : > { %1751 = vmatmul.mubr.f32.gmra.mxu1 %v5454_v55  ;;  %6125 = vmatprep.subr.mxu1 %v1915_v59 }
 0x2f1   : > { %5478 = vmatprep.mubr.msk.f32.mxu1 %vm1079_vm0, %v5457_v11  ;;  %6126 = vmatpush3.msra.mxu1 %v1915_v59  ;;  %v5500_v11 = vld [vmem:[%s9167_s4 + $0xe0] sm:$0xff] }
 0x2f2   : > { %6127 = vmatprep.subr.mxu1 %v1914_v2 }
 0x2f3   : > { %6128 = vmatpush3.msra.mxu1 %v1914_v2 }
 0x2f4   : > { %1756 = vmatmul.mubr.f32.gmra.mxu1 %v5456_v52  ;;  %6129 = vmatprep.subr.mxu1 %v1913_v49 }
 0x2f5   : > { %5479 = vmatprep.mubr.msk.f32.mxu1 %vm1079_vm0, %v5459_v15  ;;  %6130 = vmatpush3.msra.mxu1 %v1913_v49  ;;  %v5499_v49 = vld [vmem:[%s9167_s4 + $0xd8] sm:$0xff] }
 0x2f6   : > { %6131 = vmatprep.subr.mxu1 %v1912_v16 }
 0x2f7   : > { %6132 = vmatpush3.msra.mxu1 %v1912_v16 }
 0x2f8   : > { %1761 = vmatmul.mubr.f32.gmra.mxu1 %v5458_v17  ;;  %6133 = vmatprep.subr.mxu1 %v1911_v18  ;;  %v5498_v17 = vld [vmem:[%s9167_s4 + $0xd0] sm:$0xff] }
 0x2f9   : > { %5480 = vmatprep.mubr.msk.f32.mxu1 %vm1079_vm0, %v5461_v19  ;;  %6134 = vmatpush3.msra.mxu1 %v1911_v18  ;;  %v1853_v18 = vpop.permute.xlu0 %1852 }
 0x2fa   : > { %6135 = vmatprep.subr.mxu1 %v1910_v21 }
 0x2fb   : > { %6136 = vmatpush3.msra.mxu1 %v1910_v21  ;;  %v5497_v21 = vld [vmem:[%s9167_s4 + $0xc8] sm:$0xff] }
 0x2fc   : > { %1766 = vmatmul.mubr.f32.gmra.mxu1 %v5460_v22  ;;  %6137 = vmatprep.subr.mxu1 %v1909_v23 }
 0x2fd   : > { %5481 = vmatprep.mubr.msk.f32.mxu1 %vm1079_vm0, %v5463_v24  ;;  %6138 = vmatpush3.msra.mxu1 %v1909_v23  ;;  %v5496_v24 = vld [vmem:[%s9167_s4 + $0xc0] sm:$0xff] }
 0x2fe   : > { %6139 = vmatprep.subr.mxu1 %v1908_v26 }
 0x2ff   : > { %6140 = vmatpush3.msra.mxu1 %v1908_v26 }
 0x300   : > { %1771 = vmatmul.mubr.f32.gmra.mxu1 %v5462_v28  ;;  %6141 = vmatprep.subr.mxu1 %v1907_v30 }
 0x301   : > { %5482 = vmatprep.mubr.msk.f32.mxu1 %vm1079_vm0, %v5465_v34  ;;  %6142 = vmatpush3.msra.mxu1 %v1907_v30  ;;  %v5495_v30 = vld [vmem:[%s9167_s4 + $0xb8] sm:$0xff] }
 0x302   : > { %6143 = vmatprep.subr.mxu1 %v1906_v35 }
 0x303   : > { %6144 = vmatpush3.msra.mxu1 %v1906_v35 }
 0x304   : > { %1776 = vmatmul.mubr.f32.gmra.mxu1 %v5464_v42  ;;  %6145 = vmatprep.subr.mxu1 %v1905_v57  ;;  %v5494_v42 = vld [vmem:[%s9167_s4 + $0xb0] sm:$0xff] }
 0x305   : > { %5483 = vmatprep.mubr.msk.f32.mxu1 %vm1079_vm0, %v5467_v39  ;;  %6146 = vmatpush3.msra.mxu1 %v1905_v57  ;;  %v1863_v39 = vpop.permute.xlu0 %1862 }
 0x306   : > { %6147 = vmatprep.subr.mxu1 %v1904_v7 }
 0x307   : > { %6148 = vmatpush3.msra.mxu1 %v1904_v7  ;;  %v5490_v7 = vld [vmem:[%s9167_s4 + $0x90] sm:$0xff] }
 0x308   : > { %1781 = vmatmul.mubr.f32.gmra.mxu1 %v5466_v41  ;;  %6149 = vmatprep.subr.mxu1 %v1903_v62 }
 0x309   : > { %5484 = vmatprep.mubr.msk.f32.mxu1 %vm1079_vm0, %v5469_v61  ;;  %6150 = vmatpush3.msra.mxu1 %v1903_v62  ;;  %v5493_v61 = vld [vmem:[%s9167_s4 + $0xa8] sm:$0xff]  ;;  %v1873_v62 = vpop.permute.xlu0 %1872 }
 0x30a   : > { %6151 = vmatprep.subr.mxu1 %v1902_v54 }
 0x30b   : > { %6152 = vmatpush3.msra.mxu1 %v1902_v54 }
 0x30c   : > { %1786 = vmatmul.mubr.f32.gmra.mxu1 %v5468_v38  ;;  %6171 = vmatprep.subr.mxu1 %v5503_v5 }
 0x30d   : > { %5485 = vmatprep.mubr.msk.f32.mxu1 %vm1079_vm0, %v5471_v45 }
 0x310   : > { %1791 = vmatmul.mubr.f32.gmra.mxu1 %v5470_v3  ;;  %v5492_v3 = vld [vmem:[%s9167_s4 + $0xa0] sm:$0xff] }
 0x311   : > { %5486 = vmatprep.mubr.msk.f32.mxu1 %vm1079_vm0, %v5473_v46 }
 0x314   : > { %1796 = vmatmul.mubr.f32.gmra.mxu1 %v5472_v51 }
 0x315   : > { %5487 = vmatprep.mubr.msk.f32.mxu1 %vm1079_vm0, %v5475_v50  ;;  %v5491_v50 = vld [vmem:[%s9167_s4 + $0x98] sm:$0xff] }
 0x318   : > { %1801 = vmatmul.mubr.f32.gmra.mxu1 %v5474_v1 }
 0x3ac   : > { %v1747_v60 = vpop.f32.mrf.mxu1 }
 0x3ad   : > { %v1806_v4 = vadd.f32 %v1747_v60, %v7810_v32 }
 0x3ae   : > { %v1749_v63 = vpop.f32.mrf.mxu1 }
 0x3af   : > { %v8124_v8 = vadd.f32 %v1833_v0, %v1806_v4  ;;  %v5488_v4 = vld [vmem:[%s9167_s4 + $0x80] sm:$0xff] }
 0x3b0   : > { %v1752_v9 = vpop.f32.mrf.mxu1 }
 0x3b1   : > { %v1807_v48 = vadd.f32 %v1752_v9, %v7812_v44  ;;  %6153 = vmatprep.mubr.f32.mxu1 %v8124_v8  ;;  %v5501_v44 = vld [vmem:[%s9167_s4 + $0xe8] sm:$0xff] }
 0x3b2   : > { %v1754_v37 = vpop.f32.mrf.mxu1 }
 0x3b3   : > { %v8128_v58 = vadd.f32 %v1838_v40, %v1807_v48 }
 0x3b4   : > { %v1757_v29 = vpop.f32.mrf.mxu1 }
 0x3b5   : > { %v1808_v32 = vadd.f32 %v1757_v29, %v7814_v43  ;;  %6154 = vmatmul.mubr.f32.vlgmr.msra.gmra.mxu1 %v8128_v58  ;;  %v1848_v43 = vpop.permute.xlu1 %1847 }
 0x3b6   : > { %v1759_v53 = vpop.f32.mrf.mxu1  ;;  %6172 = vmatpush3.msra.mxu1 %v5503_v5  ;;  %v5489_v5 = vld [vmem:[%s9167_s4 + $0x88] sm:$0xff] }
 0x3b7   : > { %v8138_v55 = vadd.f32 %v1843_v27, %v1808_v32  ;;  %6173 = vmatprep.subr.mxu1 %v5502_v31  ;;  %v1883_v27 = vpop.permute.xlu0 %1882 }
 0x3b8   : > { %v1762_v59 = vpop.f32.mrf.mxu1  ;;  %6174 = vmatpush3.msra.mxu1 %v5502_v31 }
 0x3b9   : > { %v1809_v2 = vadd.f32 %v1762_v59, %v7816_v47  ;;  %6156 = vmatprep.mubr.f32.mxu1 %v8138_v55  ;;  %6175 = vmatprep.subr.mxu1 %v5501_v44  ;;  %v1858_v26 = vpop.permute.xlu1 %1857 }
 0x3ba   : > { %v1764_v52 = vpop.f32.mrf.mxu1  ;;  %6176 = vmatpush3.msra.mxu1 %v5501_v44 }
 0x3bb   : > { %v8148_v15 = vadd.f32 %v1848_v43, %v1809_v2  ;;  %6177 = vmatprep.subr.mxu1 %v5500_v11 }
 0x3bc   : > { %v1767_v16 = vpop.f32.mrf.mxu1  ;;  %6178 = vmatpush3.msra.mxu1 %v5500_v11 }
 0x3bd   : > { %v1810_v47 = vadd.f32 %v1767_v16, %v7818_v10  ;;  %6157 = vmatmul.mubr.f32.gmra.mxu1 %v8148_v15  ;;  %6179 = vmatprep.subr.mxu1 %v5499_v49  ;;  %v1868_v46 = vpop.permute.xlu1 %1867 }
 0x3be   : > { %v1769_v19 = vpop.f32.mrf.mxu1  ;;  %6180 = vmatpush3.msra.mxu1 %v5499_v49 }
 0x3bf   : > { %v8158_v22 = vadd.f32 %v1853_v18, %v1810_v47  ;;  %6181 = vmatprep.subr.mxu1 %v5498_v17 }
 0x3c0   : > { %v1772_v23 = vpop.f32.mrf.mxu1  ;;  %6182 = vmatpush3.msra.mxu1 %v5498_v17 }
 0x3c1   : > { %v1811_v10 = vadd.f32 %v1772_v23, %v7820_v13  ;;  %6159 = vmatprep.mubr.f32.mxu1 %v8158_v22  ;;  %6183 = vmatprep.subr.mxu1 %v5497_v21  ;;  %v1878_v63 = vpop.permute.xlu1 %1877 }
 0x3c2   : > { %v1774_v28 = vpop.f32.mrf.mxu1  ;;  %6184 = vmatpush3.msra.mxu1 %v5497_v21 }
 0x3c3   : > { %v8168_v34 = vadd.f32 %v1858_v26, %v1811_v10  ;;  %6185 = vmatprep.subr.mxu1 %v5496_v24 }
 0x3c4   : > { %v1777_v35 = vpop.f32.mrf.mxu1  ;;  %6186 = vmatpush3.msra.mxu1 %v5496_v24 }
 0x3c5   : > { %v1812_v13 = vadd.f32 %v1777_v35, %v7822_v12  ;;  %6160 = vmatmul.mubr.f32.gmra.mxu1 %v8168_v34  ;;  %6187 = vmatprep.subr.mxu1 %v5495_v30  ;;  %v1888_v53 = vpop.permute.xlu1 %1887 }
 0x3c6   : > { %v1779_v41 = vpop.f32.mrf.mxu1  ;;  %6188 = vmatpush3.msra.mxu1 %v5495_v30 }
 0x3c7   : > { %v8178_v38 = vadd.f32 %v1863_v39, %v1812_v13  ;;  %6189 = vmatprep.subr.mxu1 %v5494_v42 }
 0x3c8   : > { %v1782_v45 = vpop.f32.mrf.mxu1  ;;  %6190 = vmatpush3.msra.mxu1 %v5494_v42 }
 0x3c9   : > { %v1813_v12 = vadd.f32 %v1782_v45, %v7824_v56  ;;  %6162 = vmatprep.mubr.f32.mxu1 %v8178_v38  ;;  %6191 = vmatprep.subr.mxu1 %v5493_v61  ;;  %v2045_v45 = vld [vmem:[%s9168_s5 + $0x10] sm:$0xff] }
 0x3ca   : > { %v1784_v51 = vpop.f32.mrf.mxu1  ;;  %6192 = vmatpush3.msra.mxu1 %v5493_v61  ;;  %v2044_v61 = vld [vmem:[%s9168_s5 + $0x8] sm:$0xff] }
 0x3cb   : > { %v8188_v1 = vadd.f32 %v1868_v46, %v1813_v12  ;;  %6193 = vmatprep.subr.mxu1 %v5492_v3  ;;  %v2046_v46 = vld [vmem:[%s9168_s5 + $0x18] sm:$0xff]  ;;  %v5505_v51 = vld [vmem:[%s9168_s5 + $0x28] sm:$0xff] }
 0x3cc   : > { %v1787_v57 = vpop.f32.mrf.mxu1  ;;  %6194 = vmatpush3.msra.mxu1 %v5492_v3 }
 0x3cd   : > { %v1814_v56 = vadd.f32 %v1787_v57, %v7826_v6  ;;  %6163 = vmatmul.mubr.f32.gmra.mxu1 %v8188_v1  ;;  %6195 = vmatprep.subr.mxu1 %v5491_v50  ;;  %v5506_v57 = vld [vmem:[%s9168_s5 + $0x30] sm:$0xff] }
 0x3ce   : > { %v1789_v54 = vpop.f32.mrf.mxu1  ;;  %6196 = vmatpush3.msra.mxu1 %v5491_v50  ;;  %v5531_v50 = vld [vmem:[%s9167_s4 + $0x178] sm:$0xff] }
 0x3cf   : > { %v8198_v0 = vadd.f32 %v1873_v62, %v1814_v56  ;;  %6197 = vmatprep.subr.mxu1 %v5490_v7  ;;  %v5507_v56 = vld [vmem:[%s9168_s5 + $0x38] sm:$0xff]  ;;  %v5529_v62 = vld [vmem:[%s9167_s4 + $0x168] sm:$0xff]  ;;  %v5528_v54 = vld [vmem:[%s9167_s4 + $0x160] sm:$0xff] }
 0x3d0   : > { %v1792_v60 = vpop.f32.mrf.mxu1  ;;  %6198 = vmatpush3.msra.mxu1 %v5490_v7  ;;  %v5530_v7 = vld [vmem:[%s9167_s4 + $0x170] sm:$0xff] }
 0x3d1   : > { %v1815_v6 = vadd.f32 %v1792_v60, %v7828_v14  ;;  %6165 = vmatprep.mubr.f32.mxu1 %v8198_v0  ;;  %6199 = vmatprep.subr.mxu1 %v5489_v5  ;;  %v5526_v60 = vld [vmem:[%s9167_s4 + $0x150] sm:$0xff] }
 0x3d2   : > { %v1794_v9 = vpop.f32.mrf.mxu1  ;;  %6200 = vmatpush3.msra.mxu1 %v5489_v5  ;;  %v5527_v5 = vld [vmem:[%s9167_s4 + $0x158] sm:$0xff] }
 0x3d3   : > { %v8205_v48 = vadd.f32 %v1878_v63, %v1815_v6  ;;  %6201 = vmatprep.subr.mxu1 %v5488_v4  ;;  %v5523_v6 = vld [vmem:[%s9167_s4 + $0x138] sm:$0xff]  ;;  %v5522_v63 = vld [vmem:[%s9167_s4 + $0x130] sm:$0xff]  ;;  %v5521_v9 = vld [vmem:[%s9167_s4 + $0x128] sm:$0xff] }
 0x3d4   : > { %v1797_v40 = vpop.f32.mrf.mxu1  ;;  %6202 = vmatpush3.msra.mxu1 %v5488_v4  ;;  %v5525_v4 = vld [vmem:[%s9167_s4 + $0x148] sm:$0xff] }
 0x3d5   : > { %v1816_v37 = vadd.f32 %v1797_v40, %v7834_v20  ;;  %6166 = vmatmul.mubr.f32.gmra.mxu1 %v8205_v48  ;;  %v5504_v20 = vld [vmem:[%s9168_s5 + $0x20] sm:$0xff] }
 0x3d6   : > { %v1799_v29 = vpop.f32.mrf.mxu1  ;;  %v5520_v40 = vld [vmem:[%s9167_s4 + $0x120] sm:$0xff] }
 0x3d7   : > { %v8209_v31 = vadd.f32 %v1883_v27, %v1816_v37  ;;  %v5519_v37 = vld [vmem:[%s9167_s4 + $0x118] sm:$0xff]  ;;  %v5518_v27 = vld [vmem:[%s9167_s4 + $0x110] sm:$0xff]  ;;  %v5517_v29 = vld [vmem:[%s9167_s4 + $0x108] sm:$0xff] }
 0x3d8   : > { %v1802_v14 = vpop.f32.mrf.mxu1 }
 0x3d9   : > { %v1817_v32 = vadd.f32 %v1802_v14, %v7836_v25  ;;  %6168 = vmatprep.mubr.f32.mxu1 %v8209_v31  ;;  %v2043_v25 = vld [vmem:[%s9168_s5] sm:$0xff] }
 0x3da   : > { %v1804_v44 = vpop.f32.mrf.mxu1  ;;  %6275 = vmatprep.mubr.msk.f32.mxu0 %vm2194_vm1, %v2043_v25  ;;  %v5516_v14 = vld [vmem:[%s9167_s4 + $0x100] sm:$0xff] }
 0x3db   : > { %v8213_v59 = vadd.f32 %v1888_v53, %v1817_v32 }
 0x3dd   : > { %6169 = vmatmul.mubr.f32.gmra.mxu1 %v8213_v59 }
 0x3de   : > { %6203 = vmatprep.mubr.f32.mxu1 %v8124_v8 }
 0x3e1   : > { %6204 = vmatmul.mubr.f32.vlgmr.msra.gmra.mxu1 %v8128_v58 }
 0x3e2   : > { %6206 = vmatprep.mubr.f32.mxu1 %v8138_v55 }
 0x3e5   : > { %6207 = vmatmul.mubr.f32.gmra.mxu1 %v8148_v15 }
 0x3e6   : > { %6209 = vmatprep.mubr.f32.mxu1 %v8158_v22 }
 0x3e9   : > { %6210 = vmatmul.mubr.f32.gmra.mxu1 %v8168_v34 }
 0x3ea   : > { %6212 = vmatprep.mubr.f32.mxu1 %v8178_v38 }
 0x3ed   : > { %6213 = vmatmul.mubr.f32.gmra.mxu1 %v8188_v1 }
 0x3ee   : > { %6215 = vmatprep.mubr.f32.mxu1 %v8198_v0 }
 0x3f1   : > { %6216 = vmatmul.mubr.f32.gmra.mxu1 %v8205_v48 }
 0x3f2   : > { %6218 = vmatprep.mubr.f32.mxu1 %v8209_v31 }
 0x3f5   : > { %6219 = vmatmul.mubr.f32.gmra.mxu1 %v8213_v59 }
 0x3f6   : > { %6245 = vmatprep.mubr.msk.f32.mxu1 %vm2194_vm1, %v5504_v20 }
 0x475   : > { %v6155_v11 = vpop.f32.mrf.mxu1 }
 0x477   : > { %v1984_v2 = vpop.f32.mrf.mxu1 }
 0x47d   : > { %v6158_v43 = vpop.f32.mrf.mxu1 }
 0x47f   : > { %v1994_v52 = vpop.f32.mrf.mxu1 }
 0x485   : > { %v6161_v49 = vpop.f32.mrf.mxu1 }
 0x487   : > { %v2004_v16 = vpop.f32.mrf.mxu1 }
 0x48d   : > { %v6164_v17 = vpop.f32.mrf.mxu1 }
 0x48f   : > { %v2014_v47 = vpop.f32.mrf.mxu1 }
 0x495   : > { %v6167_v18 = vpop.f32.mrf.mxu1 }
 0x497   : > { %v2024_v19 = vpop.f32.mrf.mxu1 }
 0x49d   : > { %v6170_v21 = vpop.f32.mrf.mxu1 }
 0x49e   : > { %6251 = vmatprep.subr.mxu0 %v6170_v21 }
 0x49f   : > { %v2034_v23 = vpop.f32.mrf.mxu1  ;;  %6252 = vmatpush3.msra.mxu0 %v6170_v21  ;;  %v5535_v21 = vld [vmem:[%s9168_s5 + $0x58] sm:$0xff] }
 0x4a0   : > { %6253 = vmatprep.subr.mxu0 %v2034_v23 }
 0x4a1   : > { %v6205_v24 = vpop.f32.mrf.mxu1  ;;  %6254 = vmatpush3.msra.mxu0 %v2034_v23  ;;  %v2670_v23 = vld [vmem:[%s9170_s7 + $0x28] sm:$0xff] }
 0x4a2   : > { %6255 = vmatprep.subr.mxu0 %v6167_v18 }
 0x4a3   : > { %v2130_v10 = vpop.f32.mrf.mxu1  ;;  %6256 = vmatpush3.msra.mxu0 %v6167_v18  ;;  %v5534_v18 = vld [vmem:[%s9168_s5 + $0x50] sm:$0xff] }
 0x4a4   : > { %6257 = vmatprep.subr.mxu0 %v2024_v19 }
 0x4a5   : > { %v6208_v26 = vpop.f32.mrf.mxu1  ;;  %6258 = vmatpush3.msra.mxu0 %v2024_v19  ;;  %v2671_v19 = vld [vmem:[%s9170_s7 + $0x30] sm:$0xff] }
 0x4a6   : > { %6259 = vmatprep.subr.mxu0 %v6164_v17 }
 0x4a7   : > { %v2140_v28 = vpop.f32.mrf.mxu1  ;;  %6260 = vmatpush3.msra.mxu0 %v6164_v17  ;;  %v5533_v17 = vld [vmem:[%s9168_s5 + $0x48] sm:$0xff] }
 0x4a8   : > { %6261 = vmatprep.subr.mxu0 %v2014_v47 }
 0x4a9   : > { %v6211_v30 = vpop.f32.mrf.mxu1  ;;  %6262 = vmatpush3.msra.mxu0 %v2014_v47  ;;  %v2672_v47 = vld [vmem:[%s9170_s7 + $0x38] sm:$0xff] }
 0x4aa   : > { %6263 = vmatprep.subr.mxu0 %v6161_v49 }
 0x4ab   : > { %v2150_v35 = vpop.f32.mrf.mxu1  ;;  %6264 = vmatpush3.msra.mxu0 %v6161_v49 }
 0x4ac   : > { %6265 = vmatprep.subr.mxu0 %v2004_v16 }
 0x4ad   : > { %v6214_v42 = vpop.f32.mrf.mxu1  ;;  %6266 = vmatpush3.msra.mxu0 %v2004_v16 }
 0x4ae   : > { %6267 = vmatprep.subr.mxu0 %v6158_v43 }
 0x4af   : > { %v2160_v13 = vpop.f32.mrf.mxu1  ;;  %6268 = vmatpush3.msra.mxu0 %v6158_v43 }
 0x4b0   : > { %6269 = vmatprep.subr.mxu0 %v1994_v52 }
 0x4b1   : > { %v6217_v39 = vpop.f32.mrf.mxu1  ;;  %6270 = vmatpush3.msra.mxu0 %v1994_v52 }
 0x4b2   : > { %6271 = vmatprep.subr.mxu0 %v6155_v11 }
 0x4b3   : > { %v2170_v41 = vpop.f32.mrf.mxu1  ;;  %6272 = vmatpush3.msra.mxu0 %v6155_v11 }
 0x4b4   : > { %6273 = vmatprep.subr.mxu0 %v1984_v2 }
 0x4b5   : > { %v6220_v3 = vpop.f32.mrf.mxu1  ;;  %6274 = vmatpush3.msra.mxu0 %v1984_v2 }
 0x4b6   : > { %6221 = vmatprep.subr.mxu1 %v6220_v3  ;;  %6276 = vmatmul.mubr.msk.f32.vlgmr.msra.gmra.mxu0 %vm2194_vm1, %v2044_v61 }
 0x4b7   : > { %v2180_v12 = vpop.f32.mrf.mxu1  ;;  %6222 = vmatpush3.msra.mxu1 %v6220_v3  ;;  %6278 = vmatprep.mubr.msk.f32.mxu0 %vm2194_vm1, %v2045_v45 }
 0x4b8   : > { %6223 = vmatprep.subr.mxu1 %v2180_v12 }
 0x4b9   : > { %6224 = vmatpush3.msra.mxu1 %v2180_v12 }
 0x4ba   : > { %6225 = vmatprep.subr.mxu1 %v6217_v39  ;;  %6279 = vmatmul.mubr.msk.f32.gmra.mxu0 %vm2194_vm1, %v2046_v46 }
 0x4bb   : > { %6226 = vmatpush3.msra.mxu1 %v6217_v39  ;;  %v5569_v39 = vld [vmem:[%s9170_s7 + $0xb8] sm:$0xff] }
 0x4bc   : > { %6227 = vmatprep.subr.mxu1 %v2170_v41 }
 0x4bd   : > { %6228 = vmatpush3.msra.mxu1 %v2170_v41 }
 0x4be   : > { %6229 = vmatprep.subr.mxu1 %v6214_v42 }
 0x4bf   : > { %6230 = vmatpush3.msra.mxu1 %v6214_v42  ;;  %v5544_v42 = vld [vmem:[%s9170_s7 + $0x40] sm:$0xff] }
 0x4c0   : > { %6231 = vmatprep.subr.mxu1 %v2160_v13 }
 0x4c1   : > { %6232 = vmatpush3.msra.mxu1 %v2160_v13  ;;  %v2665_v13 = vld [vmem:[%s9170_s7] sm:$0xff] }
 0x4c2   : > { %6233 = vmatprep.subr.mxu1 %v6211_v30 }
 0x4c3   : > { %6234 = vmatpush3.msra.mxu1 %v6211_v30  ;;  %v5545_v30 = vld [vmem:[%s9170_s7 + $0x48] sm:$0xff] }
 0x4c4   : > { %6235 = vmatprep.subr.mxu1 %v2150_v35 }
 0x4c5   : > { %6236 = vmatpush3.msra.mxu1 %v2150_v35  ;;  %v2666_v35 = vld [vmem:[%s9170_s7 + $0x8] sm:$0xff] }
 0x4c6   : > { %6237 = vmatprep.subr.mxu1 %v6208_v26 }
 0x4c7   : > { %6238 = vmatpush3.msra.mxu1 %v6208_v26  ;;  %v5546_v26 = vld [vmem:[%s9170_s7 + $0x50] sm:$0xff] }
 0x4c8   : > { %6239 = vmatprep.subr.mxu1 %v2140_v28 }
 0x4c9   : > { %6240 = vmatpush3.msra.mxu1 %v2140_v28  ;;  %v2667_v28 = vld [vmem:[%s9170_s7 + $0x10] sm:$0xff] }
 0x4ca   : > { %6241 = vmatprep.subr.mxu1 %v6205_v24 }
 0x4cb   : > { %6242 = vmatpush3.msra.mxu1 %v6205_v24  ;;  %v2669_v24 = vld [vmem:[%s9170_s7 + $0x20] sm:$0xff] }
 0x4cc   : > { %6243 = vmatprep.subr.mxu1 %v2130_v10 }
 0x4cd   : > { %6244 = vmatpush3.msra.mxu1 %v2130_v10  ;;  %v2668_v10 = vld [vmem:[%s9170_s7 + $0x18] sm:$0xff] }
 0x4ce   : > { %6246 = vmatmul.mubr.msk.f32.vlgmr.msra.gmra.mxu1 %vm2194_vm1, %v5505_v51  ;;  %6281 = vmatprep.subr.mxu1 %v5531_v50 }
 0x4cf   : > { %6282 = vmatpush3.msra.mxu1 %v5531_v50  ;;  %6248 = vmatprep.mubr.msk.f32.mxu1 %vm2194_vm1, %v5506_v57  ;;  %v2644_v50 = vpop.permute.xlu0 %2643 }
 0x4d0   : > { %6283 = vmatprep.subr.mxu1 %v5530_v7 }
 0x4d1   : > { %6284 = vmatpush3.msra.mxu1 %v5530_v7 }
 0x4d2   : > { %6249 = vmatmul.mubr.msk.f32.gmra.mxu1 %vm2194_vm1, %v5507_v56  ;;  %6285 = vmatprep.subr.mxu1 %v5529_v62 }
 0x4d3   : > { %6286 = vmatpush3.msra.mxu1 %v5529_v62  ;;  %6313 = vmatprep.mubr.f32.mxu1 %v8124_v8  ;;  %v5524_v8 = vld [vmem:[%s9167_s4 + $0x140] sm:$0xff]  ;;  %v2649_v62 = vpop.permute.xlu1 %2648 }
 0x4d4   : > { %6287 = vmatprep.subr.mxu1 %v5528_v54 }
 0x4d5   : > { %6288 = vmatpush3.msra.mxu1 %v5528_v54 }
 0x4d6   : > { %6289 = vmatprep.subr.mxu1 %v5527_v5 }
 0x4d7   : > { %6290 = vmatpush3.msra.mxu1 %v5527_v5 }
 0x4d8   : > { %6291 = vmatprep.subr.mxu1 %v5526_v60 }
 0x4d9   : > { %6292 = vmatpush3.msra.mxu1 %v5526_v60 }
 0x4da   : > { %6293 = vmatprep.subr.mxu1 %v5525_v4 }
 0x4db   : > { %6294 = vmatpush3.msra.mxu1 %v5525_v4 }
 0x4dc   : > { %6295 = vmatprep.subr.mxu1 %v5524_v8 }
 0x4dd   : > { %6296 = vmatpush3.msra.mxu1 %v5524_v8 }
 0x4de   : > { %6297 = vmatprep.subr.mxu1 %v5523_v6 }
 0x4df   : > { %6298 = vmatpush3.msra.mxu1 %v5523_v6 }
 0x4e0   : > { %6299 = vmatprep.subr.mxu1 %v5522_v63 }
 0x4e1   : > { %6300 = vmatpush3.msra.mxu1 %v5522_v63 }
 0x4e2   : > { %6301 = vmatprep.subr.mxu1 %v5521_v9 }
 0x4e3   : > { %6302 = vmatpush3.msra.mxu1 %v5521_v9 }
 0x4e4   : > { %6303 = vmatprep.subr.mxu1 %v5520_v40 }
 0x4e5   : > { %6304 = vmatpush3.msra.mxu1 %v5520_v40  ;;  %v5568_v40 = vld [vmem:[%s9170_s7 + $0xb0] sm:$0xff] }
 0x4e6   : > { %6305 = vmatprep.subr.mxu1 %v5519_v37 }
 0x4e7   : > { %6306 = vmatpush3.msra.mxu1 %v5519_v37  ;;  %v2654_v37 = vpop.permute.xlu0 %2653 }
 0x4e8   : > { %6307 = vmatprep.subr.mxu1 %v5518_v27 }
 0x4e9   : > { %6308 = vmatpush3.msra.mxu1 %v5518_v27 }
 0x4ea   : > { %6309 = vmatprep.subr.mxu1 %v5517_v29 }
 0x4eb   : > { %6310 = vmatpush3.msra.mxu1 %v5517_v29  ;;  %v5567_v29 = vld [vmem:[%s9170_s7 + $0xa8] sm:$0xff] }
 0x4ec   : > { %6311 = vmatprep.subr.mxu1 %v5516_v14 }
 0x4ed   : > { %6312 = vmatpush3.msra.mxu1 %v5516_v14  ;;  %v2659_v14 = vpop.permute.xlu1 %2658 }
 0x4ee   : > { %6314 = vmatmul.mubr.f32.vlgmr.msra.gmra.mxu1 %v8128_v58  ;;  %v5532_v58 = vld [vmem:[%s9168_s5 + $0x40] sm:$0xff] }
 0x4ef   : > { %6316 = vmatprep.mubr.f32.mxu1 %v8138_v55  ;;  %6355 = vmatprep.mubr.msk.f32.mxu0 %vm2194_vm1, %v5532_v58  ;;  %v5551_v55 = vld [vmem:[%s9170_s7 + $0x78] sm:$0xff] }
 0x4f0   : > { %6383 = vmatprep.subr.mxu1 %v5551_v55 }
 0x4f1   : > { %6384 = vmatpush3.msra.mxu1 %v5551_v55  ;;  %v5566_v55 = vld [vmem:[%s9170_s7 + $0xa0] sm:$0xff] }
 0x4f2   : > { %6317 = vmatmul.mubr.f32.gmra.mxu1 %v8148_v15  ;;  %v5550_v15 = vld [vmem:[%s9170_s7 + $0x70] sm:$0xff] }
 0x4f3   : > { %6319 = vmatprep.mubr.f32.mxu1 %v8158_v22  ;;  %v5549_v22 = vld [vmem:[%s9170_s7 + $0x68] sm:$0xff]  ;;  %6385 = vmatprep.subr.mxu1 %v5550_v15 }
 0x4f4   : > { %6386 = vmatpush3.msra.mxu1 %v5550_v15  ;;  %v5565_v15 = vld [vmem:[%s9170_s7 + $0x98] sm:$0xff] }
 0x4f5   : > { %6387 = vmatprep.subr.mxu1 %v5549_v22 }
 0x4f6   : > { %6320 = vmatmul.mubr.f32.gmra.mxu1 %v8168_v34  ;;  %v5548_v34 = vld [vmem:[%s9170_s7 + $0x60] sm:$0xff] }
 0x4f7   : > { %6322 = vmatprep.mubr.f32.mxu1 %v8178_v38  ;;  %6388 = vmatpush3.msra.mxu1 %v5549_v22  ;;  %v5547_v38 = vld [vmem:[%s9170_s7 + $0x58] sm:$0xff]  ;;  %v5564_v22 = vld [vmem:[%s9170_s7 + $0x90] sm:$0xff] }
 0x4f8   : > { %6389 = vmatprep.subr.mxu1 %v5548_v34 }
 0x4f9   : > { %6390 = vmatpush3.msra.mxu1 %v5548_v34  ;;  %v5563_v34 = vld [vmem:[%s9170_s7 + $0x88] sm:$0xff] }
 0x4fa   : > { %6323 = vmatmul.mubr.f32.gmra.mxu1 %v8188_v1  ;;  %6391 = vmatprep.subr.mxu1 %v5547_v38 }
 0x4fb   : > { %6325 = vmatprep.mubr.f32.mxu1 %v8198_v0  ;;  %6392 = vmatpush3.msra.mxu1 %v5547_v38  ;;  %v5562_v38 = vld [vmem:[%s9170_s7 + $0x80] sm:$0xff] }
 0x4fc   : > { %6393 = vmatprep.subr.mxu1 %v5546_v26 }
 0x4fd   : > { %6394 = vmatpush3.msra.mxu1 %v5546_v26  ;;  %v3226_v26 = vld [vmem:[%s9173_s10] sm:$0xff] }
 0x4fe   : > { %6326 = vmatmul.mubr.f32.gmra.mxu1 %v8205_v48  ;;  %6395 = vmatprep.subr.mxu1 %v5545_v30 }
 0x4ff   : > { %6328 = vmatprep.mubr.f32.mxu1 %v8209_v31  ;;  %6396 = vmatpush3.msra.mxu1 %v5545_v30 }
 0x500   : > { %6397 = vmatprep.subr.mxu1 %v5544_v42 }
 0x501   : > { %6398 = vmatpush3.msra.mxu1 %v5544_v42 }
 0x502   : > { %6329 = vmatmul.mubr.f32.gmra.mxu1 %v8213_v59  ;;  %6427 = vmatprep.subr.mxu1 %v5569_v39 }
 0x576   : > { %v6277_v41 = vpop.f32.mrf.mxu0 }
 0x578   : > { %v2370_v61 = vpop.f32.mrf.mxu0 }
 0x57a   : > { %v6280_v45 = vpop.f32.mrf.mxu0 }
 0x57c   : > { %v2380_v3 = vpop.f32.mrf.mxu0 }
 0x58e   : > { %v8339_v1 = vpop.f32.mrf.mxu1 }
 0x58f   : > { %v2376_v12 = vadd.f32 %v6277_v41, %v8339_v1  ;;  %v5556_v1 = vld [vmem:[%s9171_s8 + $0x10] sm:$0xff] }
 0x590   : > { %v8341_v0 = vpop.f32.mrf.mxu1 }
 0x591   : > { %v2371_v51 = vadd.f32 %v2370_v61, %v8341_v0 }
 0x592   : > { %v8343_v48 = vpop.f32.mrf.mxu1 }
 0x593   : > { %v2386_v5 = vadd.f32 %v6280_v45, %v8343_v48 }
 0x594   : > { %v8345_v31 = vpop.f32.mrf.mxu1 }
 0x595   : > { %v2381_v60 = vadd.f32 %v2380_v3, %v8345_v31 }
 0x5ae   : > { %v6315_v32 = vpop.f32.mrf.mxu1 }
 0x5b0   : > { %v2472_v53 = vpop.f32.mrf.mxu1 }
 0x5b2   : > { %v6318_v44 = vpop.f32.mrf.mxu1 }
 0x5b4   : > { %v2482_v59 = vpop.f32.mrf.mxu1 }
 0x5b6   : > { %v6321_v20 = vpop.f32.mrf.mxu1 }
 0x5b8   : > { %v2492_v25 = vpop.f32.mrf.mxu1 }
 0x5ba   : > { %v6324_v11 = vpop.f32.mrf.mxu1 }
 0x5bc   : > { %v2502_v2 = vpop.f32.mrf.mxu1 }
 0x5be   : > { %v6327_v43 = vpop.f32.mrf.mxu1 }
 0x5c0   : > { %v2512_v52 = vpop.f32.mrf.mxu1 }
 0x5c2   : > { %v6330_v49 = vpop.f32.mrf.mxu1 }
 0x5c3   : > { %6331 = vmatprep.subr.mxu0 %v6330_v49 }
 0x5c4   : > { %v2522_v16 = vpop.f32.mrf.mxu1  ;;  %6332 = vmatpush3.msra.mxu0 %v6330_v49  ;;  %v5574_v49 = vld [vmem:[%s9171_s8 + $0x20] sm:$0xff] }
 0x5c5   : > { %6333 = vmatprep.subr.mxu0 %v2522_v16 }
 0x5c6   : > { %6334 = vmatpush3.msra.mxu0 %v2522_v16 }
 0x5c7   : > { %6335 = vmatprep.subr.mxu0 %v6327_v43 }
 0x5c8   : > { %6336 = vmatpush3.msra.mxu0 %v6327_v43 }
 0x5c9   : > { %6337 = vmatprep.subr.mxu0 %v2512_v52 }
 0x5ca   : > { %6338 = vmatpush3.msra.mxu0 %v2512_v52  ;;  %v2771_v52 = vld [vmem:[%s9171_s8 + $0x8] sm:$0xff] }
 0x5cb   : > { %6339 = vmatprep.subr.mxu0 %v6324_v11 }
 0x5cc   : > { %6340 = vmatpush3.msra.mxu0 %v6324_v11 }
 0x5cd   : > { %6341 = vmatprep.subr.mxu0 %v2502_v2 }
 0x5ce   : > { %6342 = vmatpush3.msra.mxu0 %v2502_v2 }
 0x5cf   : > { %6343 = vmatprep.subr.mxu0 %v6321_v20 }
 0x5d0   : > { %6344 = vmatpush3.msra.mxu0 %v6321_v20  ;;  %v5557_v20 = vld [vmem:[%s9171_s8 + $0x18] sm:$0xff] }
 0x5d1   : > { %6345 = vmatprep.subr.mxu0 %v2492_v25 }
 0x5d2   : > { %6346 = vmatpush3.msra.mxu0 %v2492_v25  ;;  %v2770_v25 = vld [vmem:[%s9171_s8] sm:$0xff] }
 0x5d3   : > { %6347 = vmatprep.subr.mxu0 %v6318_v44 }
 0x5d4   : > { %6348 = vmatpush3.msra.mxu0 %v6318_v44 }
 0x5d5   : > { %6349 = vmatprep.subr.mxu0 %v2482_v59 }
 0x5d6   : > { %6350 = vmatpush3.msra.mxu0 %v2482_v59 }
 0x5d7   : > { %6351 = vmatprep.subr.mxu0 %v6315_v32 }
 0x5d8   : > { %6352 = vmatpush3.msra.mxu0 %v6315_v32 }
 0x5d9   : > { %6353 = vmatprep.subr.mxu0 %v2472_v53 }
 0x5da   : > { %6354 = vmatpush3.msra.mxu0 %v2472_v53 }
 0x5db   : > { %6356 = vmatmul.mubr.msk.f32.vlgmr.msra.gmra.mxu0 %vm2194_vm1, %v5533_v17  ;;  %6361 = vmatprep.subr.mxu0 %v2672_v47 }
 0x5dc   : > { %6358 = vmatprep.mubr.msk.f32.mxu0 %vm2194_vm1, %v5534_v18  ;;  %6362 = vmatpush3.msra.mxu0 %v2672_v47  ;;  %v5575_v47 = vld [vmem:[%s9171_s8 + $0x28] sm:$0xff]  ;;  %v3229_v18 = vld [vmem:[%s9173_s10 + $0x18] sm:$0xff] }
 0x5dd   : > { %6363 = vmatprep.subr.mxu0 %v2671_v19 }
 0x5de   : > { %6364 = vmatpush3.msra.mxu0 %v2671_v19  ;;  %v5583_v19 = vld [vmem:[%s9173_s10 + $0x38] sm:$0xff] }
 0x5df   : > { %6359 = vmatmul.mubr.msk.f32.gmra.mxu0 %vm2194_vm1, %v5535_v21  ;;  %6365 = vmatprep.subr.mxu0 %v2670_v23  ;;  %v3228_v21 = vld [vmem:[%s9173_s10 + $0x10] sm:$0xff] }
 0x5e0   : > { %6366 = vmatpush3.msra.mxu0 %v2670_v23  ;;  %v5582_v23 = vld [vmem:[%s9173_s10 + $0x30] sm:$0xff] }
 0x5e1   : > { %6367 = vmatprep.subr.mxu0 %v2669_v24 }
 0x5e2   : > { %6368 = vmatpush3.msra.mxu0 %v2669_v24  ;;  %v3227_v24 = vld [vmem:[%s9173_s10 + $0x8] sm:$0xff] }
 0x5e3   : > { %6369 = vmatprep.subr.mxu0 %v2668_v10 }
 0x5e4   : > { %6370 = vmatpush3.msra.mxu0 %v2668_v10  ;;  %v5581_v10 = vld [vmem:[%s9173_s10 + $0x28] sm:$0xff] }
 0x5e5   : > { %6371 = vmatprep.subr.mxu0 %v2667_v28 }
 0x5e6   : > { %6372 = vmatpush3.msra.mxu0 %v2667_v28  ;;  %v5580_v28 = vld [vmem:[%s9173_s10 + $0x20] sm:$0xff] }
 0x5e7   : > { %6373 = vmatprep.subr.mxu0 %v2666_v35 }
 0x5e8   : > { %6374 = vmatpush3.msra.mxu0 %v2666_v35 }
 0x5e9   : > { %6375 = vmatprep.subr.mxu0 %v2665_v13 }
 0x5ea   : > { %6376 = vmatpush3.msra.mxu0 %v2665_v13 }
 0x69b   : > { %v6357_v46 = vpop.f32.mrf.mxu0 }
 0x69c   : > { %v2634_v57 = vadd.f32 %v6357_v46, %v2376_v12  ;;  %v3217_v46 = vpop.permute.xlu0 %3216 }
 0x69d   : > { %v2614_v7 = vpop.f32.mrf.mxu0 }
 0x69e   : > { %v2633_v56 = vadd.f32 %v2614_v7, %v2371_v51  ;;  %v2662_v8 = vadd.f32 %v2649_v62, %v2634_v57  ;;  %v3222_v51 = vpop.permute.xlu1 %3221  ;;  %v5586_v7 = vld [vmem:[%s9174_s11 + $0xc0] sm:$0xff] }
 0x69f   : > { %v6360_v54 = vpop.f32.mrf.mxu0 }
 0x6a0   : > { %v2661_v4 = vadd.f32 %v2644_v50, %v2633_v56  ;;  %v2636_v63 = vadd.f32 %v6360_v54, %v2386_v5  ;;  %v3311_v56 = vld [vmem:[%s9174_s11] sm:$0xff] }
 0x6a1   : > { %v2624_v6 = vpop.f32.mrf.mxu0 }
 0x6a2   : > { %v2635_v9 = vadd.f32 %v2624_v6, %v2381_v60  ;;  %6377 = vmatprep.mubr.msk.f32.mxu0 %vm1079_vm0, %v2661_v4  ;;  %6399 = vmatprep.mubr.msk.f32.mxu1 %vm1079_vm0, %v2661_v4  ;;  %v2664_v58 = vadd.f32 %v2659_v14, %v2636_v63  ;;  %v5588_v6 = vld [vmem:[%s9174_s11 + $0xd0] sm:$0xff] }
 0x6a3   : > { %6378 = vmatmul.mubr.msk.f32.vlgmr.msra.gmra.mxu0 %vm1079_vm0, %v2662_v8  ;;  %6400 = vmatmul.mubr.msk.f32.vlgmr.msra.gmra.mxu1 %vm1079_vm0, %v2662_v8  ;;  %v3313_v63 = vld [vmem:[%s9174_s11 + $0x10] sm:$0xff] }
 0x6a4   : > { %v2663_v27 = vadd.f32 %v2654_v37, %v2635_v9  ;;  %6428 = vmatpush3.msra.mxu1 %v5569_v39  ;;  %v5661_v9 = vld [vmem:[%s9173_s10 + $0x58] sm:$0xff]  ;;  %v5660_v14 = vld [vmem:[%s9173_s10 + $0x50] sm:$0xff] }
 0x6a5   : > { %6429 = vmatprep.subr.mxu1 %v5568_v40  ;;  %v3314_v37 = vld [vmem:[%s9174_s11 + $0x18] sm:$0xff] }
 0x6a6   : > { %6430 = vmatpush3.msra.mxu1 %v5568_v40  ;;  %6380 = vmatprep.mubr.msk.f32.mxu0 %vm1079_vm0, %v2663_v27  ;;  %v5589_v40 = vld [vmem:[%s9174_s11 + $0xd8] sm:$0xff] }
 0x6a7   : > { %6402 = vmatprep.mubr.msk.f32.mxu1 %vm1079_vm0, %v2663_v27  ;;  %6431 = vmatprep.subr.mxu1 %v5567_v29 }
 0x6a8   : > { %6381 = vmatmul.mubr.msk.f32.gmra.mxu0 %vm1079_vm0, %v2664_v58  ;;  %6403 = vmatmul.mubr.msk.f32.gmra.mxu1 %vm1079_vm0, %v2664_v58 }
 0x6a9   : > { %6432 = vmatpush3.msra.mxu1 %v5567_v29  ;;  %6443 = vmatprep.mubr.msk.f32.mxu1 %vm1079_vm0, %v2661_v4  ;;  %v5587_v4 = vld [vmem:[%s9174_s11 + $0xc8] sm:$0xff]  ;;  %v3315_v29 = vld [vmem:[%s9174_s11 + $0x20] sm:$0xff] }
 0x6aa   : > { %6433 = vmatprep.subr.mxu1 %v5566_v55  ;;  %6413 = vmatprep.mubr.msk.f32.mxu0 %vm2869_vm2, %v5556_v1  ;;  %v3318_v1 = vld [vmem:[%s9174_s11 + $0x38] sm:$0xff] }
 0x6ab   : > { %6434 = vmatpush3.msra.mxu1 %v5566_v55  ;;  %v3316_v55 = vld [vmem:[%s9174_s11 + $0x28] sm:$0xff] }
 0x6ac   : > { %6435 = vmatprep.subr.mxu1 %v5565_v15 }
 0x6ad   : > { %6436 = vmatpush3.msra.mxu1 %v5565_v15  ;;  %v5592_v15 = vld [vmem:[%s9174_s11 + $0xf0] sm:$0xff] }
 0x6ae   : > { %6437 = vmatprep.subr.mxu1 %v5564_v22 }
 0x6af   : > { %6438 = vmatpush3.msra.mxu1 %v5564_v22  ;;  %v3317_v22 = vld [vmem:[%s9174_s11 + $0x30] sm:$0xff] }
 0x6b0   : > { %6439 = vmatprep.subr.mxu1 %v5563_v34 }
 0x6b1   : > { %6440 = vmatpush3.msra.mxu1 %v5563_v34  ;;  %v5659_v34 = vld [vmem:[%s9173_s10 + $0x48] sm:$0xff] }
 0x6b2   : > { %6441 = vmatprep.subr.mxu1 %v5562_v38 }
 0x6b3   : > { %6442 = vmatpush3.msra.mxu1 %v5562_v38  ;;  %v5593_v38 = vld [vmem:[%s9174_s11 + $0xf8] sm:$0xff] }
 0x6b4   : > { %6444 = vmatmul.mubr.msk.f32.vlgmr.msra.gmra.mxu1 %vm1079_vm0, %v2662_v8  ;;  %6471 = vmatprep.subr.mxu1 %v5583_v19  ;;  %v3312_v8 = vld [vmem:[%s9174_s11 + $0x8] sm:$0xff] }
 0x6b5   : > { %6446 = vmatprep.mubr.msk.f32.mxu1 %vm1079_vm0, %v2663_v27  ;;  %6472 = vmatpush3.msra.mxu1 %v5583_v19  ;;  %v5590_v27 = vld [vmem:[%s9174_s11 + $0xe0] sm:$0xff] }
 0x6b6   : > { %6473 = vmatprep.subr.mxu1 %v5582_v23  ;;  %v5602_v19 = vld [vmem:[%s9174_s11 + $0x140] sm:$0xff] }
 0x6b7   : > { %6474 = vmatpush3.msra.mxu1 %v5582_v23  ;;  %v5603_v23 = vld [vmem:[%s9174_s11 + $0x148] sm:$0xff] }
 0x6b8   : > { %6447 = vmatmul.mubr.msk.f32.gmra.mxu1 %vm1079_vm0, %v2664_v58  ;;  %6475 = vmatprep.subr.mxu1 %v5581_v10  ;;  %v5591_v58 = vld [vmem:[%s9174_s11 + $0xe8] sm:$0xff] }
 0x6b9   : > { %6476 = vmatpush3.msra.mxu1 %v5581_v10  ;;  %v5604_v10 = vld [vmem:[%s9174_s11 + $0x150] sm:$0xff] }
 0x6ba   : > { %6477 = vmatprep.subr.mxu1 %v5580_v28 }
 0x6bb   : > { %6478 = vmatpush3.msra.mxu1 %v5580_v28  ;;  %v5605_v28 = vld [vmem:[%s9174_s11 + $0x158] sm:$0xff] }
 0x763   : > { %v6401_v0 = vpop.f32.mrf.mxu1  ;;  %v6379_v31 = vpop.f32.mrf.mxu0 }
 0x765   : > { %v2847_v48 = vpop.f32.mrf.mxu1  ;;  %v2751_v53 = vpop.f32.mrf.mxu0 }
 0x768   : > { %v6404_v32 = vpop.f32.mrf.mxu1  ;;  %v6382_v59 = vpop.f32.mrf.mxu0 }
 0x769   : > { %6405 = vmatprep.subr.mxu0 %v6404_v32 }
 0x76a   : > { %v2857_v44 = vpop.f32.mrf.mxu1  ;;  %6406 = vmatpush3.msra.mxu0 %v6404_v32  ;;  %v2761_v11 = vpop.f32.mrf.mxu0  ;;  %v5595_v32 = vld [vmem:[%s9174_s11 + $0x108] sm:$0xff] }
 0x76b   : > { %6407 = vmatprep.subr.mxu0 %v2857_v44 }
 0x76c   : > { %6408 = vmatpush3.msra.mxu0 %v2857_v44  ;;  %v5596_v44 = vld [vmem:[%s9174_s11 + $0x110] sm:$0xff] }
 0x76d   : > { %6409 = vmatprep.subr.mxu0 %v6401_v0 }
 0x76e   : > { %6410 = vmatpush3.msra.mxu0 %v6401_v0  ;;  %v5594_v0 = vld [vmem:[%s9174_s11 + $0x100] sm:$0xff] }
 0x76f   : > { %6411 = vmatprep.subr.mxu0 %v2847_v48 }
 0x770   : > { %6412 = vmatpush3.msra.mxu0 %v2847_v48  ;;  %v3319_v48 = vld [vmem:[%s9174_s11 + $0x40] sm:$0xff] }
 0x771   : > { %6416 = vmatprep.subr.mxu0 %v6382_v59  ;;  %6414 = vmatmul.mubr.msk.f32.vlgmr.msra.gmra.mxu0 %vm2869_vm2, %v5557_v20  ;;  %v5715_v20 = vld [vmem:[%s9173_s10 + $0x78] sm:$0xff] }
 0x772   : > { %6417 = vmatpush3.msra.mxu0 %v6382_v59  ;;  %6424 = vmatprep.mubr.msk.f32.mxu0 %vm2869_vm2, %v2770_v25  ;;  %v3321_v59 = vld [vmem:[%s9174_s11 + $0x50] sm:$0xff]  ;;  %v5597_v25 = vld [vmem:[%s9174_s11 + $0x118] sm:$0xff] }
 0x773   : > { %6418 = vmatprep.subr.mxu0 %v2761_v11 }
 0x774   : > { %v6445_v2 = vpop.f32.mrf.mxu1  ;;  %6419 = vmatpush3.msra.mxu0 %v2761_v11  ;;  %v3322_v11 = vld [vmem:[%s9174_s11 + $0x58] sm:$0xff] }
 0x775   : > { %6420 = vmatprep.subr.mxu0 %v6379_v31 }
 0x776   : > { %v3107_v43 = vpop.f32.mrf.mxu1  ;;  %6421 = vmatpush3.msra.mxu0 %v6379_v31  ;;  %v5658_v31 = vld [vmem:[%s9173_s10 + $0x40] sm:$0xff] }
 0x777   : > { %6422 = vmatprep.subr.mxu0 %v2751_v53 }
 0x778   : > { %v6448_v16 = vpop.f32.mrf.mxu1  ;;  %6423 = vmatpush3.msra.mxu0 %v2751_v53  ;;  %v3320_v53 = vld [vmem:[%s9174_s11 + $0x48] sm:$0xff] }
 0x779   : > { %6425 = vmatmul.mubr.msk.f32.vlgmr.msra.gmra.mxu0 %vm2869_vm2, %v2771_v52  ;;  %6449 = vmatprep.subr.mxu0 %v6448_v16  ;;  %v5599_v52 = vld [vmem:[%s9174_s11 + $0x128] sm:$0xff] }
 0x77a   : > { %v3117_v17 = vpop.f32.mrf.mxu1  ;;  %6450 = vmatpush3.msra.mxu0 %v6448_v16  ;;  %6457 = vmatprep.mubr.msk.f32.mxu0 %vm2869_vm2, %v5574_v49  ;;  %v3324_v49 = vld [vmem:[%s9174_s11 + $0x68] sm:$0xff]  ;;  %v5600_v16 = vld [vmem:[%s9174_s11 + $0x130] sm:$0xff] }
 0x77b   : > { %6451 = vmatprep.subr.mxu0 %v3117_v17 }
 0x77c   : > { %6452 = vmatpush3.msra.mxu0 %v3117_v17  ;;  %v3325_v17 = vld [vmem:[%s9174_s11 + $0x70] sm:$0xff] }
 0x77d   : > { %6453 = vmatprep.subr.mxu0 %v6445_v2 }
 0x77e   : > { %6454 = vmatpush3.msra.mxu0 %v6445_v2  ;;  %v5598_v2 = vld [vmem:[%s9174_s11 + $0x120] sm:$0xff] }
 0x77f   : > { %6455 = vmatprep.subr.mxu0 %v3107_v43 }
 0x780   : > { %6456 = vmatpush3.msra.mxu0 %v3107_v43  ;;  %v3323_v43 = vld [vmem:[%s9174_s11 + $0x60] sm:$0xff] }
 0x781   : > { %6458 = vmatmul.mubr.msk.f32.vlgmr.msra.gmra.mxu0 %vm2869_vm2, %v5575_v47  ;;  %6460 = vmatprep.subr.mxu0 %v3229_v18  ;;  %v5601_v47 = vld [vmem:[%s9174_s11 + $0x138] sm:$0xff] }
 0x782   : > { %6461 = vmatpush3.msra.mxu0 %v3229_v18  ;;  %v3326_v18 = vld [vmem:[%s9174_s11 + $0x78] sm:$0xff] }
 0x783   : > { %6462 = vmatprep.subr.mxu0 %v3228_v21 }
 0x784   : > { %6463 = vmatpush3.msra.mxu0 %v3228_v21  ;;  %v3327_v21 = vld [vmem:[%s9174_s11 + $0x80] sm:$0xff] }
 0x785   : > { %6464 = vmatprep.subr.mxu0 %v3227_v24 }
 0x786   : > { %6465 = vmatpush3.msra.mxu0 %v3227_v24  ;;  %v3328_v24 = vld [vmem:[%s9174_s11 + $0x88] sm:$0xff] }
 0x787   : > { %6466 = vmatprep.subr.mxu0 %v3226_v26 }
 0x788   : > { %6467 = vmatpush3.msra.mxu0 %v3226_v26  ;;  %v3329_v26 = vld [vmem:[%s9174_s11 + $0x90] sm:$0xff] }
 0x831   : > { %v6415_v30 = vpop.f32.mrf.mxu0 }
 0x833   : > { %v2942_v35 = vpop.f32.mrf.mxu0 }
 0x839   : > { %v6426_v42 = vpop.f32.mrf.mxu0 }
 0x83a   : > { %v3029_v39 = vadd.f32 %v6426_v42, %v6415_v30  ;;  %v3330_v30 = vld [vmem:[%s9174_s11 + $0x98] sm:$0xff]  ;;  %v3331_v42 = vld [vmem:[%s9174_s11 + $0xa0] sm:$0xff] }
 0x83b   : > { %v3023_v13 = vpop.f32.mrf.mxu0 }
 0x83c   : > { %v3024_v61 = vadd.f32 %v3023_v13, %v2942_v35  ;;  %v5606_v35 = vld [vmem:[%s9174_s11 + $0x160] sm:$0xff]  ;;  %v5607_v13 = vld [vmem:[%s9174_s11 + $0x168] sm:$0xff] }
 0x841   : > { %v6459_v41 = vpop.f32.mrf.mxu0 }
 0x842   : > { %v3211_v45 = vadd.f32 %v6459_v41, %v3029_v39  ;;  %v3332_v39 = vld [vmem:[%s9174_s11 + $0xa8] sm:$0xff]  ;;  %v5608_v41 = vld [vmem:[%s9174_s11 + $0x170] sm:$0xff] }
 0x843   : > { %v3201_v3 = vpop.f32.mrf.mxu0 }
 0x844   : > { %v3210_v12 = vadd.f32 %v3201_v3, %v3024_v61  ;;  %v8482_v57 = vadd.f32 %v3222_v51, %v3211_v45  ;;  %v3333_v61 = vld [vmem:[%s9174_s11 + $0xb0] sm:$0xff]  ;;  %v5609_v45 = vld [vmem:[%s9174_s11 + $0x178] sm:$0xff]  ;;  %v5712_v51 = vld [vmem:[%s9173_s10 + $0x60] sm:$0xff] }
 0x845   : > { %v3334_v3 = vld [vmem:[%s9174_s11 + $0xb8] sm:$0xff] }
 0x846   : > { %v8480_v50 = vadd.f32 %v3217_v46, %v3210_v12  ;;  %v5714_v12 = vld [vmem:[%s9173_s10 + $0x70] sm:$0xff]  ;;  %v5713_v46 = vld [vmem:[%s9173_s10 + $0x68] sm:$0xff] }
 0x848   : > { %6468 = vmatprep.mubr.msk.f32.mxu0 %vm2869_vm2, %v8480_v50  ;;  %6479 = vmatprep.mubr.msk.f32.mxu1 %vm2869_vm2, %v8480_v50 }
 0x849   : > { %6469 = vmatmul.mubr.msk.f32.vlgmr.msra.gmra.mxu0 %vm2869_vm2, %v8482_v57  ;;  %6480 = vmatmul.mubr.msk.f32.vlgmr.msra.gmra.mxu1 %vm2869_vm2, %v8482_v57 }
 0x84a   : > { %6486 = vmatprep.mubr.msk.f32.mxu0 %vm3440_vm3, %v5586_v7  ;;  %6526 = vmatprep.mubr.msk.f32.mxu1 %vm3440_vm3, %v3311_v56  ;;  %v5718_v7 = vld [vmem:[%s9174_s11 + $0x240] sm:$0xff] }
 0x909   : > { %v6470_v62 = vpop.f32.mrf.mxu0  ;;  %v6481_v54 = vpop.f32.mrf.mxu1 }
 0x90a   : > { %6482 = vmatprep.subr.mxu0 %v6481_v54  ;;  %6522 = vmatprep.subr.mxu1 %v6470_v62 }
 0x90b   : > { %v3302_v5 = vpop.f32.mrf.mxu0  ;;  %v3406_v60 = vpop.f32.mrf.mxu1  ;;  %6483 = vmatpush3.msra.mxu0 %v6481_v54  ;;  %6523 = vmatpush3.msra.mxu1 %v6470_v62 }
 0x90c   : > { %6484 = vmatprep.subr.mxu0 %v3406_v60  ;;  %6524 = vmatprep.subr.mxu1 %v3302_v5 }
 0x90d   : > { %6485 = vmatpush3.msra.mxu0 %v3406_v60  ;;  %6525 = vmatpush3.msra.mxu1 %v3302_v5 }
 0x90e   : > { %6487 = vmatmul.mubr.msk.f32.vlgmr.msra.gmra.mxu0 %vm3440_vm3, %v5587_v4  ;;  %6527 = vmatmul.mubr.msk.f32.vlgmr.msra.gmra.mxu1 %vm3440_vm3, %v3312_v8 }
 0x90f   : > { %6489 = vmatprep.mubr.msk.f32.mxu0 %vm3440_vm3, %v5588_v6  ;;  %6529 = vmatprep.mubr.msk.f32.mxu1 %vm3440_vm3, %v3313_v63 }
 0x910   : > { %6562 = vmatprep.subr.mxu0 %v5661_v9 }
 0x911   : > { %6563 = vmatpush3.msra.mxu0 %v5661_v9 }
 0x912   : > { %6490 = vmatmul.mubr.msk.f32.gmra.mxu0 %vm3440_vm3, %v5589_v40  ;;  %6530 = vmatmul.mubr.msk.f32.gmra.mxu1 %vm3440_vm3, %v3314_v37 }
 0x913   : > { %6492 = vmatprep.mubr.msk.f32.mxu0 %vm3440_vm3, %v5590_v27  ;;  %6532 = vmatprep.mubr.msk.f32.mxu1 %vm3440_vm3, %v3315_v29 }
 0x914   : > { %6564 = vmatprep.subr.mxu0 %v5660_v14 }
 0x915   : > { %6565 = vmatpush3.msra.mxu0 %v5660_v14 }
 0x916   : > { %6493 = vmatmul.mubr.msk.f32.gmra.mxu0 %vm3440_vm3, %v5591_v58  ;;  %6533 = vmatmul.mubr.msk.f32.gmra.mxu1 %vm3440_vm3, %v3316_v55 }
 0x917   : > { %6495 = vmatprep.mubr.msk.f32.mxu0 %vm3440_vm3, %v5592_v15  ;;  %6535 = vmatprep.mubr.msk.f32.mxu1 %vm3440_vm3, %v3317_v22 }
 0x918   : > { %6566 = vmatprep.subr.mxu0 %v5659_v34 }
 0x919   : > { %6567 = vmatpush3.msra.mxu0 %v5659_v34 }
 0x91a   : > { %6496 = vmatmul.mubr.msk.f32.gmra.mxu0 %vm3440_vm3, %v5593_v38  ;;  %6536 = vmatmul.mubr.msk.f32.gmra.mxu1 %vm3440_vm3, %v3318_v1 }
 0x91b   : > { %6498 = vmatprep.mubr.msk.f32.mxu0 %vm3440_vm3, %v5594_v0  ;;  %6538 = vmatprep.mubr.msk.f32.mxu1 %vm3440_vm3, %v3319_v48 }
 0x91c   : > { %6568 = vmatprep.subr.mxu0 %v5658_v31 }
 0x91d   : > { %6569 = vmatpush3.msra.mxu0 %v5658_v31 }
 0x91e   : > { %6499 = vmatmul.mubr.msk.f32.gmra.mxu0 %vm3440_vm3, %v5595_v32  ;;  %6539 = vmatmul.mubr.msk.f32.gmra.mxu1 %vm3440_vm3, %v3320_v53 }
 0x91f   : > { %6501 = vmatprep.mubr.msk.f32.mxu0 %vm3440_vm3, %v5596_v44  ;;  %6541 = vmatprep.mubr.msk.f32.mxu1 %vm3440_vm3, %v3321_v59 }
 0x920   : > { %6613 = vmatprep.subr.mxu0 %v5715_v20 }
 0x922   : > { %6502 = vmatmul.mubr.msk.f32.gmra.mxu0 %vm3440_vm3, %v5597_v25  ;;  %6542 = vmatmul.mubr.msk.f32.gmra.mxu1 %vm3440_vm3, %v3322_v11 }
 0x923   : > { %6504 = vmatprep.mubr.msk.f32.mxu0 %vm3440_vm3, %v5598_v2  ;;  %6544 = vmatprep.mubr.msk.f32.mxu1 %vm3440_vm3, %v3323_v43 }
 0x926   : > { %6505 = vmatmul.mubr.msk.f32.gmra.mxu0 %vm3440_vm3, %v5599_v52  ;;  %6545 = vmatmul.mubr.msk.f32.gmra.mxu1 %vm3440_vm3, %v3324_v49 }
 0x927   : > { %6507 = vmatprep.mubr.msk.f32.mxu0 %vm3440_vm3, %v5600_v16  ;;  %6547 = vmatprep.mubr.msk.f32.mxu1 %vm3440_vm3, %v3325_v17 }
 0x92a   : > { %6508 = vmatmul.mubr.msk.f32.gmra.mxu0 %vm3440_vm3, %v5601_v47  ;;  %6548 = vmatmul.mubr.msk.f32.gmra.mxu1 %vm3440_vm3, %v3326_v18 }
 0x92b   : > { %6510 = vmatprep.mubr.msk.f32.mxu0 %vm3440_vm3, %v5602_v19  ;;  %6550 = vmatprep.mubr.msk.f32.mxu1 %vm3440_vm3, %v3327_v21 }
 0x92e   : > { %6511 = vmatmul.mubr.msk.f32.gmra.mxu0 %vm3440_vm3, %v5603_v23  ;;  %6551 = vmatmul.mubr.msk.f32.gmra.mxu1 %vm3440_vm3, %v3328_v24 }
 0x92f   : > { %6513 = vmatprep.mubr.msk.f32.mxu0 %vm3440_vm3, %v5604_v10  ;;  %6553 = vmatprep.mubr.msk.f32.mxu1 %vm3440_vm3, %v3329_v26 }
 0x932   : > { %6514 = vmatmul.mubr.msk.f32.gmra.mxu0 %vm3440_vm3, %v5605_v28  ;;  %6554 = vmatmul.mubr.msk.f32.gmra.mxu1 %vm3440_vm3, %v3330_v30 }
 0x933   : > { %6516 = vmatprep.mubr.msk.f32.mxu0 %vm3440_vm3, %v5606_v35  ;;  %6556 = vmatprep.mubr.msk.f32.mxu1 %vm3440_vm3, %v3331_v42 }
 0x936   : > { %6517 = vmatmul.mubr.msk.f32.gmra.mxu0 %vm3440_vm3, %v5607_v13  ;;  %6557 = vmatmul.mubr.msk.f32.gmra.mxu1 %vm3440_vm3, %v3332_v39 }
 0x937   : > { %6519 = vmatprep.mubr.msk.f32.mxu0 %vm3440_vm3, %v5608_v41  ;;  %6559 = vmatprep.mubr.msk.f32.mxu1 %vm3440_vm3, %v3333_v61 }
 0x93a   : > { %6520 = vmatmul.mubr.msk.f32.gmra.mxu0 %vm3440_vm3, %v5609_v45  ;;  %6560 = vmatmul.mubr.msk.f32.gmra.mxu1 %vm3440_vm3, %v3334_v3 }
 0x93b   : > { %6570 = vmatprep.mubr.msk.f32.mxu0 %vm2869_vm2, %v8480_v50 }
 0x93e   : > { %6571 = vmatmul.mubr.msk.f32.vlgmr.msra.gmra.mxu0 %vm2869_vm2, %v8482_v57 }
 0x93f   : > { %6614 = vmatpush3.msra.mxu0 %v5715_v20  ;;  %6621 = vmatprep.mubr.msk.f32.mxu0 %vm2869_vm2, %v8480_v50  ;;  %v5664_v50 = vld [vmem:[%s9174_s11 + $0x180] sm:$0xff] }
 0x940   : > { %6615 = vmatprep.subr.mxu0 %v5714_v12  ;;  %6577 = vmatprep.mubr.msk.f32.mxu1 %vm3440_vm3, %v5664_v50 }
 0x941   : > { %6616 = vmatpush3.msra.mxu0 %v5714_v12 }
 0x942   : > { %6617 = vmatprep.subr.mxu0 %v5713_v46 }
 0x943   : > { %6618 = vmatpush3.msra.mxu0 %v5713_v46 }
 0x944   : > { %6619 = vmatprep.subr.mxu0 %v5712_v51 }
 0x945   : > { %6620 = vmatpush3.msra.mxu0 %v5712_v51 }
 0x946   : > { %6622 = vmatmul.mubr.msk.f32.vlgmr.msra.gmra.mxu0 %vm2869_vm2, %v8482_v57 }
 0x947   : > { %6628 = vmatprep.mubr.msk.f32.mxu0 %vm3440_vm3, %v5718_v7 }
 0x9ce   : > { %v6488_v56 = vpop.f32.mrf.mxu0  ;;  %v6528_v62 = vpop.f32.mrf.mxu1 }
 0x9cf   : > { %v8724_v54 = vadd.f32 %v6528_v62, %v6488_v56 }
 0x9d0   : > { %v3579_v5 = vpop.f32.mrf.mxu0  ;;  %v3836_v60 = vpop.f32.mrf.mxu1 }
 0x9d1   : > { %v8726_v4 = vadd.f32 %v3836_v60, %v3579_v5 }
 0x9d2   : > { %v8728_v57 = vpop.f32.mrf.mxu0  ;;  %v8730_v8 = vpop.f32.mrf.mxu1 }
 0x9d4   : > { %v8732_v6 = vpop.f32.mrf.mxu0  ;;  %v8734_v63 = vpop.f32.mrf.mxu1 }
 0x9d6   : > { %v8736_v9 = vpop.f32.mrf.mxu0  ;;  %v8738_v40 = vpop.f32.mrf.mxu1 }
 0x9d8   : > { %v8740_v37 = vpop.f32.mrf.mxu0  ;;  %v8742_v27 = vpop.f32.mrf.mxu1 }
 0x9da   : > { %v8744_v29 = vpop.f32.mrf.mxu0  ;;  %v8746_v14 = vpop.f32.mrf.mxu1 }
 0x9dc   : > { %v8748_v58 = vpop.f32.mrf.mxu0  ;;  %v8750_v55 = vpop.f32.mrf.mxu1 }
 0x9de   : > { %v6500_v15 = vpop.f32.mrf.mxu0  ;;  %v6540_v22 = vpop.f32.mrf.mxu1 }
 0x9df   : > { %v8752_v34 = vadd.f32 %v6540_v22, %v6500_v15  ;;  %v5665_v15 = vld [vmem:[%s9174_s11 + $0x188] sm:$0xff]  ;;  %v5666_v22 = vld [vmem:[%s9174_s11 + $0x190] sm:$0xff] }
 0x9e0   : > { %v3619_v38 = vpop.f32.mrf.mxu0  ;;  %v3876_v1 = vpop.f32.mrf.mxu1 }
 0x9e1   : > { %v8754_v0 = vadd.f32 %v3876_v1, %v3619_v38  ;;  %v5667_v38 = vld [vmem:[%s9174_s11 + $0x198] sm:$0xff]  ;;  %v5668_v1 = vld [vmem:[%s9174_s11 + $0x1a0] sm:$0xff] }
 0x9e2   : > { %v6503_v48 = vpop.f32.mrf.mxu0  ;;  %v6543_v31 = vpop.f32.mrf.mxu1 }
 0x9e3   : > { %v8756_v32 = vadd.f32 %v6543_v31, %v6503_v48 }
 0x9e4   : > { %v3629_v53 = vpop.f32.mrf.mxu0  ;;  %v3886_v44 = vpop.f32.mrf.mxu1 }
 0x9e5   : > { %v8758_v59 = vadd.f32 %v3886_v44, %v3629_v53  ;;  %v5719_v53 = vld [vmem:[%s9174_s11 + $0x248] sm:$0xff] }
 0x9e6   : > { %v6506_v20 = vpop.f32.mrf.mxu0  ;;  %v6546_v25 = vpop.f32.mrf.mxu1  ;;  %v5669_v44 = vld [vmem:[%s9174_s11 + $0x1a8] sm:$0xff] }
 0x9e7   : > { %v8760_v11 = vadd.f32 %v6546_v25, %v6506_v20  ;;  %v5720_v20 = vld [vmem:[%s9174_s11 + $0x250] sm:$0xff] }
 0x9e8   : > { %v3639_v2 = vpop.f32.mrf.mxu0  ;;  %v3896_v43 = vpop.f32.mrf.mxu1  ;;  %v5670_v25 = vld [vmem:[%s9174_s11 + $0x1b0] sm:$0xff] }
 0x9e9   : > { %v8762_v52 = vadd.f32 %v3896_v43, %v3639_v2  ;;  %v5721_v2 = vld [vmem:[%s9174_s11 + $0x258] sm:$0xff] }
 0x9ea   : > { %v6509_v49 = vpop.f32.mrf.mxu0  ;;  %v6549_v16 = vpop.f32.mrf.mxu1  ;;  %v5671_v43 = vld [vmem:[%s9174_s11 + $0x1b8] sm:$0xff] }
 0x9eb   : > { %v8764_v17 = vadd.f32 %v6549_v16, %v6509_v49  ;;  %v5722_v49 = vld [vmem:[%s9174_s11 + $0x260] sm:$0xff] }
 0x9ec   : > { %v3649_v47 = vpop.f32.mrf.mxu0  ;;  %v3906_v18 = vpop.f32.mrf.mxu1  ;;  %v5672_v16 = vld [vmem:[%s9174_s11 + $0x1c0] sm:$0xff] }
 0x9ed   : > { %v8766_v19 = vadd.f32 %v3906_v18, %v3649_v47  ;;  %v5723_v47 = vld [vmem:[%s9174_s11 + $0x268] sm:$0xff] }
 0x9ee   : > { %v6512_v21 = vpop.f32.mrf.mxu0  ;;  %v6552_v23 = vpop.f32.mrf.mxu1  ;;  %v5673_v18 = vld [vmem:[%s9174_s11 + $0x1c8] sm:$0xff] }
 0x9ef   : > { %v8768_v24 = vadd.f32 %v6552_v23, %v6512_v21  ;;  %v5724_v21 = vld [vmem:[%s9174_s11 + $0x270] sm:$0xff] }
 0x9f0   : > { %v3659_v10 = vpop.f32.mrf.mxu0  ;;  %v3916_v26 = vpop.f32.mrf.mxu1  ;;  %v5674_v23 = vld [vmem:[%s9174_s11 + $0x1d0] sm:$0xff] }
 0x9f1   : > { %v8770_v28 = vadd.f32 %v3916_v26, %v3659_v10  ;;  %v5725_v10 = vld [vmem:[%s9174_s11 + $0x278] sm:$0xff] }
 0x9f2   : > { %v6515_v30 = vpop.f32.mrf.mxu0  ;;  %v6555_v35 = vpop.f32.mrf.mxu1  ;;  %v5675_v26 = vld [vmem:[%s9174_s11 + $0x1d8] sm:$0xff] }
 0x9f3   : > { %v8772_v42 = vadd.f32 %v6555_v35, %v6515_v30  ;;  %v5726_v30 = vld [vmem:[%s9174_s11 + $0x280] sm:$0xff] }
 0x9f4   : > { %v3669_v13 = vpop.f32.mrf.mxu0  ;;  %v3926_v39 = vpop.f32.mrf.mxu1  ;;  %v5676_v35 = vld [vmem:[%s9174_s11 + $0x1e0] sm:$0xff] }
 0x9f5   : > { %v8774_v41 = vadd.f32 %v3926_v39, %v3669_v13  ;;  %v5727_v13 = vld [vmem:[%s9174_s11 + $0x288] sm:$0xff] }
 0x9f6   : > { %v6518_v61 = vpop.f32.mrf.mxu0  ;;  %v6558_v45 = vpop.f32.mrf.mxu1  ;;  %v5677_v39 = vld [vmem:[%s9174_s11 + $0x1e8] sm:$0xff] }
 0x9f7   : > { %v8776_v3 = vadd.f32 %v6558_v45, %v6518_v61  ;;  %v5728_v61 = vld [vmem:[%s9174_s11 + $0x290] sm:$0xff] }
 0x9f8   : > { %v3679_v12 = vpop.f32.mrf.mxu0  ;;  %v3936_v46 = vpop.f32.mrf.mxu1  ;;  %v5678_v45 = vld [vmem:[%s9174_s11 + $0x1f0] sm:$0xff] }
 0x9f9   : > { %v8778_v51 = vadd.f32 %v3936_v46, %v3679_v12  ;;  %v5729_v12 = vld [vmem:[%s9174_s11 + $0x298] sm:$0xff] }
 0x9fa   : > { %v6521_v50 = vpop.f32.mrf.mxu0  ;;  %v6561_v7 = vpop.f32.mrf.mxu1  ;;  %v5679_v46 = vld [vmem:[%s9174_s11 + $0x1f8] sm:$0xff] }
 0x9fb   : > { %v8780_v56 = vadd.f32 %v6561_v7, %v6521_v50  ;;  %v5730_v50 = vld [vmem:[%s9174_s11 + $0x2a0] sm:$0xff] }
 0x9fc   : > { %v8782_v62 = vpop.f32.mrf.mxu0  ;;  %v5680_v7 = vld [vmem:[%s9174_s11 + $0x200] sm:$0xff] }
 0x9fe   : > { %v6572_v5 = vpop.f32.mrf.mxu0 }
 0x9ff   : > { %6573 = vmatprep.subr.mxu1 %v6572_v5 }
 0xa00   : > { %v4026_v60 = vpop.f32.mrf.mxu0  ;;  %6574 = vmatpush3.msra.mxu1 %v6572_v5  ;;  %v5731_v5 = vld [vmem:[%s9174_s11 + $0x2a8] sm:$0xff] }
 0xa01   : > { %6575 = vmatprep.subr.mxu1 %v4026_v60 }
 0xa02   : > { %6576 = vmatpush3.msra.mxu1 %v4026_v60  ;;  %v5681_v60 = vld [vmem:[%s9174_s11 + $0x208] sm:$0xff] }
 0xa03   : > { %6578 = vmatmul.mubr.msk.f32.vlgmr.msra.gmra.mxu1 %vm3440_vm3, %v5665_v15  ;;  %6664 = vmatprep.subr.mxu1 %v9218_v36  ;;  %v5732_v15 = vld [vmem:[%s9174_s11 + $0x2b0] sm:$0xff] }
 0xa04   : > { %6580 = vmatprep.mubr.msk.f32.mxu1 %vm3440_vm3, %v5666_v22  ;;  %v5682_v22 = vld [vmem:[%s9174_s11 + $0x210] sm:$0xff] }
 0xa06   : > { %v6623_v48 = vpop.f32.mrf.mxu0 }
 0xa07   : > { %6624 = vmatprep.subr.mxu0 %v6623_v48  ;;  %6581 = vmatmul.mubr.msk.f32.gmra.mxu1 %vm3440_vm3, %v5667_v38  ;;  %v5733_v38 = vld [vmem:[%s9174_s11 + $0x2b8] sm:$0xff] }
 0xa08   : > { %v4412_v31 = vpop.f32.mrf.mxu0  ;;  %6625 = vmatpush3.msra.mxu0 %v6623_v48  ;;  %6583 = vmatprep.mubr.msk.f32.mxu1 %vm3440_vm3, %v5668_v1  ;;  %v5683_v1 = vld [vmem:[%s9174_s11 + $0x218] sm:$0xff]  ;;  %v5734_v48 = vld [vmem:[%s9174_s11 + $0x2c0] sm:$0xff] }
 0xa09   : > { %6626 = vmatprep.subr.mxu0 %v4412_v31 }
 0xa0a   : > { %6627 = vmatpush3.msra.mxu0 %v4412_v31  ;;  %v5684_v31 = vld [vmem:[%s9174_s11 + $0x220] sm:$0xff] }
 0xa0b   : > { %6629 = vmatmul.mubr.msk.f32.vlgmr.msra.gmra.mxu0 %vm3440_vm3, %v5719_v53  ;;  %6584 = vmatmul.mubr.msk.f32.gmra.mxu1 %vm3440_vm3, %v5669_v44  ;;  %v5735_v53 = vld [vmem:[%s9174_s11 + $0x2c8] sm:$0xff] }
 0xa0c   : > { %6631 = vmatprep.mubr.msk.f32.mxu0 %vm3440_vm3, %v5720_v20  ;;  %6586 = vmatprep.mubr.msk.f32.mxu1 %vm3440_vm3, %v5670_v25  ;;  %v5685_v44 = vld [vmem:[%s9174_s11 + $0x228] sm:$0xff]  ;;  %v5736_v20 = vld [vmem:[%s9174_s11 + $0x2d0] sm:$0xff] }
 0xa0d   : > { %6697 = vmatprep.subr.mxu0 %v9218_v36  ;;  %v5686_v25 = vld [vmem:[%s9174_s11 + $0x230] sm:$0xff] }
 0xa0f   : > { %6632 = vmatmul.mubr.msk.f32.gmra.mxu0 %vm3440_vm3, %v5721_v2  ;;  %6587 = vmatmul.mubr.msk.f32.gmra.mxu1 %vm3440_vm3, %v5671_v43  ;;  %v5737_v2 = vld [vmem:[%s9174_s11 + $0x2d8] sm:$0xff] }
 0xa10   : > { %6634 = vmatprep.mubr.msk.f32.mxu0 %vm3440_vm3, %v5722_v49  ;;  %6589 = vmatprep.mubr.msk.f32.mxu1 %vm3440_vm3, %v5672_v16  ;;  %v5687_v43 = vld [vmem:[%s9174_s11 + $0x238] sm:$0xff]  ;;  %v5738_v49 = vld [vmem:[%s9174_s11 + $0x2e0] sm:$0xff]  ;;  %v5739_v16 = vld [vmem:[%s9174_s11 + $0x2e8] sm:$0xff] }
 0xa13   : > { %6635 = vmatmul.mubr.msk.f32.gmra.mxu0 %vm3440_vm3, %v5723_v47  ;;  %6590 = vmatmul.mubr.msk.f32.gmra.mxu1 %vm3440_vm3, %v5673_v18  ;;  %v5740_v47 = vld [vmem:[%s9174_s11 + $0x2f0] sm:$0xff]  ;;  %v5741_v18 = vld [vmem:[%s9174_s11 + $0x2f8] sm:$0xff] }
 0xa14   : > { %6637 = vmatprep.mubr.msk.f32.mxu0 %vm3440_vm3, %v5724_v21  ;;  %6592 = vmatprep.mubr.msk.f32.mxu1 %vm3440_vm3, %v5674_v23  ;;  %v6769_v21 = vmov 7   ;;  %v8972_v23 = vpop.f32.mrf.mxu1 }
 0xa15   : > { %6731 = vset.pattern.permute.xlu1 %v6769_v21  ;;  %6732 = vset.pattern.permute.xlu0 %v6769_v21 }
 0xa17   : > { %6638 = vmatmul.mubr.msk.f32.gmra.mxu0 %vm3440_vm3, %v5725_v10  ;;  %6593 = vmatmul.mubr.msk.f32.gmra.mxu1 %vm3440_vm3, %v5675_v26  ;;  %v4789_v26 = vpop.permute.xlu0 %4788 }
 0xa18   : > { %6640 = vmatprep.mubr.msk.f32.mxu0 %vm3440_vm3, %v5726_v30  ;;  %6595 = vmatprep.mubr.msk.f32.mxu1 %vm3440_vm3, %v5676_v35 }
 0xa1b   : > { %6641 = vmatmul.mubr.msk.f32.gmra.mxu0 %vm3440_vm3, %v5727_v13  ;;  %6596 = vmatmul.mubr.msk.f32.gmra.mxu1 %vm3440_vm3, %v5677_v39  ;;  %v4779_v39 = vpop.permute.xlu0 %4778 }
 0xa1c   : > { %6643 = vmatprep.mubr.msk.f32.mxu0 %vm3440_vm3, %v5728_v61  ;;  %6598 = vmatprep.mubr.msk.f32.mxu1 %vm3440_vm3, %v5678_v45 }
 0xa1f   : > { %6644 = vmatmul.mubr.msk.f32.gmra.mxu0 %vm3440_vm3, %v5729_v12  ;;  %6599 = vmatmul.mubr.msk.f32.gmra.mxu1 %vm3440_vm3, %v5679_v46  ;;  %v3852_v12 = vadd.f32 %v8730_v8, %v8728_v57 }
 0xa20   : > { %6646 = vmatprep.mubr.msk.f32.mxu0 %vm3440_vm3, %v5730_v50  ;;  %6601 = vmatprep.mubr.msk.f32.mxu1 %vm3440_vm3, %v5680_v7 }
 0xa23   : > { %6647 = vmatmul.mubr.msk.f32.gmra.mxu0 %vm3440_vm3, %v5731_v5  ;;  %6602 = vmatmul.mubr.msk.f32.gmra.mxu1 %vm3440_vm3, %v5681_v60 }
 0xa24   : > { %6649 = vmatprep.mubr.msk.f32.mxu0 %vm3440_vm3, %v5732_v15  ;;  %6604 = vmatprep.mubr.msk.f32.mxu1 %vm3440_vm3, %v5682_v22  ;;  %v4784_v15 = vpop.permute.xlu1 %4783  ;;  %v4769_v22 = vpop.permute.xlu0 %4768 }
 0xa27   : > { %6650 = vmatmul.mubr.msk.f32.gmra.mxu0 %vm3440_vm3, %v5733_v38  ;;  %6605 = vmatmul.mubr.msk.f32.gmra.mxu1 %vm3440_vm3, %v5683_v1  ;;  %v3862_v38 = vadd.f32 %v8738_v40, %v8736_v9  ;;  %v3867_v40 = vadd.f32 %v8750_v55, %v8748_v58 }
 0xa28   : > { %6652 = vmatprep.mubr.msk.f32.mxu0 %vm3440_vm3, %v5734_v48  ;;  %6607 = vmatprep.mubr.msk.f32.mxu1 %vm3440_vm3, %v5684_v31  ;;  %v4774_v9 = vpop.permute.xlu1 %4773 }
 0xa2b   : > { %6653 = vmatmul.mubr.msk.f32.gmra.mxu0 %vm3440_vm3, %v5735_v53  ;;  %6608 = vmatmul.mubr.msk.f32.gmra.mxu1 %vm3440_vm3, %v5685_v44  ;;  %v3857_v53 = vadd.f32 %v8742_v27, %v8740_v37 }
 0xa2c   : > { %6655 = vmatprep.mubr.msk.f32.mxu0 %vm3440_vm3, %v5736_v20  ;;  %6610 = vmatprep.mubr.msk.f32.mxu1 %vm3440_vm3, %v5686_v25  ;;  %v3872_v25 = vadd.f32 %v8746_v14, %v8744_v29 }
 0xa2f   : > { %6656 = vmatmul.mubr.msk.f32.gmra.mxu0 %vm3440_vm3, %v5737_v2  ;;  %6611 = vmatmul.mubr.msk.f32.gmra.mxu1 %vm3440_vm3, %v5687_v43 }
 0xa30   : > { %6658 = vmatprep.mubr.msk.f32.mxu0 %vm3440_vm3, %v5738_v49  ;;  %6680 = vmatprep.mubr.msk.f32.mxu1 %vm6770_vm4, %v9218_v36 }
 0xa33   : > { %6659 = vmatmul.mubr.msk.f32.gmra.mxu0 %vm3440_vm3, %v5739_v16 }
 0xa34   : > { %6661 = vmatprep.mubr.msk.f32.mxu0 %vm3440_vm3, %v5740_v47 }
 0xa37   : > { %6662 = vmatmul.mubr.msk.f32.gmra.mxu0 %vm3440_vm3, %v5741_v18 }
 0xa38   : > { %6713 = vmatprep.mubr.msk.f32.mxu0 %vm6770_vm4, %v9218_v36 }
 0xac3   : > { %v6579_v10 = vpop.f32.mrf.mxu1 }
 0xac5   : > { %v8974_v30 = vpop.f32.mrf.mxu1 }
 0xac7   : > { %v6582_v35 = vpop.f32.mrf.mxu1 }
 0xac8   : > { %v4320_v7 = vadd.f32 %v6582_v35, %v3852_v12 }
 0xac9   : > { %v4208_v13 = vpop.f32.mrf.mxu1 }
 0xacb   : > { %v6630_v61 = vpop.f32.mrf.mxu0  ;;  %v6585_v45 = vpop.f32.mrf.mxu1 }
 0xacc   : > { %v4322_v44 = vadd.f32 %v6585_v45, %v3862_v38  ;;  %v3847_v45 = vadd.f32 %v8734_v63, %v8732_v6  ;;  %v4764_v6 = vpop.permute.xlu1 %4763 }
 0xacd   : > { %v8978_v46 = vpop.f32.mrf.mxu0  ;;  %v4218_v50 = vpop.f32.mrf.mxu1 }
 0xace   : > { %v4321_v2 = vadd.f32 %v4218_v50, %v3857_v53 }
 0xacf   : > { %v6633_v5 = vpop.f32.mrf.mxu0  ;;  %v6588_v60 = vpop.f32.mrf.mxu1 }
 0xad0   : > { %v4706_v1 = vadd.f32 %v6633_v5, %v4320_v7  ;;  %v4324_v47 = vadd.f32 %v6588_v60, %v3872_v25  ;;  %v4319_v5 = vadd.f32 %v4208_v13, %v3847_v45  ;;  %v4736_v13 = vld [vmem:[%s9175_s12 + $0x48] sm:$0xff] }
 0xad1   : > { %v4594_v48 = vpop.f32.mrf.mxu0  ;;  %v4228_v31 = vpop.f32.mrf.mxu1 }
 0xad2   : > { %v4874_v20 = vadd.f32 %v4769_v22, %v4706_v1  ;;  %v4323_v29 = vadd.f32 %v4228_v31, %v3867_v40  ;;  %v4705_v55 = vadd.f32 %v4594_v48, %v4319_v5  ;;  %v4318_v1 = vadd.f32 %v6579_v10, %v8724_v54  ;;  %v4735_v54 = vld [vmem:[%s9175_s12 + $0x40] sm:$0xff]  ;;  %v4759_v10 = vpop.permute.xlu0 %4758 }
 0xad3   : > { %v6636_v57 = vpop.f32.mrf.mxu0  ;;  %v8984_v8 = vpop.f32.mrf.mxu1 }
 0xad4   : > { %v4708_v43 = vadd.f32 %v6636_v57, %v4322_v44  ;;  %4913 = vperm.xlu1 %6731, %v4874_v20   ;;  %v4873_v31 = vadd.f32 %v4764_v6, %v4705_v55  ;;  %v4704_v44 = vadd.f32 %v6630_v61, %v4318_v1 }
 0xad5   : > { %v4604_v49 = vpop.f32.mrf.mxu0  ;;  %v8988_v16 = vpop.f32.mrf.mxu1 }
 0xad6   : > { %v4876_v37 = vadd.f32 %v4779_v39, %v4708_v43  ;;  %v4707_v27 = vadd.f32 %v4604_v49, %v4321_v2  ;;  %v4872_v57 = vadd.f32 %v4759_v10, %v4704_v44 }
 0xad7   : > { %v6639_v18 = vpop.f32.mrf.mxu0  ;;  %v8992_v35 = vpop.f32.mrf.mxu1 }
 0xad8   : > { %v4875_v14 = vadd.f32 %v4774_v9, %v4707_v27  ;;  %v4710_v12 = vadd.f32 %v6639_v18, %v4324_v47  ;;  %4923 = vperm.xlu1 %6731, %v4876_v37  }
 0xad9   : > { %v4614_v50 = vpop.f32.mrf.mxu0  ;;  %v8996_v7 = vpop.f32.mrf.mxu1 }
 0xada   : > { %v4709_v22 = vadd.f32 %v4614_v50, %v4323_v29  ;;  %4918 = vperm.xlu0 %6732, %v4875_v14   ;;  %v4878_v39 = vadd.f32 %v4789_v26, %v4710_v12  ;;  %v4829_v12 = vpop.permute.xlu0 %4828 }
 0xadb   : > { %v8998_v58 = vpop.f32.mrf.mxu1  ;;  %v6642_v47 = vpop.f32.mrf.mxu0 }
 0xadc   : > { %v4877_v60 = vadd.f32 %v4784_v15, %v4709_v22  ;;  %v4317_v15 = vadd.f32 %v8974_v30, %v8726_v4  ;;  %v4754_v30 = vpop.permute.xlu1 %4753 }
 0xadd   : > { %v9000_v38 = vpop.f32.mrf.mxu1  ;;  %v4624_v27 = vpop.f32.mrf.mxu0 }
 0xade   : > { %4933 = vperm.xlu0 %6732, %v4878_v39   ;;  %4928 = vperm.xlu1 %6731, %v4877_v60   ;;  %v4703_v61 = vadd.f32 %v8978_v46, %v4317_v15  ;;  %v4814_v55 = vpop.permute.xlu0 %4813  ;;  %v4329_v44 = vadd.f32 %v9000_v38, %v8762_v52 }
 0xadf   : > { %v6600_v63 = vpop.f32.mrf.mxu1  ;;  %v6645_v45 = vpop.f32.mrf.mxu0 }
 0xae0   : > { %v4871_v43 = vadd.f32 %v4754_v30, %v4703_v61  ;;  %v4824_v37 = vpop.permute.xlu1 %4823  ;;  %v4332_v39 = vadd.f32 %v6600_v63, %v8764_v17  ;;  %v4328_v17 = vadd.f32 %v8992_v35, %v8756_v32  ;;  %v4326_v32 = vadd.f32 %v8984_v8, %v8752_v34 }
 0xae1   : > { %v4268_v53 = vpop.f32.mrf.mxu1  ;;  %v4634_v29 = vpop.f32.mrf.mxu0 }
 0xae2   : > { %6733 = vset.pattern.permute.xlu0 %v6768_v33  ;;  %4908 = vperm.xlu1 %6731, %v4873_v31   ;;  %v4331_v60 = vadd.f32 %v4268_v53, %v8766_v19  ;;  %v4330_v31 = vadd.f32 %v8998_v58, %v8760_v11  ;;  %v4327_v53 = vadd.f32 %v8996_v7, %v8758_v59 }
 0xae3   : > { %4798 = vperm.xlu0 %6733, %v4736_v13   ;;  %v6603_v26 = vpop.f32.mrf.mxu1  ;;  %v6648_v14 = vpop.f32.mrf.mxu0  ;;  %v4325_v59 = vadd.f32 %v8988_v16, %v8754_v0  ;;  %v4712_v7 = vadd.f32 %v6642_v47, %v4326_v32  ;;  %v4895_v16 = vld [vmem:[%s9177_s14] sm:$0xf] }
 0xae4   : > { %v9010_v48 = vadd.f32 %v6603_v26, %v8768_v24  ;;  %v4819_v18 = vpop.permute.xlu1 %4818  ;;  %v4716_v26 = vadd.f32 %v6648_v14, %v4330_v31  ;;  %v4713_v52 = vadd.f32 %v4634_v29, %v4327_v53  ;;  %v4750_v31 = vld [vmem:[%s9175_s12 + $0xb8] sm:$0xff] }
 0xae5   : > { %v4278_v20 = vpop.f32.mrf.mxu1  ;;  %v4644_v5 = vpop.f32.mrf.mxu0 }
 0xae6   : > { %6734 = vset.pattern.permute.xlu1 %v6768_v33  ;;  %v9018_v25 = vadd.f32 %v4278_v20, %v8770_v28  ;;  %v4715_v63 = vadd.f32 %v4644_v5, %v4329_v44  ;;  %v4884_v61 = vadd.f32 %v4819_v18, %v4716_v26  ;;  %v4747_v5 = vld [vmem:[%s9175_s12 + $0xa0] sm:$0xff] }
 0xae7   : > { %6735 = vset.pattern.permute.xlu0 %v6769_v21  ;;  %4793 = vperm.xlu1 %6734, %v4735_v54   ;;  %v6606_v4 = vpop.f32.mrf.mxu1  ;;  %v6651_v22 = vpop.f32.mrf.mxu0 }
 0xae8   : > { %4903 = vperm.xlu0 %6735, %v4872_v57   ;;  %v9022_v24 = vadd.f32 %v6606_v4, %v8772_v42  ;;  %v4714_v57 = vadd.f32 %v6645_v45, %v4328_v17  ;;  %v4883_v4 = vadd.f32 %v4814_v55, %v4715_v63  ;;  %v4744_v55 = vld [vmem:[%s9175_s12 + $0x88] sm:$0xff]  ;;  %v5033_v17 = vld [vmem:[%s9176_s13 + $0x20] sm:$0xff] }
 0xae9   : > { %v4288_v2 = vpop.f32.mrf.mxu1  ;;  %v5034_v63 = vld [vmem:[%s9176_s13 + $0x28] sm:$0xff] }
 0xaea   : > { %v9025_v49 = vadd.f32 %v4288_v2, %v8774_v41 }
 0xaeb   : > { %6736 = vset.pattern.permute.xlu1 %v6769_v21  ;;  %v6609_v28 = vpop.f32.mrf.mxu1 }
 0xaec   : > { %4898 = vperm.xlu1 %6736, %v4871_v43   ;;  %v9031_v46 = vadd.f32 %v6609_v28, %v8776_v3  ;;  %6737 = vset.pattern.permute.xlu0 %v6768_v33  ;;  %v4809_v3 = vpop.permute.xlu1 %4808 }
 0xaed   : > { %v4298_v42 = vpop.f32.mrf.mxu1  ;;  %v4882_v35 = vadd.f32 %v4809_v3, %v4714_v57 }
 0xaee   : > { %v9035_v9 = vadd.f32 %v4298_v42, %v8778_v51 }
 0xaef   : > { %v6612_v41 = vpop.f32.mrf.mxu1 }
 0xaf0   : > { %v9038_v40 = vadd.f32 %v6612_v41, %v8780_v56  ;;  %6738 = vset.pattern.permute.xlu1 %v6768_v33  ;;  %v4804_v50 = vpop.permute.xlu1 %4803  ;;  %v4654_v56 = vpop.f32.mrf.mxu0  ;;  %v4718_v33 = vadd.f32 %v6651_v22, %v4332_v39  ;;  %v4746_v22 = vld [vmem:[%s9175_s12 + $0x98] sm:$0xff]  ;;  %v4743_v39 = vld [vmem:[%s9175_s12 + $0x80] sm:$0xff] }
 0xaf1   : > { %v4717_v13 = vadd.f32 %v4654_v56, %v4331_v60  ;;  %v4881_v28 = vadd.f32 %v4804_v50, %v4713_v52  ;;  %v9066_v47 = vpop.f32.mrf.mxu1  ;;  %v4748_v50 = vld [vmem:[%s9175_s12 + $0xa8] sm:$0xff] }
 0xaf2   : > { %v4886_v15 = vadd.f32 %v4829_v12, %v4718_v33  ;;  %v4749_v12 = vld [vmem:[%s9175_s12 + $0xb0] sm:$0xff]  ;;  %v6654_v53 = vpop.f32.mrf.mxu0 }
 0xaf3   : > { %v4885_v19 = vadd.f32 %v4824_v37, %v4717_v13  ;;  %v4711_v37 = vadd.f32 %v4624_v27, %v4325_v59  ;;  %v5029_v13 = vld [vmem:[%s9176_s13] sm:$0xff] }
 0xb4f   : > { %v4914_v51 = vpop.permute.xlu1 %4913 }
 0xb50   : > { %v4939_v43 = vmul.f32 %v4914_v51, %v4882_v35  ;;  %v4745_v51 = vld [vmem:[%s9175_s12 + $0x90] sm:$0xff] }
 0xb53   : > { %v4924_v6 = vpop.permute.xlu1 %4923 }
 0xb54   : > { %v4941_v38 = vmul.f32 %v4924_v6, %v4884_v61  ;;  %v4664_v61 = vpop.f32.mrf.mxu0 }
 0xb55   : > { %v4919_v1 = vpop.permute.xlu0 %4918 }
 0xb56   : > { %v4940_v2 = vmul.f32 %v4919_v1, %v4883_v4 }
 0xb59   : > { %v4934_v54 = vpop.permute.xlu0 %4933  ;;  %v4929_v10 = vpop.permute.xlu1 %4928 }
 0xb5a   : > { %v4943_v20 = vmul.f32 %v4934_v54, %v4886_v15  ;;  %v4942_v11 = vmul.f32 %v4929_v10, %v4885_v19  ;;  %v5030_v54 = vld [vmem:[%s9176_s13 + $0x8] sm:$0xff]  ;;  %v5031_v10 = vld [vmem:[%s9176_s13 + $0x10] sm:$0xff]  ;;  %v5036_v19 = vld [vmem:[%s9176_s13 + $0x38] sm:$0xff] }
 0xb5c   : > { %6665 = vmatpush3.msra.mxu1 %v4943_v20  ;;  %v5035_v20 = vld [vmem:[%s9176_s13 + $0x30] sm:$0xff] }
 0xb5d   : > { %v4909_v58 = vpop.permute.xlu1 %4908  ;;  %6666 = vmatprep.subr.mxu1 %v9218_v36 }
 0xb5e   : > { %v4799_v30 = vpop.permute.xlu0 %4798  ;;  %6667 = vmatpush3.msra.mxu1 %v4942_v11  ;;  %v4938_v18 = vmul.f32 %v4909_v58, %v4881_v28  ;;  %v6657_v11 = vpop.f32.mrf.mxu0 }
 0xb5f   : > { %6668 = vmatprep.subr.mxu1 %v9218_v36  ;;  %v4880_v45 = vadd.f32 %v4799_v30, %v4712_v7 }
 0xb60   : > { %6669 = vmatpush3.msra.mxu1 %v4941_v38  ;;  %v4674_v52 = vpop.f32.mrf.mxu0 }
 0xb61   : > { %6670 = vmatprep.subr.mxu1 %v9218_v36 }
 0xb62   : > { %v4794_v42 = vpop.permute.xlu1 %4793  ;;  %6671 = vmatpush3.msra.mxu1 %v4940_v2  ;;  %v6660_v4 = vpop.f32.mrf.mxu0 }
 0xb63   : > { %v4904_v41 = vpop.permute.xlu0 %4903  ;;  %6672 = vmatprep.subr.mxu1 %v9218_v36  ;;  %v4879_v34 = vadd.f32 %v4794_v42, %v4711_v37  ;;  %v3947_v42 = vadd.f32 %v8972_v23, %v8782_v62  ;;  %v4721_v62 = vadd.f32 %v4674_v52, %v9025_v49 }
 0xb64   : > { %6673 = vmatpush3.msra.mxu1 %v4939_v43  ;;  %v4937_v8 = vmul.f32 %v4904_v41, %v4880_v45  ;;  %v4684_v30 = vpop.f32.mrf.mxu0 }
 0xb65   : > { %6674 = vmatprep.subr.mxu1 %v9218_v36  ;;  %v4339_v45 = vadd.f32 %v9066_v47, %v3947_v42 }
 0xb66   : > { %6675 = vmatpush3.msra.mxu1 %v4938_v18  ;;  %v6663_v59 = vpop.f32.mrf.mxu0 }
 0xb67   : > { %v4899_v29 = vpop.permute.xlu1 %4898  ;;  %6676 = vmatprep.subr.mxu1 %v9218_v36 }
 0xb68   : > { %v4936_v0 = vmul.f32 %v4899_v29, %v4879_v34  ;;  %6677 = vmatpush3.msra.mxu1 %v4937_v8  ;;  %v4694_v41 = vpop.f32.mrf.mxu0  ;;  %v4726_v34 = vadd.f32 %v6663_v59, %v9038_v40  ;;  %v4723_v29 = vadd.f32 %v4684_v30, %v9035_v9  ;;  %v4722_v9 = vadd.f32 %v6657_v11, %v9022_v24 }
 0xb69   : > { %6678 = vmatprep.subr.mxu1 %v9218_v36 }
 0xb6a   : > { %6679 = vmatpush3.msra.mxu1 %v4936_v0  ;;  %v4725_v0 = vadd.f32 %v4694_v41, %v4339_v45 }
 0xb6b   : > { %6681 = vmatmul.mubr.msk.f32.vlgmr.msra.gmra.mxu1 %vm1079_vm0, %v4895_v16 }
 0xb6c   : > { %6685 = vmatprep.mubr.msk.f32.mxu1 %vm5037_vm6, %v5029_v13 }
 0xc2b   : > { %v5013_v27 = vpop.f32.mrf.mxu1 }
 0xc2c   : > { %v5018_v3 = vsel %vm5017_vm5, %v5013_v27, -inf }
 0xc2d   : > { %5019 = vmax.xlane.f32.xlu1 %v5018_v3  ;;  %v6682_v14 = vpop.f32.mrf.mxu1 }
 0xc2e   : > { %v4724_v14 = vadd.f32 %v6660_v4, %v9031_v46 }
 0xc3e   : > { %4863 = vperm.xlu1 %6738, %v4749_v12  }
 0xc42   : > { %4858 = vperm.xlu1 %6738, %v4748_v50  }
 0xc46   : > { %4853 = vperm.xlu1 %6738, %v4747_v5  }
 0xc4a   : > { %4848 = vperm.xlu1 %6738, %v4746_v22  }
 0xc4e   : > { %4843 = vperm.xlu1 %6738, %v4745_v51  }
 0xc52   : > { %4838 = vperm.xlu1 %6738, %v4744_v55  }
 0xc56   : > { %4833 = vperm.xlu1 %6738, %v4743_v39  }
 0xcb6   : > { %v5020_v56 = vpop.xlane.xlu1 %5019 }
 0xcb7   : > { %v5021_v60 = vsub.f32 %v5013_v27, %v5020_v56 }
 0xcb9   : > { %v5022_v33 = vmul.f32 1.442695, %v5021_v60  ;;  %v4719_v60 = vadd.f32 %v4664_v61, %v9018_v25  ;;  %v5204_v61 = vld [vmem:[%s9178_s15] sm:$0x1] }
 0xcba   : > { %v4864_v57 = vpop.permute.xlu1 %4863 }
 0xcbb   : > { %6740 = vpow2.f32 %v5022_v33  ;;  %v4893_v12 = vadd.f32 %v4864_v57, %v4725_v0 }
 0xcbe   : > { %v4859_v58 = vpop.permute.xlu1 %4858 }
 0xcbf   : > { %v4892_v22 = vadd.f32 %v4859_v58, %v4724_v14  ;;  %v5205_v58 = vld [vmem:[#allocation2] sm:$0x1] }
 0xcc2   : > { %v4854_v38 = vpop.permute.xlu1 %4853 }
 0xcc3   : > { %v4891_v50 = vadd.f32 %v4854_v38, %v4723_v29 }
 0xcc6   : > { %v4849_v32 = vpop.permute.xlu1 %4848 }
 0xcc7   : > { %v4890_v33 = vadd.f32 %v4849_v32, %v4722_v9 }
 0xcc8   : > { %v6741_v6 = vpop.eup %6740 }
 0xcc9   : > { %v5024_v1 = vsel %vm5017_vm5, %v6741_v6, 0.0 }
 0xcca   : > { %5025 = vadd.xlane.f32.xlu0 %v5024_v1  ;;  %v4844_v43 = vpop.permute.xlu1 %4843  ;;  %v4720_v1 = vadd.f32 %v6654_v53, %v9010_v48 }
 0xccb   : > { %v4889_v55 = vadd.f32 %v4844_v43, %v4721_v62 }
 0xcce   : > { %v4839_v27 = vpop.permute.xlu1 %4838 }
 0xccf   : > { %v4888_v24 = vadd.f32 %v4839_v27, %v4720_v1 }
 0xcd2   : > { %v4834_v46 = vpop.permute.xlu1 %4833 }
 0xce0   : > { %4868 = vperm.xlu0 %6737, %v4750_v31   ;;  %v4887_v31 = vadd.f32 %v4834_v46, %v4719_v60 }
 0xce4   : > { %6739 = vset.pattern.permute.xlu0 %v6769_v21  ;;  %v5032_v21 = vld [vmem:[%s9176_s13 + $0x18] sm:$0xff] }
 0xd53   : > { %v5026_v44 = vpop.xlane.xlu0 %5025 }
 0xd54   : > { %6742 = vrcp.f32 %v5026_v44 }
 0xd5b   : > { %v4869_v37 = vpop.permute.xlu0 %4868 }
 0xd5c   : > { %v4894_v16 = vadd.f32 %v4869_v37, %v4726_v34 }
 0xd61   : > { %v6743_v26 = vpop.eup %6742 }
 0xd62   : > { %v5028_v15 = vmul.f32 %v6743_v26, %v6741_v6 }
 0xd64   : > { %6683 = vmatprep.subr.msk.mxu1 %vm5062_vm7, %v5028_v15 }
 0xd65   : > { %6684 = vmatpush3.msk.msra.mxu1 %vm5062_vm7, %v5028_v15 }
 0xd66   : > { %6686 = vmatmul.mubr.msk.f32.vlgmr.msra.gmra.mxu1 %vm5037_vm6, %v5030_v54 }
 0xd67   : > { %6688 = vmatprep.mubr.msk.f32.mxu1 %vm5037_vm6, %v5031_v10 }
 0xd6a   : > { %6689 = vmatmul.mubr.msk.f32.gmra.mxu1 %vm5037_vm6, %v5032_v21 }
 0xd6b   : > { %6691 = vmatprep.mubr.msk.f32.mxu1 %vm5037_vm6, %v5033_v17 }
 0xd6e   : > { %6692 = vmatmul.mubr.msk.f32.gmra.mxu1 %vm5037_vm6, %v5034_v63 }
 0xd6f   : > { %6694 = vmatprep.mubr.msk.f32.mxu1 %vm5037_vm6, %v5035_v20 }
 0xd72   : > { %6695 = vmatmul.mubr.msk.f32.gmra.mxu1 %vm5037_vm6, %v5036_v19 }
 0xe26   : > { %v6687_v35 = vpop.f32.mrf.mxu1 }
 0xe27   : > { %v5172_v54 = vmul.f32 %v6687_v35, %v4888_v24 }
 0xe28   : > { %v5132_v2 = vpop.f32.mrf.mxu1 }
 0xe29   : > { %v5171_v26 = vmul.f32 %v5132_v2, %v4887_v31  ;;  %v5183_v21 = vsel %vm5179_vm8, %v5172_v54, 0.0 }
 0xe2a   : > { %v6690_v7 = vpop.f32.mrf.mxu1 }
 0xe2b   : > { %v5174_v13 = vmul.f32 %v6690_v7, %v4890_v33  ;;  %v5180_v10 = vsel %vm5179_vm8, %v5171_v26, 0.0 }
 0xe2c   : > { %v5142_v28 = vpop.f32.mrf.mxu1 }
 0xe2d   : > { %v5173_v49 = vmul.f32 %v5142_v28, %v4889_v55  ;;  %v5189_v25 = vsel %vm5179_vm8, %v5174_v13, 0.0 }
 0xe2e   : > { %v6693_v18 = vpop.f32.mrf.mxu1 }
 0xe2f   : > { %v5176_v39 = vmul.f32 %v6693_v18, %v4892_v22  ;;  %v5186_v15 = vsel %vm5179_vm8, %v5173_v49, 0.0 }
 0xe30   : > { %v5152_v8 = vpop.f32.mrf.mxu1 }
 0xe31   : > { %v5175_v47 = vmul.f32 %v5152_v8, %v4891_v50  ;;  %v5195_v44 = vsel %vm5179_vm8, %v5176_v39, 0.0 }
 0xe32   : > { %v6696_v3 = vpop.f32.mrf.mxu1 }
 0xe33   : > { %v5178_v5 = vmul.f32 %v6696_v3, %v4894_v16  ;;  %v5192_v6 = vsel %vm5179_vm8, %v5175_v47, 0.0 }
 0xe34   : > { %v5162_v23 = vpop.f32.mrf.mxu1 }
 0xe35   : > { %v5177_v51 = vmul.f32 %v5162_v23, %v4893_v12  ;;  %v5201_v40 = vsel %vm5179_vm8, %v5178_v5, 0.0 }
 0xe36   : > { %5202 = vadd.xlane.f32.xlu1 %v5201_v40 }
 0xe37   : > { %v5198_v56 = vsel %vm5179_vm8, %v5177_v51, 0.0 }
 0xe38   : > { %5199 = vadd.xlane.f32.xlu0 %v5198_v56 }
 0xe3a   : > { %5193 = vadd.xlane.f32.xlu1 %v5192_v6 }
 0xe3c   : > { %5196 = vadd.xlane.f32.xlu0 %v5195_v44 }
 0xe3e   : > { %5187 = vadd.xlane.f32.xlu1 %v5186_v15 }
 0xe40   : > { %5190 = vadd.xlane.f32.xlu0 %v5189_v25 }
 0xe42   : > { %5181 = vadd.xlane.f32.xlu1 %v5180_v10 }
 0xe44   : > { %5184 = vadd.xlane.f32.xlu0 %v5183_v21 }
 0xebf   : > { %v5203_v48 = vpop.xlane.xlu1 %5202 }
 0xec0   : > { %6698 = vmatpush3.msra.mxu0 %v5203_v48 }
 0xec1   : > { %6699 = vmatprep.subr.mxu0 %v9218_v36  ;;  %v5200_v17 = vpop.xlane.xlu0 %5199 }
 0xec2   : > { %6700 = vmatpush3.msra.mxu0 %v5200_v17 }
 0xec3   : > { %v5194_v63 = vpop.xlane.xlu1 %5193  ;;  %6701 = vmatprep.subr.mxu0 %v9218_v36 }
 0xec5   : > { %v5197_v20 = vpop.xlane.xlu0 %5196 }
 0xec6   : > { %6702 = vmatpush3.msra.mxu0 %v5197_v20 }
 0xec7   : > { %6703 = vmatprep.subr.mxu0 %v9218_v36  ;;  %v5188_v19 = vpop.xlane.xlu1 %5187 }
 0xec8   : > { %6704 = vmatpush3.msra.mxu0 %v5194_v63 }
 0xec9   : > { %6705 = vmatprep.subr.mxu0 %v9218_v36  ;;  %v5191_v53 = vpop.xlane.xlu0 %5190 }
 0xeca   : > { %6706 = vmatpush3.msra.mxu0 %v5191_v53 }
 0xecb   : > { %6707 = vmatprep.subr.mxu0 %v9218_v36  ;;  %v5182_v11 = vpop.xlane.xlu1 %5181 }
 0xecc   : > { %6708 = vmatpush3.msra.mxu0 %v5188_v19 }
 0xecd   : > { %6709 = vmatprep.subr.mxu0 %v9218_v36  ;;  %v5185_v57 = vpop.xlane.xlu0 %5184 }
 0xece   : > { %6710 = vmatpush3.msra.mxu0 %v5185_v57 }
 0xecf   : > { %6711 = vmatprep.subr.mxu0 %v9218_v36 }
 0xed0   : > { %6712 = vmatpush3.msra.mxu0 %v5182_v11 }
 0xed1   : > { %6714 = vmatmul.mubr.msk.f32.vlgmr.msra.gmra.mxu0 %vm1079_vm0, %v5204_v61 }
 0xf91   : > { %v5275_v52 = vpop.f32.mrf.mxu0 }
 0xf92   : > { %v5276_v38 = vadd.f32 %v5275_v52, %v5205_v58 }
 0xf93   : > { %v6715_v4 = vpop.f32.mrf.mxu0 }
 0xf94   : > { %v5777_v30 = vmul.f32 -1.442695, %v5276_v38 }
 0xf96   : > { %6744 = vpow2.f32 %v5777_v30 }
 0xfa3   : > { %v6745_v32 = vpop.eup %6744 }
 0xfa4   : > { %v5282_v35 = vadd.f32 1.0, %v6745_v32 }
 0xfa6   : > { %6746 = vrcp.f32 %v5282_v35 }
 0xfb3   : > { %v6747_v2 = vpop.eup %6746 }
 0xfb4   : > { %5286 = vst.msk [vmem:[%s546_s22] sm:$0x1] %vm5285_vm9, %v6747_v2 }
 0xfb5 PF: > { %s29_s26 = sadd.s32 1, %s6765_s26  }
 0xfb6   : > { %p26_p4 = scmp.ge.s32.totalorder %s29_s26, 4  }
 0xfb8   :  { %28 = sbr.rel (!%p26_p4) target bundleno = 3 (0x3), region = 136 }

</bundles_post_ra>
